<compile_context>
chip_gen: v7x
topology: tpu7x:2x2x1
jax: 0.10.0
libtpu: 0.0.40
codegen_flags: <defaults>
</compile_context>

<pallas_src>
import jax
import jax.numpy as jnp
from jax.experimental import pallas as pl
from jax.experimental.pallas import tpu as pltpu

H = 32        # hidden size
E = 32        # embedding size
B = 8         # batch (grown to fill all 8 f32 sublanes)
SRC_LEN = 8   # max source length
TGT_LEN = 7   # max target length (wrapped with <s>, </s>)
T1 = TGT_LEN - 1
V_SRC = 50
V_TGT = 64
V_PAD = 128   # vocab projection zero-padded to a full f32 lane width
PAD_ID = 0


def _sigmoid(x):
    # stable tanh form; single EUP dispatch, no exp overflow
    return 0.5 * (jnp.tanh(0.5 * x) + 1.0)


def _lstm_gates(pre, h):
    # PyTorch LSTM gate order: i, f, g, o (used by the pure-JAX reference).
    sg = _sigmoid(pre)
    th = jnp.tanh(pre)
    return sg[:, 0:h], sg[:, h:2 * h], th[:, 2 * h:3 * h], sg[:, 3 * h:4 * h]


# ----------------------------------------------------------------------------
# Fused kernel: encoder + decoder + vocab scores, all in VMEM / registers
# ----------------------------------------------------------------------------
def nmt_fused_kernel(
        # inputs
        xcat_ref, keep_ref, encpad_ref, y_ref, tgt_ref, tmask_ref,
        wi_ref, bi_ref, whbd_ref, whc_ref, wattca_ref,
        wdiy_ref, bd_ref, wdr_ref, wch_ref, wvocab_ref,
        # output
        scores_ref):
    f32 = jnp.float32
    S, b, e2 = xcat_ref.shape
    e = e2 // 2
    h = wch_ref.shape[0]
    h2 = 2 * h
    t1 = y_ref.shape[0]
    vp = wvocab_ref.shape[1]
    neg = jnp.float32(-1e30)

    # ---------------- encoder: both directions in lockstep --------------------
    # One hoisted matmul produces, for step i, the fwd pre-activation at time i
    # AND the bwd pre-activation at time S-1-i (xcat = [x_t | x_rev_t] in the
    # wrapper, wi_ref packed with interleaved gate columns).
    X2 = xcat_ref[...].reshape(S * b, e2)
    prex = (jnp.dot(X2, wi_ref[...], preferred_element_type=f32)
            + bi_ref[...]).reshape(S, b, 4 * h2)          # (S, B, 8H)
    whbd = whbd_ref[...]                                   # (2H, 8H) block-diag
    keep = keep_ref[...] > 0.5                             # (S, B, 2H) bool

    h_cat = jnp.zeros((b, h2), f32)                        # [h_fwd | h_bwd]
    c_cat = jnp.zeros((b, h2), f32)                        # [c_fwd | c_bwd]
    enc_f = [None] * S
    enc_b = [None] * S
    for i in range(S):                                     # fully unrolled
        pre = prex[i] + jnp.dot(h_cat, whbd, preferred_element_type=f32)  # (B,8H)
        sg = _sigmoid(pre)
        th = jnp.tanh(pre)
        gi = sg[:, 0:h2]                                   # [i_f | i_b]
        gf = sg[:, h2:2 * h2]                              # [f_f | f_b]
        gg = th[:, 2 * h2:3 * h2]                          # [g_f | g_b]
        go = sg[:, 3 * h2:4 * h2]                          # [o_f | o_b]
        c_new = gf * c_cat + gi * gg
        h_new = go * jnp.tanh(c_new)
        m = keep[i]                                        # (B, 2H) bool
        out = jnp.where(m, h_new, 0.0)                     # pad positions -> 0
        h_cat = jnp.where(m, h_new, h_cat)                 # freeze past length
        c_cat = jnp.where(m, c_new, c_cat)
        enc_f[i] = out[:, :h]                              # fwd output at time i
        enc_b[S - 1 - i] = out[:, h:]                      # bwd output at time S-1-i

    # decoder init state: one fused matmul over the stacked [h_cat; c_cat]
    hc = jnp.concatenate([h_cat, c_cat], axis=0)           # (2B, 2H)
    hc_proj = jnp.dot(hc, whc_ref[...], preferred_element_type=f32)  # (2B, 2H)
    dec_h = hc_proj[:b, :h]
    dec_c = hc_proj[b:, h:]

    # Attention pre-projections (enc_proj and enc @ W_comb_a) in one matmul.
    enc_flat = jnp.concatenate(
        [jnp.concatenate([enc_f[t], enc_b[t]], axis=-1) for t in range(S)],
        axis=0)                                            # (S*B, 2H)
    proj_all = jnp.dot(enc_flat, wattca_ref[...],
                       preferred_element_type=f32).reshape(S, b, h2)
    enc_proj = proj_all[:, :, :h]                          # (S, B, H)
    enc_wca = proj_all[:, :, h:]                           # (S, B, H): enc @ W_comb_a
    encpad = encpad_ref[...] > 0.5                         # (S, B): True at pads

    # ---------------- decoder (LSTMCell + Luong attention) --------------------
    Y2 = y_ref[...].reshape(t1 * b, e)
    prey = (jnp.dot(Y2, wdiy_ref[...], preferred_element_type=f32)
            + bd_ref[...]).reshape(t1, b, 4 * h)
    wdr = wdr_ref[...]                                     # [wdi_o; wdh] (2H, 4H)
    wch = wch_ref[...]

    hd, cd = dec_h, dec_c
    o_prev = jnp.zeros((b, h), f32)
    comb = [None] * t1
    for t in range(t1):                                    # fully unrolled
        zcat = jnp.concatenate([o_prev, hd], axis=-1)      # (B, 2H)
        pre = prey[t] + jnp.dot(zcat, wdr, preferred_element_type=f32)   # (B, 4H)
        sg = _sigmoid(pre)
        th = jnp.tanh(pre)
        gi = sg[:, 0:h]; gf = sg[:, h:2 * h]
        gg = th[:, 2 * h:3 * h]; go = sg[:, 3 * h:4 * h]
        cd = gf * cd + gi * gg
        hd = go * jnp.tanh(cd)
        # Luong global attention with pad masking (time-major);
        # a_t @ W_comb_a = sum_s alpha_s * enc_wca_s  (precomputed by linearity).
        e_t = jnp.sum(enc_proj * hd[None, :, :], axis=-1)              # (S, B)
        e_t = jnp.where(encpad, neg, e_t)
        mmax = jnp.max(e_t, axis=0, keepdims=True)
        p = jnp.exp(e_t - mmax)
        alpha = p * pl.reciprocal(jnp.sum(p, axis=0, keepdims=True), approx=True)
        v_a = jnp.sum(alpha[:, :, None] * enc_wca, axis=0)             # (B, H)
        o_t = jnp.tanh(jnp.dot(hd, wch, preferred_element_type=f32) + v_a)
        comb[t] = o_t                                      # dropout == identity
        o_prev = o_t

    # -------- vocab projection + log_softmax + gold gather + masked time sum --
    comb_flat = jnp.concatenate(comb, axis=0)              # (T1*B, H)
    logits = jnp.dot(comb_flat, wvocab_ref[...],
                     preferred_element_type=f32).reshape(t1, b, vp)
    lane = jax.lax.broadcasted_iota(jnp.int32, (t1, b, vp), 2)
    logits = jnp.where(lane < V_TGT, logits, neg)          # mask padded vocab lanes
    mlog = jnp.max(logits, axis=-1, keepdims=True)
    lse = jnp.log(jnp.sum(jnp.exp(logits - mlog), axis=-1, keepdims=True)) + mlog
    logp = logits - lse                                    # (T1, B, V_PAD)
    ids = tgt_ref[...]                                     # (T1, B) int32
    picked = jnp.where(lane == ids[:, :, None], logp, 0.0)
    contrib = picked * tmask_ref[...][:, :, None]          # (T1, B, V_PAD)
    per_b = jnp.sum(contrib, axis=0)                       # (B, V_PAD)
    score_col = jnp.sum(per_b, axis=-1, keepdims=True)     # (B, 1)
    # lane-dense (8,128) full-vreg store; wrapper reads column 0
    scores_ref[...] = jnp.broadcast_to(score_col, (b, vp))


# ----------------------------------------------------------------------------
# Wrapper
# ----------------------------------------------------------------------------
def _vmem():
    return pl.BlockSpec(memory_space=pltpu.MemorySpace.VMEM)


def _interleave_gates(wf, wb, h=H):
    # [i f g o] x {fwd, bwd}  ->  [i_f i_b f_f f_b g_f g_b o_f o_b]
    parts = []
    for g in range(4):
        parts.append(wf[..., g * h:(g + 1) * h])
        parts.append(wb[..., g * h:(g + 1) * h])
    return jnp.concatenate(parts, axis=-1)


def nmt_forward_pallas(params, source_padded, source_lengths, target_padded):
    lens = jnp.asarray(source_lengths, dtype=jnp.int32)
    # embedding lookups + mask construction are glue (plain JAX)
    X = jnp.take(params['src_embed'], source_padded, axis=0)        # (S, B, E)
    Y = jnp.take(params['tgt_embed'], target_padded[:-1], axis=0)   # (T1, B, E)
    # pack fwd time t with bwd time S-1-t so one matmul feeds both directions
    Xcat = jnp.concatenate([X, X[::-1]], axis=-1)                   # (S, B, 2E)

    keep = (jnp.arange(SRC_LEN)[:, None] < lens[None, :]).astype(jnp.float32)  # (S,B)
    keep_f = jnp.broadcast_to(keep[:, :, None], (SRC_LEN, B, H))
    keep_b = jnp.broadcast_to(keep[::-1][:, :, None], (SRC_LEN, B, H))
    enc_keep = jnp.concatenate([keep_f, keep_b], axis=-1)           # (S, B, 2H)
    enc_pad = 1.0 - keep                                            # (S, B), 1 at pad

    tgt_gold = target_padded[1:].astype(jnp.int32)                  # (T1, B)
    tgt_mask = (target_padded[1:] != PAD_ID).astype(jnp.float32)    # (T1, B)

    # ---- weight plumbing: merge paired matmul weights in the wrapper ----
    zi = jnp.zeros_like(params['enc_wif'])
    zh = jnp.zeros_like(params['enc_whf'])
    # encoder input proj: rows 0:E act on x_t (fwd cols), rows E:2E on x_rev_t (bwd cols)
    wi_comb = jnp.concatenate([_interleave_gates(params['enc_wif'], zi),
                               _interleave_gates(zi, params['enc_wib'])], axis=0)
    b_comb = _interleave_gates(params['enc_bf'], params['enc_bb'])         # (1, 8H)
    # encoder recurrent block-diagonal weight (interleaved gate columns)
    wh_bd = jnp.concatenate([_interleave_gates(params['enc_whf'], zh),
                             _interleave_gates(zh, params['enc_whb'])], axis=0)
    # dec init: stacked [h_cat; c_cat] @ [[whp_f|wcp_f],[whp_b|wcp_b]]
    w_hc = jnp.concatenate([
        jnp.concatenate([params['whp_f'], params['wcp_f']], axis=1),
        jnp.concatenate([params['whp_b'], params['wcp_b']], axis=1)], axis=0)
    # attention pre-projections: enc @ [watt | wcomb_a]
    w_attca = jnp.concatenate([params['watt'], params['wcomb_a']], axis=1)
    # decoder recurrent: [o_prev | h] @ [wdi_o; wdh]
    wdr = jnp.concatenate([params['wdi_o'], params['wdh']], axis=0)
    # vocab projection zero-padded to a full 128-lane width
    w_vocab_pad = jnp.zeros((H, V_PAD), jnp.float32).at[:, :V_TGT].set(
        params['w_vocab'])

    args = (Xcat, enc_keep, enc_pad, Y, tgt_gold, tgt_mask,
            wi_comb, b_comb, wh_bd, w_hc, w_attca,
            params['wdi_y'], params['bd'], wdr, params['wcomb_h'], w_vocab_pad)

    out = pl.pallas_call(
        nmt_fused_kernel,
        out_shape=jax.ShapeDtypeStruct((B, V_PAD), jnp.float32),
        in_specs=[_vmem() for _ in args],
        out_specs=_vmem(),
    )(*args)
    return out[:, 0]                                                 # (B,)


# ----------------------------------------------------------------------------
# Pure-JAX reference (same math, XLA) for sanity checking
# ----------------------------------------------------------------------------
def nmt_forward_ref(p, source_padded, source_lengths, target_padded):
    X = jnp.take(p['src_embed'], source_padded, axis=0)
    lens = jnp.asarray(source_lengths)
    mask = (jnp.arange(SRC_LEN)[:, None] < lens[None, :]).astype(jnp.float32)[:, :, None]

    def cell(xt, hp, cp, wi, wh, bias):
        pre = xt @ wi + hp @ wh + bias
        i, f, g, o = _lstm_gates(pre, H)
        c = f * cp + i * g
        return o * jnp.tanh(c), c

    hf = jnp.zeros((B, H)); cf = jnp.zeros((B, H)); enc_f = []
    for t in range(SRC_LEN):
        hn, cn = cell(X[t], hf, cf, p['enc_wif'], p['enc_whf'], p['enc_bf'])
        m = mask[t]
        enc_f.append(m * hn)
        hf = m * hn + (1 - m) * hf
        cf = m * cn + (1 - m) * cf
    hb = jnp.zeros((B, H)); cb = jnp.zeros((B, H)); enc_b = [None] * SRC_LEN
    for t in range(SRC_LEN - 1, -1, -1):
        hn, cn = cell(X[t], hb, cb, p['enc_wib'], p['enc_whb'], p['enc_bb'])
        m = mask[t]
        enc_b[t] = m * hn
        hb = m * hn + (1 - m) * hb
        cb = m * cn + (1 - m) * cb
    enc_hiddens = jnp.transpose(
        jnp.stack([jnp.concatenate([f_, b_], -1) for f_, b_ in zip(enc_f, enc_b)], 0),
        (1, 0, 2))
    dec_h = hf @ p['whp_f'] + hb @ p['whp_b']
    dec_c = cf @ p['wcp_f'] + cb @ p['wcp_b']

    enc_proj = enc_hiddens @ p['watt']
    enc_pad_mask = (jnp.arange(SRC_LEN)[None, :] >= lens[:, None]).astype(jnp.float32)

    Y = jnp.take(p['tgt_embed'], target_padded[:-1], axis=0)
    o_prev = jnp.zeros((B, H)); h = dec_h; c = dec_c; outs = []
    for t in range(TGT_LEN - 1):
        pre = Y[t] @ p['wdi_y'] + o_prev @ p['wdi_o'] + h @ p['wdh'] + p['bd']
        i, f, g, o = _lstm_gates(pre, H)
        c = f * c + i * g
        h = o * jnp.tanh(c)
        e_t = jnp.sum(enc_proj * h[:, None, :], axis=-1)
        e_t = jnp.where(enc_pad_mask > 0.5, jnp.float32(-1e30), e_t)
        alpha = jax.nn.softmax(e_t, axis=1)
        a_t = jnp.sum(alpha[:, :, None] * enc_hiddens, axis=1)
        o_prev = jnp.tanh(h @ p['wcomb_h'] + a_t @ p['wcomb_a'])
        outs.append(o_prev)
    combined = jnp.stack(outs, 0)
    logits = combined @ p['w_vocab']
    logp = jax.nn.log_softmax(logits, axis=-1)
    gold = jnp.take_along_axis(logp, target_padded[1:][:, :, None], axis=-1)[..., 0]
    tgt_mask = (target_padded[1:] != PAD_ID).astype(jnp.float32)
    return jnp.sum(gold * tgt_mask, axis=0)


# ----------------------------------------------------------------------------
# Deterministic parameter init (synthetic; shapes follow NMT.__init__)
# ----------------------------------------------------------------------------
def init_params(key):
    ks = jax.random.split(key, 20)

    def u(k, shape, fan_in):
        s = 1.0 / jnp.sqrt(jnp.float32(fan_in))
        return jax.random.uniform(k, shape, jnp.float32, -s, s)

    p = {}
    p['src_embed'] = u(ks[0], (V_SRC, E), E)
    p['tgt_embed'] = u(ks[1], (V_TGT, E), E)
    # encoder bi-LSTM (weights stored transposed; biases combined b_ih + b_hh)
    p['enc_wif'] = u(ks[2], (E, 4 * H), H)
    p['enc_whf'] = u(ks[3], (H, 4 * H), H)
    p['enc_bf'] = u(ks[4], (1, 4 * H), H)
    p['enc_wib'] = u(ks[5], (E, 4 * H), H)
    p['enc_whb'] = u(ks[6], (H, 4 * H), H)
    p['enc_bb'] = u(ks[7], (1, 4 * H), H)
    # h/c projections (2h -> h), split into forward/backward halves
    p['whp_f'] = u(ks[8], (H, H), 2 * H)
    p['whp_b'] = u(ks[9], (H, H), 2 * H)
    p['wcp_f'] = u(ks[10], (H, H), 2 * H)
    p['wcp_b'] = u(ks[11], (H, H), 2 * H)
    # attention projection (2h -> h)
    p['watt'] = u(ks[12], (2 * H, H), 2 * H)
    # decoder LSTMCell (input = [y_t (E), o_prev (H)])
    p['wdi_y'] = u(ks[13], (E, 4 * H), H)
    p['wdi_o'] = u(ks[14], (H, 4 * H), H)
    p['wdh'] = u(ks[15], (H, 4 * H), H)
    p['bd'] = u(ks[16], (1, 4 * H), H)
    # combined output projection (3h -> h) split into [dec_hidden | a_t] halves
    p['wcomb_h'] = u(ks[17], (H, H), 3 * H)
    p['wcomb_a'] = u(ks[18], (2 * H, H), 3 * H)
    # target vocab projection (h -> V_tgt)
    p['w_vocab'] = u(ks[19], (H, V_TGT), H)
    return p


if __name__ == "__main__":
    key = jax.random.PRNGKey(0)
    pkey, skey, tkey = jax.random.split(key, 3)
    params = init_params(pkey)

    # sources sorted longest -> shortest (pack_padded_sequence precondition)
    source_lengths = [8, 8, 7, 6, 5, 4, 3, 2]
    src = jax.random.randint(skey, (SRC_LEN, B), 1, V_SRC).astype(jnp.int32)
    src = jnp.where(jnp.arange(SRC_LEN)[:, None] < jnp.asarray(source_lengths)[None, :],
                    src, PAD_ID)

    tgt_lengths = [7, 7, 6, 6, 5, 4, 3, 2]
    tgt = jax.random.randint(tkey, (TGT_LEN, B), 1, V_TGT).astype(jnp.int32)
    tgt = jnp.where(jnp.arange(TGT_LEN)[:, None] < jnp.asarray(tgt_lengths)[None, :],
                    tgt, PAD_ID)

    lens = jnp.asarray(source_lengths, dtype=jnp.int32)
    fwd = jax.jit(nmt_forward_pallas)
    scores = fwd(params, src, lens, tgt)
    scores = jax.block_until_ready(scores)

    ref = nmt_forward_ref(params, src, source_lengths, tgt)
    assert scores.shape == (B,)
    assert jnp.allclose(scores, ref, rtol=1e-2, atol=1e-2), (scores, ref)
    print("KERNEL_OK")
</pallas_src>

<mosaic_0001>
module attributes {stable_mosaic.version = 11 : i64} {
  func.func @nmt_fused_kernel(%arg0: memref<8x8x64xf32, #tpu.memory_space<vmem>>, %arg1: memref<8x8x64xf32, #tpu.memory_space<vmem>>, %arg2: memref<8x8xf32, #tpu.memory_space<vmem>>, %arg3: memref<6x8x32xf32, #tpu.memory_space<vmem>>, %arg4: memref<6x8xi32, #tpu.memory_space<vmem>>, %arg5: memref<6x8xf32, #tpu.memory_space<vmem>>, %arg6: memref<64x256xf32, #tpu.memory_space<vmem>>, %arg7: memref<1x256xf32, #tpu.memory_space<vmem>>, %arg8: memref<64x256xf32, #tpu.memory_space<vmem>>, %arg9: memref<64x64xf32, #tpu.memory_space<vmem>>, %arg10: memref<64x64xf32, #tpu.memory_space<vmem>>, %arg11: memref<32x128xf32, #tpu.memory_space<vmem>>, %arg12: memref<1x128xf32, #tpu.memory_space<vmem>>, %arg13: memref<64x128xf32, #tpu.memory_space<vmem>>, %arg14: memref<32x32xf32, #tpu.memory_space<vmem>>, %arg15: memref<32x128xf32, #tpu.memory_space<vmem>>, %arg16: memref<8x128xf32, #tpu.memory_space<vmem>>) attributes {dimension_semantics = [], scalar_prefetch = 0 : i64, scratch_operands = 0 : i64, tpu.core_type = #tpu.core_type<tc>} {
    %c0 = arith.constant 0 : index
    %c0_0 = arith.constant 0 : index
    %c0_1 = arith.constant 0 : index
    %0 = vector.load %arg0[%c0, %c0_0, %c0_1] : memref<8x8x64xf32, #tpu.memory_space<vmem>>, vector<8x8x64xf32>
    %1 = vector.shape_cast %0 : vector<8x8x64xf32> to vector<64x64xf32>
    %c0_2 = arith.constant 0 : index
    %c0_3 = arith.constant 0 : index
    %2 = vector.load %arg6[%c0_2, %c0_3] : memref<64x256xf32, #tpu.memory_space<vmem>>, vector<64x256xf32>
    %cst = arith.constant dense<0.000000e+00> : vector<64x256xf32>
    %3 = tpu.matmul %1, %2, %cst {dimension_numbers = #tpu.dot_dimension_numbers<[1], [0], [0], [1], [0, 0, 1, 1], [], []>} : vector<64x64xf32>, vector<64x256xf32>, vector<64x256xf32> -> vector<64x256xf32>
    %c0_4 = arith.constant 0 : index
    %c0_5 = arith.constant 0 : index
    %4 = vector.load %arg7[%c0_4, %c0_5] : memref<1x256xf32, #tpu.memory_space<vmem>>, vector<1x256xf32>
    %5 = vector.broadcast %4 : vector<1x256xf32> to vector<64x256xf32>
    %6 = arith.addf %3, %5 : vector<64x256xf32>
    %7 = vector.shape_cast %6 : vector<64x256xf32> to vector<8x8x256xf32>
    %c0_6 = arith.constant 0 : index
    %c0_7 = arith.constant 0 : index
    %8 = vector.load %arg8[%c0_6, %c0_7] : memref<64x256xf32, #tpu.memory_space<vmem>>, vector<64x256xf32>
    %c0_8 = arith.constant 0 : index
    %c0_9 = arith.constant 0 : index
    %c0_10 = arith.constant 0 : index
    %9 = vector.load %arg1[%c0_8, %c0_9, %c0_10] : memref<8x8x64xf32, #tpu.memory_space<vmem>>, vector<8x8x64xf32>
    %cst_11 = arith.constant 5.000000e-01 : f32
    %10 = vector.broadcast %cst_11 : f32 to vector<8x8x64xf32>
    %11 = arith.cmpf ogt, %9, %10 : vector<8x8x64xf32>
    %cst_12 = arith.constant 0.000000e+00 : f32
    %12 = vector.broadcast %cst_12 : f32 to vector<8x64xf32>
    %cst_13 = arith.constant 0.000000e+00 : f32
    %13 = vector.broadcast %cst_13 : f32 to vector<8x64xf32>
    %14 = vector.extract_strided_slice %7 {offsets = [0, 0, 0], sizes = [1, 8, 256], strides = [1, 1, 1]} : vector<8x8x256xf32> to vector<1x8x256xf32>
    %15 = vector.shape_cast %14 : vector<1x8x256xf32> to vector<8x256xf32>
    %cst_14 = arith.constant dense<0.000000e+00> : vector<8x256xf32>
    %16 = tpu.matmul %12, %8, %cst_14 {dimension_numbers = #tpu.dot_dimension_numbers<[1], [0], [0], [1], [0, 0, 1, 1], [], []>} : vector<8x64xf32>, vector<64x256xf32>, vector<8x256xf32> -> vector<8x256xf32>
    %17 = arith.addf %15, %16 : vector<8x256xf32>
    %cst_15 = arith.constant 5.000000e-01 : f32
    %18 = vector.broadcast %cst_15 : f32 to vector<8x256xf32>
    %19 = arith.mulf %18, %17 : vector<8x256xf32>
    %20 = math.tanh %19 : vector<8x256xf32>
    %cst_16 = arith.constant 1.000000e+00 : f32
    %21 = vector.broadcast %cst_16 : f32 to vector<8x256xf32>
    %22 = arith.addf %20, %21 : vector<8x256xf32>
    %cst_17 = arith.constant 5.000000e-01 : f32
    %23 = vector.broadcast %cst_17 : f32 to vector<8x256xf32>
    %24 = arith.mulf %23, %22 : vector<8x256xf32>
    %25 = math.tanh %17 : vector<8x256xf32>
    %26 = vector.extract_strided_slice %24 {offsets = [0, 0], sizes = [8, 64], strides = [1, 1]} : vector<8x256xf32> to vector<8x64xf32>
    %27 = vector.extract_strided_slice %24 {offsets = [0, 64], sizes = [8, 64], strides = [1, 1]} : vector<8x256xf32> to vector<8x64xf32>
    %28 = vector.extract_strided_slice %25 {offsets = [0, 128], sizes = [8, 64], strides = [1, 1]} : vector<8x256xf32> to vector<8x64xf32>
    %29 = vector.extract_strided_slice %24 {offsets = [0, 192], sizes = [8, 64], strides = [1, 1]} : vector<8x256xf32> to vector<8x64xf32>
    %30 = arith.mulf %27, %13 : vector<8x64xf32>
    %31 = arith.mulf %26, %28 : vector<8x64xf32>
    %32 = arith.addf %30, %31 : vector<8x64xf32>
    %33 = math.tanh %32 : vector<8x64xf32>
    %34 = arith.mulf %29, %33 : vector<8x64xf32>
    %35 = vector.extract_strided_slice %11 {offsets = [0, 0, 0], sizes = [1, 8, 64], strides = [1, 1, 1]} : vector<8x8x64xi1> to vector<1x8x64xi1>
    %36 = vector.shape_cast %35 : vector<1x8x64xi1> to vector<8x64xi1>
    %cst_18 = arith.constant 0.000000e+00 : f32
    %37 = vector.broadcast %cst_18 : f32 to vector<8x64xf32>
    %38 = arith.select %36, %34, %37 : vector<8x64xi1>, vector<8x64xf32>
    %39 = arith.select %36, %34, %12 : vector<8x64xi1>, vector<8x64xf32>
    %40 = arith.select %36, %32, %13 : vector<8x64xi1>, vector<8x64xf32>
    %41 = vector.extract_strided_slice %38 {offsets = [0, 0], sizes = [8, 32], strides = [1, 1]} : vector<8x64xf32> to vector<8x32xf32>
    %42 = vector.extract_strided_slice %38 {offsets = [0, 32], sizes = [8, 32], strides = [1, 1]} : vector<8x64xf32> to vector<8x32xf32>
    %43 = vector.extract_strided_slice %7 {offsets = [1, 0, 0], sizes = [1, 8, 256], strides = [1, 1, 1]} : vector<8x8x256xf32> to vector<1x8x256xf32>
    %44 = vector.shape_cast %43 : vector<1x8x256xf32> to vector<8x256xf32>
    %cst_19 = arith.constant dense<0.000000e+00> : vector<8x256xf32>
    %45 = tpu.matmul %39, %8, %cst_19 {dimension_numbers = #tpu.dot_dimension_numbers<[1], [0], [0], [1], [0, 0, 1, 1], [], []>} : vector<8x64xf32>, vector<64x256xf32>, vector<8x256xf32> -> vector<8x256xf32>
    %46 = arith.addf %44, %45 : vector<8x256xf32>
    %cst_20 = arith.constant 5.000000e-01 : f32
    %47 = vector.broadcast %cst_20 : f32 to vector<8x256xf32>
    %48 = arith.mulf %47, %46 : vector<8x256xf32>
    %49 = math.tanh %48 : vector<8x256xf32>
    %cst_21 = arith.constant 1.000000e+00 : f32
    %50 = vector.broadcast %cst_21 : f32 to vector<8x256xf32>
    %51 = arith.addf %49, %50 : vector<8x256xf32>
    %cst_22 = arith.constant 5.000000e-01 : f32
    %52 = vector.broadcast %cst_22 : f32 to vector<8x256xf32>
    %53 = arith.mulf %52, %51 : vector<8x256xf32>
    %54 = math.tanh %46 : vector<8x256xf32>
    %55 = vector.extract_strided_slice %53 {offsets = [0, 0], sizes = [8, 64], strides = [1, 1]} : vector<8x256xf32> to vector<8x64xf32>
    %56 = vector.extract_strided_slice %53 {offsets = [0, 64], sizes = [8, 64], strides = [1, 1]} : vector<8x256xf32> to vector<8x64xf32>
    %57 = vector.extract_strided_slice %54 {offsets = [0, 128], sizes = [8, 64], strides = [1, 1]} : vector<8x256xf32> to vector<8x64xf32>
    %58 = vector.extract_strided_slice %53 {offsets = [0, 192], sizes = [8, 64], strides = [1, 1]} : vector<8x256xf32> to vector<8x64xf32>
    %59 = arith.mulf %56, %40 : vector<8x64xf32>
    %60 = arith.mulf %55, %57 : vector<8x64xf32>
    %61 = arith.addf %59, %60 : vector<8x64xf32>
    %62 = math.tanh %61 : vector<8x64xf32>
    %63 = arith.mulf %58, %62 : vector<8x64xf32>
    %64 = vector.extract_strided_slice %11 {offsets = [1, 0, 0], sizes = [1, 8, 64], strides = [1, 1, 1]} : vector<8x8x64xi1> to vector<1x8x64xi1>
    %65 = vector.shape_cast %64 : vector<1x8x64xi1> to vector<8x64xi1>
    %cst_23 = arith.constant 0.000000e+00 : f32
    %66 = vector.broadcast %cst_23 : f32 to vector<8x64xf32>
    %67 = arith.select %65, %63, %66 : vector<8x64xi1>, vector<8x64xf32>
    %68 = arith.select %65, %63, %39 : vector<8x64xi1>, vector<8x64xf32>
    %69 = arith.select %65, %61, %40 : vector<8x64xi1>, vector<8x64xf32>
    %70 = vector.extract_strided_slice %67 {offsets = [0, 0], sizes = [8, 32], strides = [1, 1]} : vector<8x64xf32> to vector<8x32xf32>
    %71 = vector.extract_strided_slice %67 {offsets = [0, 32], sizes = [8, 32], strides = [1, 1]} : vector<8x64xf32> to vector<8x32xf32>
    %72 = vector.extract_strided_slice %7 {offsets = [2, 0, 0], sizes = [1, 8, 256], strides = [1, 1, 1]} : vector<8x8x256xf32> to vector<1x8x256xf32>
    %73 = vector.shape_cast %72 : vector<1x8x256xf32> to vector<8x256xf32>
    %cst_24 = arith.constant dense<0.000000e+00> : vector<8x256xf32>
    %74 = tpu.matmul %68, %8, %cst_24 {dimension_numbers = #tpu.dot_dimension_numbers<[1], [0], [0], [1], [0, 0, 1, 1], [], []>} : vector<8x64xf32>, vector<64x256xf32>, vector<8x256xf32> -> vector<8x256xf32>
    %75 = arith.addf %73, %74 : vector<8x256xf32>
    %cst_25 = arith.constant 5.000000e-01 : f32
    %76 = vector.broadcast %cst_25 : f32 to vector<8x256xf32>
    %77 = arith.mulf %76, %75 : vector<8x256xf32>
    %78 = math.tanh %77 : vector<8x256xf32>
    %cst_26 = arith.constant 1.000000e+00 : f32
    %79 = vector.broadcast %cst_26 : f32 to vector<8x256xf32>
    %80 = arith.addf %78, %79 : vector<8x256xf32>
    %cst_27 = arith.constant 5.000000e-01 : f32
    %81 = vector.broadcast %cst_27 : f32 to vector<8x256xf32>
    %82 = arith.mulf %81, %80 : vector<8x256xf32>
    %83 = math.tanh %75 : vector<8x256xf32>
    %84 = vector.extract_strided_slice %82 {offsets = [0, 0], sizes = [8, 64], strides = [1, 1]} : vector<8x256xf32> to vector<8x64xf32>
    %85 = vector.extract_strided_slice %82 {offsets = [0, 64], sizes = [8, 64], strides = [1, 1]} : vector<8x256xf32> to vector<8x64xf32>
    %86 = vector.extract_strided_slice %83 {offsets = [0, 128], sizes = [8, 64], strides = [1, 1]} : vector<8x256xf32> to vector<8x64xf32>
    %87 = vector.extract_strided_slice %82 {offsets = [0, 192], sizes = [8, 64], strides = [1, 1]} : vector<8x256xf32> to vector<8x64xf32>
    %88 = arith.mulf %85, %69 : vector<8x64xf32>
    %89 = arith.mulf %84, %86 : vector<8x64xf32>
    %90 = arith.addf %88, %89 : vector<8x64xf32>
    %91 = math.tanh %90 : vector<8x64xf32>
    %92 = arith.mulf %87, %91 : vector<8x64xf32>
    %93 = vector.extract_strided_slice %11 {offsets = [2, 0, 0], sizes = [1, 8, 64], strides = [1, 1, 1]} : vector<8x8x64xi1> to vector<1x8x64xi1>
    %94 = vector.shape_cast %93 : vector<1x8x64xi1> to vector<8x64xi1>
    %cst_28 = arith.constant 0.000000e+00 : f32
    %95 = vector.broadcast %cst_28 : f32 to vector<8x64xf32>
    %96 = arith.select %94, %92, %95 : vector<8x64xi1>, vector<8x64xf32>
    %97 = arith.select %94, %92, %68 : vector<8x64xi1>, vector<8x64xf32>
    %98 = arith.select %94, %90, %69 : vector<8x64xi1>, vector<8x64xf32>
    %99 = vector.extract_strided_slice %96 {offsets = [0, 0], sizes = [8, 32], strides = [1, 1]} : vector<8x64xf32> to vector<8x32xf32>
    %100 = vector.extract_strided_slice %96 {offsets = [0, 32], sizes = [8, 32], strides = [1, 1]} : vector<8x64xf32> to vector<8x32xf32>
    %101 = vector.extract_strided_slice %7 {offsets = [3, 0, 0], sizes = [1, 8, 256], strides = [1, 1, 1]} : vector<8x8x256xf32> to vector<1x8x256xf32>
    %102 = vector.shape_cast %101 : vector<1x8x256xf32> to vector<8x256xf32>
    %cst_29 = arith.constant dense<0.000000e+00> : vector<8x256xf32>
    %103 = tpu.matmul %97, %8, %cst_29 {dimension_numbers = #tpu.dot_dimension_numbers<[1], [0], [0], [1], [0, 0, 1, 1], [], []>} : vector<8x64xf32>, vector<64x256xf32>, vector<8x256xf32> -> vector<8x256xf32>
    %104 = arith.addf %102, %103 : vector<8x256xf32>
    %cst_30 = arith.constant 5.000000e-01 : f32
    %105 = vector.broadcast %cst_30 : f32 to vector<8x256xf32>
    %106 = arith.mulf %105, %104 : vector<8x256xf32>
    %107 = math.tanh %106 : vector<8x256xf32>
    %cst_31 = arith.constant 1.000000e+00 : f32
    %108 = vector.broadcast %cst_31 : f32 to vector<8x256xf32>
    %109 = arith.addf %107, %108 : vector<8x256xf32>
    %cst_32 = arith.constant 5.000000e-01 : f32
    %110 = vector.broadcast %cst_32 : f32 to vector<8x256xf32>
    %111 = arith.mulf %110, %109 : vector<8x256xf32>
    %112 = math.tanh %104 : vector<8x256xf32>
    %113 = vector.extract_strided_slice %111 {offsets = [0, 0], sizes = [8, 64], strides = [1, 1]} : vector<8x256xf32> to vector<8x64xf32>
    %114 = vector.extract_strided_slice %111 {offsets = [0, 64], sizes = [8, 64], strides = [1, 1]} : vector<8x256xf32> to vector<8x64xf32>
    %115 = vector.extract_strided_slice %112 {offsets = [0, 128], sizes = [8, 64], strides = [1, 1]} : vector<8x256xf32> to vector<8x64xf32>
    %116 = vector.extract_strided_slice %111 {offsets = [0, 192], sizes = [8, 64], strides = [1, 1]} : vector<8x256xf32> to vector<8x64xf32>
    %117 = arith.mulf %114, %98 : vector<8x64xf32>
    %118 = arith.mulf %113, %115 : vector<8x64xf32>
    %119 = arith.addf %117, %118 : vector<8x64xf32>
    %120 = math.tanh %119 : vector<8x64xf32>
    %121 = arith.mulf %116, %120 : vector<8x64xf32>
    %122 = vector.extract_strided_slice %11 {offsets = [3, 0, 0], sizes = [1, 8, 64], strides = [1, 1, 1]} : vector<8x8x64xi1> to vector<1x8x64xi1>
    %123 = vector.shape_cast %122 : vector<1x8x64xi1> to vector<8x64xi1>
    %cst_33 = arith.constant 0.000000e+00 : f32
    %124 = vector.broadcast %cst_33 : f32 to vector<8x64xf32>
    %125 = arith.select %123, %121, %124 : vector<8x64xi1>, vector<8x64xf32>
    %126 = arith.select %123, %121, %97 : vector<8x64xi1>, vector<8x64xf32>
    %127 = arith.select %123, %119, %98 : vector<8x64xi1>, vector<8x64xf32>
    %128 = vector.extract_strided_slice %125 {offsets = [0, 0], sizes = [8, 32], strides = [1, 1]} : vector<8x64xf32> to vector<8x32xf32>
    %129 = vector.extract_strided_slice %125 {offsets = [0, 32], sizes = [8, 32], strides = [1, 1]} : vector<8x64xf32> to vector<8x32xf32>
    %130 = vector.extract_strided_slice %7 {offsets = [4, 0, 0], sizes = [1, 8, 256], strides = [1, 1, 1]} : vector<8x8x256xf32> to vector<1x8x256xf32>
    %131 = vector.shape_cast %130 : vector<1x8x256xf32> to vector<8x256xf32>
    %cst_34 = arith.constant dense<0.000000e+00> : vector<8x256xf32>
    %132 = tpu.matmul %126, %8, %cst_34 {dimension_numbers = #tpu.dot_dimension_numbers<[1], [0], [0], [1], [0, 0, 1, 1], [], []>} : vector<8x64xf32>, vector<64x256xf32>, vector<8x256xf32> -> vector<8x256xf32>
    %133 = arith.addf %131, %132 : vector<8x256xf32>
    %cst_35 = arith.constant 5.000000e-01 : f32
    %134 = vector.broadcast %cst_35 : f32 to vector<8x256xf32>
    %135 = arith.mulf %134, %133 : vector<8x256xf32>
    %136 = math.tanh %135 : vector<8x256xf32>
    %cst_36 = arith.constant 1.000000e+00 : f32
    %137 = vector.broadcast %cst_36 : f32 to vector<8x256xf32>
    %138 = arith.addf %136, %137 : vector<8x256xf32>
    %cst_37 = arith.constant 5.000000e-01 : f32
    %139 = vector.broadcast %cst_37 : f32 to vector<8x256xf32>
    %140 = arith.mulf %139, %138 : vector<8x256xf32>
    %141 = math.tanh %133 : vector<8x256xf32>
    %142 = vector.extract_strided_slice %140 {offsets = [0, 0], sizes = [8, 64], strides = [1, 1]} : vector<8x256xf32> to vector<8x64xf32>
    %143 = vector.extract_strided_slice %140 {offsets = [0, 64], sizes = [8, 64], strides = [1, 1]} : vector<8x256xf32> to vector<8x64xf32>
    %144 = vector.extract_strided_slice %141 {offsets = [0, 128], sizes = [8, 64], strides = [1, 1]} : vector<8x256xf32> to vector<8x64xf32>
    %145 = vector.extract_strided_slice %140 {offsets = [0, 192], sizes = [8, 64], strides = [1, 1]} : vector<8x256xf32> to vector<8x64xf32>
    %146 = arith.mulf %143, %127 : vector<8x64xf32>
    %147 = arith.mulf %142, %144 : vector<8x64xf32>
    %148 = arith.addf %146, %147 : vector<8x64xf32>
    %149 = math.tanh %148 : vector<8x64xf32>
    %150 = arith.mulf %145, %149 : vector<8x64xf32>
    %151 = vector.extract_strided_slice %11 {offsets = [4, 0, 0], sizes = [1, 8, 64], strides = [1, 1, 1]} : vector<8x8x64xi1> to vector<1x8x64xi1>
    %152 = vector.shape_cast %151 : vector<1x8x64xi1> to vector<8x64xi1>
    %cst_38 = arith.constant 0.000000e+00 : f32
    %153 = vector.broadcast %cst_38 : f32 to vector<8x64xf32>
    %154 = arith.select %152, %150, %153 : vector<8x64xi1>, vector<8x64xf32>
    %155 = arith.select %152, %150, %126 : vector<8x64xi1>, vector<8x64xf32>
    %156 = arith.select %152, %148, %127 : vector<8x64xi1>, vector<8x64xf32>
    %157 = vector.extract_strided_slice %154 {offsets = [0, 0], sizes = [8, 32], strides = [1, 1]} : vector<8x64xf32> to vector<8x32xf32>
    %158 = vector.extract_strided_slice %154 {offsets = [0, 32], sizes = [8, 32], strides = [1, 1]} : vector<8x64xf32> to vector<8x32xf32>
    %159 = vector.extract_strided_slice %7 {offsets = [5, 0, 0], sizes = [1, 8, 256], strides = [1, 1, 1]} : vector<8x8x256xf32> to vector<1x8x256xf32>
    %160 = vector.shape_cast %159 : vector<1x8x256xf32> to vector<8x256xf32>
    %cst_39 = arith.constant dense<0.000000e+00> : vector<8x256xf32>
    %161 = tpu.matmul %155, %8, %cst_39 {dimension_numbers = #tpu.dot_dimension_numbers<[1], [0], [0], [1], [0, 0, 1, 1], [], []>} : vector<8x64xf32>, vector<64x256xf32>, vector<8x256xf32> -> vector<8x256xf32>
    %162 = arith.addf %160, %161 : vector<8x256xf32>
    %cst_40 = arith.constant 5.000000e-01 : f32
    %163 = vector.broadcast %cst_40 : f32 to vector<8x256xf32>
    %164 = arith.mulf %163, %162 : vector<8x256xf32>
    %165 = math.tanh %164 : vector<8x256xf32>
    %cst_41 = arith.constant 1.000000e+00 : f32
    %166 = vector.broadcast %cst_41 : f32 to vector<8x256xf32>
    %167 = arith.addf %165, %166 : vector<8x256xf32>
    %cst_42 = arith.constant 5.000000e-01 : f32
    %168 = vector.broadcast %cst_42 : f32 to vector<8x256xf32>
    %169 = arith.mulf %168, %167 : vector<8x256xf32>
    %170 = math.tanh %162 : vector<8x256xf32>
    %171 = vector.extract_strided_slice %169 {offsets = [0, 0], sizes = [8, 64], strides = [1, 1]} : vector<8x256xf32> to vector<8x64xf32>
    %172 = vector.extract_strided_slice %169 {offsets = [0, 64], sizes = [8, 64], strides = [1, 1]} : vector<8x256xf32> to vector<8x64xf32>
    %173 = vector.extract_strided_slice %170 {offsets = [0, 128], sizes = [8, 64], strides = [1, 1]} : vector<8x256xf32> to vector<8x64xf32>
    %174 = vector.extract_strided_slice %169 {offsets = [0, 192], sizes = [8, 64], strides = [1, 1]} : vector<8x256xf32> to vector<8x64xf32>
    %175 = arith.mulf %172, %156 : vector<8x64xf32>
    %176 = arith.mulf %171, %173 : vector<8x64xf32>
    %177 = arith.addf %175, %176 : vector<8x64xf32>
    %178 = math.tanh %177 : vector<8x64xf32>
    %179 = arith.mulf %174, %178 : vector<8x64xf32>
    %180 = vector.extract_strided_slice %11 {offsets = [5, 0, 0], sizes = [1, 8, 64], strides = [1, 1, 1]} : vector<8x8x64xi1> to vector<1x8x64xi1>
    %181 = vector.shape_cast %180 : vector<1x8x64xi1> to vector<8x64xi1>
    %cst_43 = arith.constant 0.000000e+00 : f32
    %182 = vector.broadcast %cst_43 : f32 to vector<8x64xf32>
    %183 = arith.select %181, %179, %182 : vector<8x64xi1>, vector<8x64xf32>
    %184 = arith.select %181, %179, %155 : vector<8x64xi1>, vector<8x64xf32>
    %185 = arith.select %181, %177, %156 : vector<8x64xi1>, vector<8x64xf32>
    %186 = vector.extract_strided_slice %183 {offsets = [0, 0], sizes = [8, 32], strides = [1, 1]} : vector<8x64xf32> to vector<8x32xf32>
    %187 = vector.extract_strided_slice %183 {offsets = [0, 32], sizes = [8, 32], strides = [1, 1]} : vector<8x64xf32> to vector<8x32xf32>
    %188 = vector.extract_strided_slice %7 {offsets = [6, 0, 0], sizes = [1, 8, 256], strides = [1, 1, 1]} : vector<8x8x256xf32> to vector<1x8x256xf32>
    %189 = vector.shape_cast %188 : vector<1x8x256xf32> to vector<8x256xf32>
    %cst_44 = arith.constant dense<0.000000e+00> : vector<8x256xf32>
    %190 = tpu.matmul %184, %8, %cst_44 {dimension_numbers = #tpu.dot_dimension_numbers<[1], [0], [0], [1], [0, 0, 1, 1], [], []>} : vector<8x64xf32>, vector<64x256xf32>, vector<8x256xf32> -> vector<8x256xf32>
    %191 = arith.addf %189, %190 : vector<8x256xf32>
    %cst_45 = arith.constant 5.000000e-01 : f32
    %192 = vector.broadcast %cst_45 : f32 to vector<8x256xf32>
    %193 = arith.mulf %192, %191 : vector<8x256xf32>
    %194 = math.tanh %193 : vector<8x256xf32>
    %cst_46 = arith.constant 1.000000e+00 : f32
    %195 = vector.broadcast %cst_46 : f32 to vector<8x256xf32>
    %196 = arith.addf %194, %195 : vector<8x256xf32>
    %cst_47 = arith.constant 5.000000e-01 : f32
    %197 = vector.broadcast %cst_47 : f32 to vector<8x256xf32>
    %198 = arith.mulf %197, %196 : vector<8x256xf32>
    %199 = math.tanh %191 : vector<8x256xf32>
    %200 = vector.extract_strided_slice %198 {offsets = [0, 0], sizes = [8, 64], strides = [1, 1]} : vector<8x256xf32> to vector<8x64xf32>
    %201 = vector.extract_strided_slice %198 {offsets = [0, 64], sizes = [8, 64], strides = [1, 1]} : vector<8x256xf32> to vector<8x64xf32>
    %202 = vector.extract_strided_slice %199 {offsets = [0, 128], sizes = [8, 64], strides = [1, 1]} : vector<8x256xf32> to vector<8x64xf32>
    %203 = vector.extract_strided_slice %198 {offsets = [0, 192], sizes = [8, 64], strides = [1, 1]} : vector<8x256xf32> to vector<8x64xf32>
    %204 = arith.mulf %201, %185 : vector<8x64xf32>
    %205 = arith.mulf %200, %202 : vector<8x64xf32>
    %206 = arith.addf %204, %205 : vector<8x64xf32>
    %207 = math.tanh %206 : vector<8x64xf32>
    %208 = arith.mulf %203, %207 : vector<8x64xf32>
    %209 = vector.extract_strided_slice %11 {offsets = [6, 0, 0], sizes = [1, 8, 64], strides = [1, 1, 1]} : vector<8x8x64xi1> to vector<1x8x64xi1>
    %210 = vector.shape_cast %209 : vector<1x8x64xi1> to vector<8x64xi1>
    %cst_48 = arith.constant 0.000000e+00 : f32
    %211 = vector.broadcast %cst_48 : f32 to vector<8x64xf32>
    %212 = arith.select %210, %208, %211 : vector<8x64xi1>, vector<8x64xf32>
    %213 = arith.select %210, %208, %184 : vector<8x64xi1>, vector<8x64xf32>
    %214 = arith.select %210, %206, %185 : vector<8x64xi1>, vector<8x64xf32>
    %215 = vector.extract_strided_slice %212 {offsets = [0, 0], sizes = [8, 32], strides = [1, 1]} : vector<8x64xf32> to vector<8x32xf32>
    %216 = vector.extract_strided_slice %212 {offsets = [0, 32], sizes = [8, 32], strides = [1, 1]} : vector<8x64xf32> to vector<8x32xf32>
    %217 = vector.extract_strided_slice %7 {offsets = [7, 0, 0], sizes = [1, 8, 256], strides = [1, 1, 1]} : vector<8x8x256xf32> to vector<1x8x256xf32>
    %218 = vector.shape_cast %217 : vector<1x8x256xf32> to vector<8x256xf32>
    %cst_49 = arith.constant dense<0.000000e+00> : vector<8x256xf32>
    %219 = tpu.matmul %213, %8, %cst_49 {dimension_numbers = #tpu.dot_dimension_numbers<[1], [0], [0], [1], [0, 0, 1, 1], [], []>} : vector<8x64xf32>, vector<64x256xf32>, vector<8x256xf32> -> vector<8x256xf32>
    %220 = arith.addf %218, %219 : vector<8x256xf32>
    %cst_50 = arith.constant 5.000000e-01 : f32
    %221 = vector.broadcast %cst_50 : f32 to vector<8x256xf32>
    %222 = arith.mulf %221, %220 : vector<8x256xf32>
    %223 = math.tanh %222 : vector<8x256xf32>
    %cst_51 = arith.constant 1.000000e+00 : f32
    %224 = vector.broadcast %cst_51 : f32 to vector<8x256xf32>
    %225 = arith.addf %223, %224 : vector<8x256xf32>
    %cst_52 = arith.constant 5.000000e-01 : f32
    %226 = vector.broadcast %cst_52 : f32 to vector<8x256xf32>
    %227 = arith.mulf %226, %225 : vector<8x256xf32>
    %228 = math.tanh %220 : vector<8x256xf32>
    %229 = vector.extract_strided_slice %227 {offsets = [0, 0], sizes = [8, 64], strides = [1, 1]} : vector<8x256xf32> to vector<8x64xf32>
    %230 = vector.extract_strided_slice %227 {offsets = [0, 64], sizes = [8, 64], strides = [1, 1]} : vector<8x256xf32> to vector<8x64xf32>
    %231 = vector.extract_strided_slice %228 {offsets = [0, 128], sizes = [8, 64], strides = [1, 1]} : vector<8x256xf32> to vector<8x64xf32>
    %232 = vector.extract_strided_slice %227 {offsets = [0, 192], sizes = [8, 64], strides = [1, 1]} : vector<8x256xf32> to vector<8x64xf32>
    %233 = arith.mulf %230, %214 : vector<8x64xf32>
    %234 = arith.mulf %229, %231 : vector<8x64xf32>
    %235 = arith.addf %233, %234 : vector<8x64xf32>
    %236 = math.tanh %235 : vector<8x64xf32>
    %237 = arith.mulf %232, %236 : vector<8x64xf32>
    %238 = vector.extract_strided_slice %11 {offsets = [7, 0, 0], sizes = [1, 8, 64], strides = [1, 1, 1]} : vector<8x8x64xi1> to vector<1x8x64xi1>
    %239 = vector.shape_cast %238 : vector<1x8x64xi1> to vector<8x64xi1>
    %cst_53 = arith.constant 0.000000e+00 : f32
    %240 = vector.broadcast %cst_53 : f32 to vector<8x64xf32>
    %241 = arith.select %239, %237, %240 : vector<8x64xi1>, vector<8x64xf32>
    %242 = arith.select %239, %237, %213 : vector<8x64xi1>, vector<8x64xf32>
    %243 = arith.select %239, %235, %214 : vector<8x64xi1>, vector<8x64xf32>
    %244 = vector.extract_strided_slice %241 {offsets = [0, 0], sizes = [8, 32], strides = [1, 1]} : vector<8x64xf32> to vector<8x32xf32>
    %245 = vector.extract_strided_slice %241 {offsets = [0, 32], sizes = [8, 32], strides = [1, 1]} : vector<8x64xf32> to vector<8x32xf32>
    %246 = tpu.concatenate %242, %243 in 0 : vector<8x64xf32>, vector<8x64xf32> -> vector<16x64xf32>
    %c0_54 = arith.constant 0 : index
    %c0_55 = arith.constant 0 : index
    %247 = vector.load %arg9[%c0_54, %c0_55] : memref<64x64xf32, #tpu.memory_space<vmem>>, vector<64x64xf32>
    %cst_56 = arith.constant dense<0.000000e+00> : vector<16x64xf32>
    %248 = tpu.matmul %246, %247, %cst_56 {dimension_numbers = #tpu.dot_dimension_numbers<[1], [0], [0], [1], [0, 0, 1, 1], [], []>} : vector<16x64xf32>, vector<64x64xf32>, vector<16x64xf32> -> vector<16x64xf32>
    %249 = vector.extract_strided_slice %248 {offsets = [0, 0], sizes = [8, 32], strides = [1, 1]} : vector<16x64xf32> to vector<8x32xf32>
    %250 = vector.extract_strided_slice %248 {offsets = [8, 32], sizes = [8, 32], strides = [1, 1]} : vector<16x64xf32> to vector<8x32xf32>
    %251 = tpu.concatenate %41, %245 in 1 : vector<8x32xf32>, vector<8x32xf32> -> vector<8x64xf32>
    %252 = tpu.concatenate %70, %216 in 1 : vector<8x32xf32>, vector<8x32xf32> -> vector<8x64xf32>
    %253 = tpu.concatenate %99, %187 in 1 : vector<8x32xf32>, vector<8x32xf32> -> vector<8x64xf32>
    %254 = tpu.concatenate %128, %158 in 1 : vector<8x32xf32>, vector<8x32xf32> -> vector<8x64xf32>
    %255 = tpu.concatenate %157, %129 in 1 : vector<8x32xf32>, vector<8x32xf32> -> vector<8x64xf32>
    %256 = tpu.concatenate %186, %100 in 1 : vector<8x32xf32>, vector<8x32xf32> -> vector<8x64xf32>
    %257 = tpu.concatenate %215, %71 in 1 : vector<8x32xf32>, vector<8x32xf32> -> vector<8x64xf32>
    %258 = tpu.concatenate %244, %42 in 1 : vector<8x32xf32>, vector<8x32xf32> -> vector<8x64xf32>
    %259 = tpu.concatenate %251, %252, %253, %254, %255, %256, %257, %258 in 0 : vector<8x64xf32>, vector<8x64xf32>, vector<8x64xf32>, vector<8x64xf32>, vector<8x64xf32>, vector<8x64xf32>, vector<8x64xf32>, vector<8x64xf32> -> vector<64x64xf32>
    %c0_57 = arith.constant 0 : index
    %c0_58 = arith.constant 0 : index
    %260 = vector.load %arg10[%c0_57, %c0_58] : memref<64x64xf32, #tpu.memory_space<vmem>>, vector<64x64xf32>
    %cst_59 = arith.constant dense<0.000000e+00> : vector<64x64xf32>
    %261 = tpu.matmul %259, %260, %cst_59 {dimension_numbers = #tpu.dot_dimension_numbers<[1], [0], [0], [1], [0, 0, 1, 1], [], []>} : vector<64x64xf32>, vector<64x64xf32>, vector<64x64xf32> -> vector<64x64xf32>
    %262 = vector.shape_cast %261 : vector<64x64xf32> to vector<8x8x64xf32>
    %263 = vector.extract_strided_slice %262 {offsets = [0, 0, 0], sizes = [8, 8, 32], strides = [1, 1, 1]} : vector<8x8x64xf32> to vector<8x8x32xf32>
    %264 = vector.extract_strided_slice %262 {offsets = [0, 0, 32], sizes = [8, 8, 32], strides = [1, 1, 1]} : vector<8x8x64xf32> to vector<8x8x32xf32>
    %c0_60 = arith.constant 0 : index
    %c0_61 = arith.constant 0 : index
    %265 = vector.load %arg2[%c0_60, %c0_61] : memref<8x8xf32, #tpu.memory_space<vmem>>, vector<8x8xf32>
    %cst_62 = arith.constant 5.000000e-01 : f32
    %266 = vector.broadcast %cst_62 : f32 to vector<8x8xf32>
    %267 = arith.cmpf ogt, %265, %266 : vector<8x8xf32>
    %c0_63 = arith.constant 0 : index
    %c0_64 = arith.constant 0 : index
    %c0_65 = arith.constant 0 : index
    %268 = vector.load %arg3[%c0_63, %c0_64, %c0_65] : memref<6x8x32xf32, #tpu.memory_space<vmem>>, vector<6x8x32xf32>
    %269 = vector.shape_cast %268 : vector<6x8x32xf32> to vector<48x32xf32>
    %c0_66 = arith.constant 0 : index
    %c0_67 = arith.constant 0 : index
    %270 = vector.load %arg11[%c0_66, %c0_67] : memref<32x128xf32, #tpu.memory_space<vmem>>, vector<32x128xf32>
    %cst_68 = arith.constant dense<0.000000e+00> : vector<48x128xf32>
    %271 = tpu.matmul %269, %270, %cst_68 {dimension_numbers = #tpu.dot_dimension_numbers<[1], [0], [0], [1], [0, 0, 1, 1], [], []>} : vector<48x32xf32>, vector<32x128xf32>, vector<48x128xf32> -> vector<48x128xf32>
    %c0_69 = arith.constant 0 : index
    %c0_70 = arith.constant 0 : index
    %272 = vector.load %arg12[%c0_69, %c0_70] : memref<1x128xf32, #tpu.memory_space<vmem>>, vector<1x128xf32>
    %273 = vector.broadcast %272 : vector<1x128xf32> to vector<48x128xf32>
    %274 = arith.addf %271, %273 : vector<48x128xf32>
    %275 = vector.shape_cast %274 : vector<48x128xf32> to vector<6x8x128xf32>
    %c0_71 = arith.constant 0 : index
    %c0_72 = arith.constant 0 : index
    %276 = vector.load %arg13[%c0_71, %c0_72] : memref<64x128xf32, #tpu.memory_space<vmem>>, vector<64x128xf32>
    %c0_73 = arith.constant 0 : index
    %c0_74 = arith.constant 0 : index
    %277 = vector.load %arg14[%c0_73, %c0_74] : memref<32x32xf32, #tpu.memory_space<vmem>>, vector<32x32xf32>
    %cst_75 = arith.constant 0.000000e+00 : f32
    %278 = vector.broadcast %cst_75 : f32 to vector<8x32xf32>
    %279 = tpu.concatenate %278, %249 in 1 : vector<8x32xf32>, vector<8x32xf32> -> vector<8x64xf32>
    %280 = vector.extract_strided_slice %275 {offsets = [0, 0, 0], sizes = [1, 8, 128], strides = [1, 1, 1]} : vector<6x8x128xf32> to vector<1x8x128xf32>
    %281 = vector.shape_cast %280 : vector<1x8x128xf32> to vector<8x128xf32>
    %cst_76 = arith.constant dense<0.000000e+00> : vector<8x128xf32>
    %282 = tpu.matmul %279, %276, %cst_76 {dimension_numbers = #tpu.dot_dimension_numbers<[1], [0], [0], [1], [0, 0, 1, 1], [], []>} : vector<8x64xf32>, vector<64x128xf32>, vector<8x128xf32> -> vector<8x128xf32>
    %283 = arith.addf %281, %282 : vector<8x128xf32>
    %cst_77 = arith.constant 5.000000e-01 : f32
    %284 = vector.broadcast %cst_77 : f32 to vector<8x128xf32>
    %285 = arith.mulf %284, %283 : vector<8x128xf32>
    %286 = math.tanh %285 : vector<8x128xf32>
    %cst_78 = arith.constant 1.000000e+00 : f32
    %287 = vector.broadcast %cst_78 : f32 to vector<8x128xf32>
    %288 = arith.addf %286, %287 : vector<8x128xf32>
    %cst_79 = arith.constant 5.000000e-01 : f32
    %289 = vector.broadcast %cst_79 : f32 to vector<8x128xf32>
    %290 = arith.mulf %289, %288 : vector<8x128xf32>
    %291 = math.tanh %283 : vector<8x128xf32>
    %292 = vector.extract_strided_slice %290 {offsets = [0, 0], sizes = [8, 32], strides = [1, 1]} : vector<8x128xf32> to vector<8x32xf32>
    %293 = vector.extract_strided_slice %290 {offsets = [0, 32], sizes = [8, 32], strides = [1, 1]} : vector<8x128xf32> to vector<8x32xf32>
    %294 = vector.extract_strided_slice %291 {offsets = [0, 64], sizes = [8, 32], strides = [1, 1]} : vector<8x128xf32> to vector<8x32xf32>
    %295 = vector.extract_strided_slice %290 {offsets = [0, 96], sizes = [8, 32], strides = [1, 1]} : vector<8x128xf32> to vector<8x32xf32>
    %296 = arith.mulf %293, %250 : vector<8x32xf32>
    %297 = arith.mulf %292, %294 : vector<8x32xf32>
    %298 = arith.addf %296, %297 : vector<8x32xf32>
    %299 = math.tanh %298 : vector<8x32xf32>
    %300 = arith.mulf %295, %299 : vector<8x32xf32>
    %301 = vector.shape_cast %300 : vector<8x32xf32> to vector<1x8x32xf32>
    %302 = vector.broadcast %301 : vector<1x8x32xf32> to vector<8x8x32xf32>
    %303 = arith.mulf %263, %302 : vector<8x8x32xf32>
    %cst_80 = arith.constant dense<0.000000e+00> : vector<8x8xf32>
    %304 = vector.multi_reduction <add>, %303, %cst_80 [2] : vector<8x8x32xf32> to vector<8x8xf32>
    %cst_81 = arith.constant -1.000000e+30 : f32
    %305 = vector.broadcast %cst_81 : f32 to vector<8x8xf32>
    %306 = arith.select %267, %305, %304 : vector<8x8xi1>, vector<8x8xf32>
    %cst_82 = arith.constant dense<0xFF800000> : vector<8xf32>
    %307 = vector.multi_reduction <maximumf>, %306, %cst_82 [0] : vector<8x8xf32> to vector<8xf32>
    %308 = vector.shape_cast %307 : vector<8xf32> to vector<1x8xf32>
    %309 = vector.broadcast %308 : vector<1x8xf32> to vector<8x8xf32>
    %310 = arith.subf %306, %309 : vector<8x8xf32>
    %311 = math.exp %310 : vector<8x8xf32>
    %cst_83 = arith.constant dense<0.000000e+00> : vector<8xf32>
    %312 = vector.multi_reduction <add>, %311, %cst_83 [0] : vector<8x8xf32> to vector<8xf32>
    %313 = vector.shape_cast %312 : vector<8xf32> to vector<1x8xf32>
    %314 = tpu.reciprocal %313 {approx = true} : vector<1x8xf32> -> vector<1x8xf32>
    %315 = vector.broadcast %314 : vector<1x8xf32> to vector<8x8xf32>
    %316 = arith.mulf %311, %315 : vector<8x8xf32>
    %317 = vector.shape_cast %316 : vector<8x8xf32> to vector<8x8x1xf32>
    %318 = vector.broadcast %317 : vector<8x8x1xf32> to vector<8x8x32xf32>
    %319 = arith.mulf %318, %264 : vector<8x8x32xf32>
    %cst_84 = arith.constant dense<0.000000e+00> : vector<8x32xf32>
    %320 = vector.multi_reduction <add>, %319, %cst_84 [0] : vector<8x8x32xf32> to vector<8x32xf32>
    %cst_85 = arith.constant dense<0.000000e+00> : vector<8x32xf32>
    %321 = tpu.matmul %300, %277, %cst_85 {dimension_numbers = #tpu.dot_dimension_numbers<[1], [0], [0], [1], [0, 0, 1, 1], [], []>} : vector<8x32xf32>, vector<32x32xf32>, vector<8x32xf32> -> vector<8x32xf32>
    %322 = arith.addf %321, %320 : vector<8x32xf32>
    %323 = math.tanh %322 : vector<8x32xf32>
    %324 = tpu.concatenate %323, %300 in 1 : vector<8x32xf32>, vector<8x32xf32> -> vector<8x64xf32>
    %325 = vector.extract_strided_slice %275 {offsets = [1, 0, 0], sizes = [1, 8, 128], strides = [1, 1, 1]} : vector<6x8x128xf32> to vector<1x8x128xf32>
    %326 = vector.shape_cast %325 : vector<1x8x128xf32> to vector<8x128xf32>
    %cst_86 = arith.constant dense<0.000000e+00> : vector<8x128xf32>
    %327 = tpu.matmul %324, %276, %cst_86 {dimension_numbers = #tpu.dot_dimension_numbers<[1], [0], [0], [1], [0, 0, 1, 1], [], []>} : vector<8x64xf32>, vector<64x128xf32>, vector<8x128xf32> -> vector<8x128xf32>
    %328 = arith.addf %326, %327 : vector<8x128xf32>
    %cst_87 = arith.constant 5.000000e-01 : f32
    %329 = vector.broadcast %cst_87 : f32 to vector<8x128xf32>
    %330 = arith.mulf %329, %328 : vector<8x128xf32>
    %331 = math.tanh %330 : vector<8x128xf32>
    %cst_88 = arith.constant 1.000000e+00 : f32
    %332 = vector.broadcast %cst_88 : f32 to vector<8x128xf32>
    %333 = arith.addf %331, %332 : vector<8x128xf32>
    %cst_89 = arith.constant 5.000000e-01 : f32
    %334 = vector.broadcast %cst_89 : f32 to vector<8x128xf32>
    %335 = arith.mulf %334, %333 : vector<8x128xf32>
    %336 = math.tanh %328 : vector<8x128xf32>
    %337 = vector.extract_strided_slice %335 {offsets = [0, 0], sizes = [8, 32], strides = [1, 1]} : vector<8x128xf32> to vector<8x32xf32>
    %338 = vector.extract_strided_slice %335 {offsets = [0, 32], sizes = [8, 32], strides = [1, 1]} : vector<8x128xf32> to vector<8x32xf32>
    %339 = vector.extract_strided_slice %336 {offsets = [0, 64], sizes = [8, 32], strides = [1, 1]} : vector<8x128xf32> to vector<8x32xf32>
    %340 = vector.extract_strided_slice %335 {offsets = [0, 96], sizes = [8, 32], strides = [1, 1]} : vector<8x128xf32> to vector<8x32xf32>
    %341 = arith.mulf %338, %298 : vector<8x32xf32>
    %342 = arith.mulf %337, %339 : vector<8x32xf32>
    %343 = arith.addf %341, %342 : vector<8x32xf32>
    %344 = math.tanh %343 : vector<8x32xf32>
    %345 = arith.mulf %340, %344 : vector<8x32xf32>
    %346 = vector.shape_cast %345 : vector<8x32xf32> to vector<1x8x32xf32>
    %347 = vector.broadcast %346 : vector<1x8x32xf32> to vector<8x8x32xf32>
    %348 = arith.mulf %263, %347 : vector<8x8x32xf32>
    %cst_90 = arith.constant dense<0.000000e+00> : vector<8x8xf32>
    %349 = vector.multi_reduction <add>, %348, %cst_90 [2] : vector<8x8x32xf32> to vector<8x8xf32>
    %cst_91 = arith.constant -1.000000e+30 : f32
    %350 = vector.broadcast %cst_91 : f32 to vector<8x8xf32>
    %351 = arith.select %267, %350, %349 : vector<8x8xi1>, vector<8x8xf32>
    %cst_92 = arith.constant dense<0xFF800000> : vector<8xf32>
    %352 = vector.multi_reduction <maximumf>, %351, %cst_92 [0] : vector<8x8xf32> to vector<8xf32>
    %353 = vector.shape_cast %352 : vector<8xf32> to vector<1x8xf32>
    %354 = vector.broadcast %353 : vector<1x8xf32> to vector<8x8xf32>
    %355 = arith.subf %351, %354 : vector<8x8xf32>
    %356 = math.exp %355 : vector<8x8xf32>
    %cst_93 = arith.constant dense<0.000000e+00> : vector<8xf32>
    %357 = vector.multi_reduction <add>, %356, %cst_93 [0] : vector<8x8xf32> to vector<8xf32>
    %358 = vector.shape_cast %357 : vector<8xf32> to vector<1x8xf32>
    %359 = tpu.reciprocal %358 {approx = true} : vector<1x8xf32> -> vector<1x8xf32>
    %360 = vector.broadcast %359 : vector<1x8xf32> to vector<8x8xf32>
    %361 = arith.mulf %356, %360 : vector<8x8xf32>
    %362 = vector.shape_cast %361 : vector<8x8xf32> to vector<8x8x1xf32>
    %363 = vector.broadcast %362 : vector<8x8x1xf32> to vector<8x8x32xf32>
    %364 = arith.mulf %363, %264 : vector<8x8x32xf32>
    %cst_94 = arith.constant dense<0.000000e+00> : vector<8x32xf32>
    %365 = vector.multi_reduction <add>, %364, %cst_94 [0] : vector<8x8x32xf32> to vector<8x32xf32>
    %cst_95 = arith.constant dense<0.000000e+00> : vector<8x32xf32>
    %366 = tpu.matmul %345, %277, %cst_95 {dimension_numbers = #tpu.dot_dimension_numbers<[1], [0], [0], [1], [0, 0, 1, 1], [], []>} : vector<8x32xf32>, vector<32x32xf32>, vector<8x32xf32> -> vector<8x32xf32>
    %367 = arith.addf %366, %365 : vector<8x32xf32>
    %368 = math.tanh %367 : vector<8x32xf32>
    %369 = tpu.concatenate %368, %345 in 1 : vector<8x32xf32>, vector<8x32xf32> -> vector<8x64xf32>
    %370 = vector.extract_strided_slice %275 {offsets = [2, 0, 0], sizes = [1, 8, 128], strides = [1, 1, 1]} : vector<6x8x128xf32> to vector<1x8x128xf32>
    %371 = vector.shape_cast %370 : vector<1x8x128xf32> to vector<8x128xf32>
    %cst_96 = arith.constant dense<0.000000e+00> : vector<8x128xf32>
    %372 = tpu.matmul %369, %276, %cst_96 {dimension_numbers = #tpu.dot_dimension_numbers<[1], [0], [0], [1], [0, 0, 1, 1], [], []>} : vector<8x64xf32>, vector<64x128xf32>, vector<8x128xf32> -> vector<8x128xf32>
    %373 = arith.addf %371, %372 : vector<8x128xf32>
    %cst_97 = arith.constant 5.000000e-01 : f32
    %374 = vector.broadcast %cst_97 : f32 to vector<8x128xf32>
    %375 = arith.mulf %374, %373 : vector<8x128xf32>
    %376 = math.tanh %375 : vector<8x128xf32>
    %cst_98 = arith.constant 1.000000e+00 : f32
    %377 = vector.broadcast %cst_98 : f32 to vector<8x128xf32>
    %378 = arith.addf %376, %377 : vector<8x128xf32>
    %cst_99 = arith.constant 5.000000e-01 : f32
    %379 = vector.broadcast %cst_99 : f32 to vector<8x128xf32>
    %380 = arith.mulf %379, %378 : vector<8x128xf32>
    %381 = math.tanh %373 : vector<8x128xf32>
    %382 = vector.extract_strided_slice %380 {offsets = [0, 0], sizes = [8, 32], strides = [1, 1]} : vector<8x128xf32> to vector<8x32xf32>
    %383 = vector.extract_strided_slice %380 {offsets = [0, 32], sizes = [8, 32], strides = [1, 1]} : vector<8x128xf32> to vector<8x32xf32>
    %384 = vector.extract_strided_slice %381 {offsets = [0, 64], sizes = [8, 32], strides = [1, 1]} : vector<8x128xf32> to vector<8x32xf32>
    %385 = vector.extract_strided_slice %380 {offsets = [0, 96], sizes = [8, 32], strides = [1, 1]} : vector<8x128xf32> to vector<8x32xf32>
    %386 = arith.mulf %383, %343 : vector<8x32xf32>
    %387 = arith.mulf %382, %384 : vector<8x32xf32>
    %388 = arith.addf %386, %387 : vector<8x32xf32>
    %389 = math.tanh %388 : vector<8x32xf32>
    %390 = arith.mulf %385, %389 : vector<8x32xf32>
    %391 = vector.shape_cast %390 : vector<8x32xf32> to vector<1x8x32xf32>
    %392 = vector.broadcast %391 : vector<1x8x32xf32> to vector<8x8x32xf32>
    %393 = arith.mulf %263, %392 : vector<8x8x32xf32>
    %cst_100 = arith.constant dense<0.000000e+00> : vector<8x8xf32>
    %394 = vector.multi_reduction <add>, %393, %cst_100 [2] : vector<8x8x32xf32> to vector<8x8xf32>
    %cst_101 = arith.constant -1.000000e+30 : f32
    %395 = vector.broadcast %cst_101 : f32 to vector<8x8xf32>
    %396 = arith.select %267, %395, %394 : vector<8x8xi1>, vector<8x8xf32>
    %cst_102 = arith.constant dense<0xFF800000> : vector<8xf32>
    %397 = vector.multi_reduction <maximumf>, %396, %cst_102 [0] : vector<8x8xf32> to vector<8xf32>
    %398 = vector.shape_cast %397 : vector<8xf32> to vector<1x8xf32>
    %399 = vector.broadcast %398 : vector<1x8xf32> to vector<8x8xf32>
    %400 = arith.subf %396, %399 : vector<8x8xf32>
    %401 = math.exp %400 : vector<8x8xf32>
    %cst_103 = arith.constant dense<0.000000e+00> : vector<8xf32>
    %402 = vector.multi_reduction <add>, %401, %cst_103 [0] : vector<8x8xf32> to vector<8xf32>
    %403 = vector.shape_cast %402 : vector<8xf32> to vector<1x8xf32>
    %404 = tpu.reciprocal %403 {approx = true} : vector<1x8xf32> -> vector<1x8xf32>
    %405 = vector.broadcast %404 : vector<1x8xf32> to vector<8x8xf32>
    %406 = arith.mulf %401, %405 : vector<8x8xf32>
    %407 = vector.shape_cast %406 : vector<8x8xf32> to vector<8x8x1xf32>
    %408 = vector.broadcast %407 : vector<8x8x1xf32> to vector<8x8x32xf32>
    %409 = arith.mulf %408, %264 : vector<8x8x32xf32>
    %cst_104 = arith.constant dense<0.000000e+00> : vector<8x32xf32>
    %410 = vector.multi_reduction <add>, %409, %cst_104 [0] : vector<8x8x32xf32> to vector<8x32xf32>
    %cst_105 = arith.constant dense<0.000000e+00> : vector<8x32xf32>
    %411 = tpu.matmul %390, %277, %cst_105 {dimension_numbers = #tpu.dot_dimension_numbers<[1], [0], [0], [1], [0, 0, 1, 1], [], []>} : vector<8x32xf32>, vector<32x32xf32>, vector<8x32xf32> -> vector<8x32xf32>
    %412 = arith.addf %411, %410 : vector<8x32xf32>
    %413 = math.tanh %412 : vector<8x32xf32>
    %414 = tpu.concatenate %413, %390 in 1 : vector<8x32xf32>, vector<8x32xf32> -> vector<8x64xf32>
    %415 = vector.extract_strided_slice %275 {offsets = [3, 0, 0], sizes = [1, 8, 128], strides = [1, 1, 1]} : vector<6x8x128xf32> to vector<1x8x128xf32>
    %416 = vector.shape_cast %415 : vector<1x8x128xf32> to vector<8x128xf32>
    %cst_106 = arith.constant dense<0.000000e+00> : vector<8x128xf32>
    %417 = tpu.matmul %414, %276, %cst_106 {dimension_numbers = #tpu.dot_dimension_numbers<[1], [0], [0], [1], [0, 0, 1, 1], [], []>} : vector<8x64xf32>, vector<64x128xf32>, vector<8x128xf32> -> vector<8x128xf32>
    %418 = arith.addf %416, %417 : vector<8x128xf32>
    %cst_107 = arith.constant 5.000000e-01 : f32
    %419 = vector.broadcast %cst_107 : f32 to vector<8x128xf32>
    %420 = arith.mulf %419, %418 : vector<8x128xf32>
    %421 = math.tanh %420 : vector<8x128xf32>
    %cst_108 = arith.constant 1.000000e+00 : f32
    %422 = vector.broadcast %cst_108 : f32 to vector<8x128xf32>
    %423 = arith.addf %421, %422 : vector<8x128xf32>
    %cst_109 = arith.constant 5.000000e-01 : f32
    %424 = vector.broadcast %cst_109 : f32 to vector<8x128xf32>
    %425 = arith.mulf %424, %423 : vector<8x128xf32>
    %426 = math.tanh %418 : vector<8x128xf32>
    %427 = vector.extract_strided_slice %425 {offsets = [0, 0], sizes = [8, 32], strides = [1, 1]} : vector<8x128xf32> to vector<8x32xf32>
    %428 = vector.extract_strided_slice %425 {offsets = [0, 32], sizes = [8, 32], strides = [1, 1]} : vector<8x128xf32> to vector<8x32xf32>
    %429 = vector.extract_strided_slice %426 {offsets = [0, 64], sizes = [8, 32], strides = [1, 1]} : vector<8x128xf32> to vector<8x32xf32>
    %430 = vector.extract_strided_slice %425 {offsets = [0, 96], sizes = [8, 32], strides = [1, 1]} : vector<8x128xf32> to vector<8x32xf32>
    %431 = arith.mulf %428, %388 : vector<8x32xf32>
    %432 = arith.mulf %427, %429 : vector<8x32xf32>
    %433 = arith.addf %431, %432 : vector<8x32xf32>
    %434 = math.tanh %433 : vector<8x32xf32>
    %435 = arith.mulf %430, %434 : vector<8x32xf32>
    %436 = vector.shape_cast %435 : vector<8x32xf32> to vector<1x8x32xf32>
    %437 = vector.broadcast %436 : vector<1x8x32xf32> to vector<8x8x32xf32>
    %438 = arith.mulf %263, %437 : vector<8x8x32xf32>
    %cst_110 = arith.constant dense<0.000000e+00> : vector<8x8xf32>
    %439 = vector.multi_reduction <add>, %438, %cst_110 [2] : vector<8x8x32xf32> to vector<8x8xf32>
    %cst_111 = arith.constant -1.000000e+30 : f32
    %440 = vector.broadcast %cst_111 : f32 to vector<8x8xf32>
    %441 = arith.select %267, %440, %439 : vector<8x8xi1>, vector<8x8xf32>
    %cst_112 = arith.constant dense<0xFF800000> : vector<8xf32>
    %442 = vector.multi_reduction <maximumf>, %441, %cst_112 [0] : vector<8x8xf32> to vector<8xf32>
    %443 = vector.shape_cast %442 : vector<8xf32> to vector<1x8xf32>
    %444 = vector.broadcast %443 : vector<1x8xf32> to vector<8x8xf32>
    %445 = arith.subf %441, %444 : vector<8x8xf32>
    %446 = math.exp %445 : vector<8x8xf32>
    %cst_113 = arith.constant dense<0.000000e+00> : vector<8xf32>
    %447 = vector.multi_reduction <add>, %446, %cst_113 [0] : vector<8x8xf32> to vector<8xf32>
    %448 = vector.shape_cast %447 : vector<8xf32> to vector<1x8xf32>
    %449 = tpu.reciprocal %448 {approx = true} : vector<1x8xf32> -> vector<1x8xf32>
    %450 = vector.broadcast %449 : vector<1x8xf32> to vector<8x8xf32>
    %451 = arith.mulf %446, %450 : vector<8x8xf32>
    %452 = vector.shape_cast %451 : vector<8x8xf32> to vector<8x8x1xf32>
    %453 = vector.broadcast %452 : vector<8x8x1xf32> to vector<8x8x32xf32>
    %454 = arith.mulf %453, %264 : vector<8x8x32xf32>
    %cst_114 = arith.constant dense<0.000000e+00> : vector<8x32xf32>
    %455 = vector.multi_reduction <add>, %454, %cst_114 [0] : vector<8x8x32xf32> to vector<8x32xf32>
    %cst_115 = arith.constant dense<0.000000e+00> : vector<8x32xf32>
    %456 = tpu.matmul %435, %277, %cst_115 {dimension_numbers = #tpu.dot_dimension_numbers<[1], [0], [0], [1], [0, 0, 1, 1], [], []>} : vector<8x32xf32>, vector<32x32xf32>, vector<8x32xf32> -> vector<8x32xf32>
    %457 = arith.addf %456, %455 : vector<8x32xf32>
    %458 = math.tanh %457 : vector<8x32xf32>
    %459 = tpu.concatenate %458, %435 in 1 : vector<8x32xf32>, vector<8x32xf32> -> vector<8x64xf32>
    %460 = vector.extract_strided_slice %275 {offsets = [4, 0, 0], sizes = [1, 8, 128], strides = [1, 1, 1]} : vector<6x8x128xf32> to vector<1x8x128xf32>
    %461 = vector.shape_cast %460 : vector<1x8x128xf32> to vector<8x128xf32>
    %cst_116 = arith.constant dense<0.000000e+00> : vector<8x128xf32>
    %462 = tpu.matmul %459, %276, %cst_116 {dimension_numbers = #tpu.dot_dimension_numbers<[1], [0], [0], [1], [0, 0, 1, 1], [], []>} : vector<8x64xf32>, vector<64x128xf32>, vector<8x128xf32> -> vector<8x128xf32>
    %463 = arith.addf %461, %462 : vector<8x128xf32>
    %cst_117 = arith.constant 5.000000e-01 : f32
    %464 = vector.broadcast %cst_117 : f32 to vector<8x128xf32>
    %465 = arith.mulf %464, %463 : vector<8x128xf32>
    %466 = math.tanh %465 : vector<8x128xf32>
    %cst_118 = arith.constant 1.000000e+00 : f32
    %467 = vector.broadcast %cst_118 : f32 to vector<8x128xf32>
    %468 = arith.addf %466, %467 : vector<8x128xf32>
    %cst_119 = arith.constant 5.000000e-01 : f32
    %469 = vector.broadcast %cst_119 : f32 to vector<8x128xf32>
    %470 = arith.mulf %469, %468 : vector<8x128xf32>
    %471 = math.tanh %463 : vector<8x128xf32>
    %472 = vector.extract_strided_slice %470 {offsets = [0, 0], sizes = [8, 32], strides = [1, 1]} : vector<8x128xf32> to vector<8x32xf32>
    %473 = vector.extract_strided_slice %470 {offsets = [0, 32], sizes = [8, 32], strides = [1, 1]} : vector<8x128xf32> to vector<8x32xf32>
    %474 = vector.extract_strided_slice %471 {offsets = [0, 64], sizes = [8, 32], strides = [1, 1]} : vector<8x128xf32> to vector<8x32xf32>
    %475 = vector.extract_strided_slice %470 {offsets = [0, 96], sizes = [8, 32], strides = [1, 1]} : vector<8x128xf32> to vector<8x32xf32>
    %476 = arith.mulf %473, %433 : vector<8x32xf32>
    %477 = arith.mulf %472, %474 : vector<8x32xf32>
    %478 = arith.addf %476, %477 : vector<8x32xf32>
    %479 = math.tanh %478 : vector<8x32xf32>
    %480 = arith.mulf %475, %479 : vector<8x32xf32>
    %481 = vector.shape_cast %480 : vector<8x32xf32> to vector<1x8x32xf32>
    %482 = vector.broadcast %481 : vector<1x8x32xf32> to vector<8x8x32xf32>
    %483 = arith.mulf %263, %482 : vector<8x8x32xf32>
    %cst_120 = arith.constant dense<0.000000e+00> : vector<8x8xf32>
    %484 = vector.multi_reduction <add>, %483, %cst_120 [2] : vector<8x8x32xf32> to vector<8x8xf32>
    %cst_121 = arith.constant -1.000000e+30 : f32
    %485 = vector.broadcast %cst_121 : f32 to vector<8x8xf32>
    %486 = arith.select %267, %485, %484 : vector<8x8xi1>, vector<8x8xf32>
    %cst_122 = arith.constant dense<0xFF800000> : vector<8xf32>
    %487 = vector.multi_reduction <maximumf>, %486, %cst_122 [0] : vector<8x8xf32> to vector<8xf32>
    %488 = vector.shape_cast %487 : vector<8xf32> to vector<1x8xf32>
    %489 = vector.broadcast %488 : vector<1x8xf32> to vector<8x8xf32>
    %490 = arith.subf %486, %489 : vector<8x8xf32>
    %491 = math.exp %490 : vector<8x8xf32>
    %cst_123 = arith.constant dense<0.000000e+00> : vector<8xf32>
    %492 = vector.multi_reduction <add>, %491, %cst_123 [0] : vector<8x8xf32> to vector<8xf32>
    %493 = vector.shape_cast %492 : vector<8xf32> to vector<1x8xf32>
    %494 = tpu.reciprocal %493 {approx = true} : vector<1x8xf32> -> vector<1x8xf32>
    %495 = vector.broadcast %494 : vector<1x8xf32> to vector<8x8xf32>
    %496 = arith.mulf %491, %495 : vector<8x8xf32>
    %497 = vector.shape_cast %496 : vector<8x8xf32> to vector<8x8x1xf32>
    %498 = vector.broadcast %497 : vector<8x8x1xf32> to vector<8x8x32xf32>
    %499 = arith.mulf %498, %264 : vector<8x8x32xf32>
    %cst_124 = arith.constant dense<0.000000e+00> : vector<8x32xf32>
    %500 = vector.multi_reduction <add>, %499, %cst_124 [0] : vector<8x8x32xf32> to vector<8x32xf32>
    %cst_125 = arith.constant dense<0.000000e+00> : vector<8x32xf32>
    %501 = tpu.matmul %480, %277, %cst_125 {dimension_numbers = #tpu.dot_dimension_numbers<[1], [0], [0], [1], [0, 0, 1, 1], [], []>} : vector<8x32xf32>, vector<32x32xf32>, vector<8x32xf32> -> vector<8x32xf32>
    %502 = arith.addf %501, %500 : vector<8x32xf32>
    %503 = math.tanh %502 : vector<8x32xf32>
    %504 = tpu.concatenate %503, %480 in 1 : vector<8x32xf32>, vector<8x32xf32> -> vector<8x64xf32>
    %505 = vector.extract_strided_slice %275 {offsets = [5, 0, 0], sizes = [1, 8, 128], strides = [1, 1, 1]} : vector<6x8x128xf32> to vector<1x8x128xf32>
    %506 = vector.shape_cast %505 : vector<1x8x128xf32> to vector<8x128xf32>
    %cst_126 = arith.constant dense<0.000000e+00> : vector<8x128xf32>
    %507 = tpu.matmul %504, %276, %cst_126 {dimension_numbers = #tpu.dot_dimension_numbers<[1], [0], [0], [1], [0, 0, 1, 1], [], []>} : vector<8x64xf32>, vector<64x128xf32>, vector<8x128xf32> -> vector<8x128xf32>
    %508 = arith.addf %506, %507 : vector<8x128xf32>
    %cst_127 = arith.constant 5.000000e-01 : f32
    %509 = vector.broadcast %cst_127 : f32 to vector<8x128xf32>
    %510 = arith.mulf %509, %508 : vector<8x128xf32>
    %511 = math.tanh %510 : vector<8x128xf32>
    %cst_128 = arith.constant 1.000000e+00 : f32
    %512 = vector.broadcast %cst_128 : f32 to vector<8x128xf32>
    %513 = arith.addf %511, %512 : vector<8x128xf32>
    %cst_129 = arith.constant 5.000000e-01 : f32
    %514 = vector.broadcast %cst_129 : f32 to vector<8x128xf32>
    %515 = arith.mulf %514, %513 : vector<8x128xf32>
    %516 = math.tanh %508 : vector<8x128xf32>
    %517 = vector.extract_strided_slice %515 {offsets = [0, 0], sizes = [8, 32], strides = [1, 1]} : vector<8x128xf32> to vector<8x32xf32>
    %518 = vector.extract_strided_slice %515 {offsets = [0, 32], sizes = [8, 32], strides = [1, 1]} : vector<8x128xf32> to vector<8x32xf32>
    %519 = vector.extract_strided_slice %516 {offsets = [0, 64], sizes = [8, 32], strides = [1, 1]} : vector<8x128xf32> to vector<8x32xf32>
    %520 = vector.extract_strided_slice %515 {offsets = [0, 96], sizes = [8, 32], strides = [1, 1]} : vector<8x128xf32> to vector<8x32xf32>
    %521 = arith.mulf %518, %478 : vector<8x32xf32>
    %522 = arith.mulf %517, %519 : vector<8x32xf32>
    %523 = arith.addf %521, %522 : vector<8x32xf32>
    %524 = math.tanh %523 : vector<8x32xf32>
    %525 = arith.mulf %520, %524 : vector<8x32xf32>
    %526 = vector.shape_cast %525 : vector<8x32xf32> to vector<1x8x32xf32>
    %527 = vector.broadcast %526 : vector<1x8x32xf32> to vector<8x8x32xf32>
    %528 = arith.mulf %263, %527 : vector<8x8x32xf32>
    %cst_130 = arith.constant dense<0.000000e+00> : vector<8x8xf32>
    %529 = vector.multi_reduction <add>, %528, %cst_130 [2] : vector<8x8x32xf32> to vector<8x8xf32>
    %cst_131 = arith.constant -1.000000e+30 : f32
    %530 = vector.broadcast %cst_131 : f32 to vector<8x8xf32>
    %531 = arith.select %267, %530, %529 : vector<8x8xi1>, vector<8x8xf32>
    %cst_132 = arith.constant dense<0xFF800000> : vector<8xf32>
    %532 = vector.multi_reduction <maximumf>, %531, %cst_132 [0] : vector<8x8xf32> to vector<8xf32>
    %533 = vector.shape_cast %532 : vector<8xf32> to vector<1x8xf32>
    %534 = vector.broadcast %533 : vector<1x8xf32> to vector<8x8xf32>
    %535 = arith.subf %531, %534 : vector<8x8xf32>
    %536 = math.exp %535 : vector<8x8xf32>
    %cst_133 = arith.constant dense<0.000000e+00> : vector<8xf32>
    %537 = vector.multi_reduction <add>, %536, %cst_133 [0] : vector<8x8xf32> to vector<8xf32>
    %538 = vector.shape_cast %537 : vector<8xf32> to vector<1x8xf32>
    %539 = tpu.reciprocal %538 {approx = true} : vector<1x8xf32> -> vector<1x8xf32>
    %540 = vector.broadcast %539 : vector<1x8xf32> to vector<8x8xf32>
    %541 = arith.mulf %536, %540 : vector<8x8xf32>
    %542 = vector.shape_cast %541 : vector<8x8xf32> to vector<8x8x1xf32>
    %543 = vector.broadcast %542 : vector<8x8x1xf32> to vector<8x8x32xf32>
    %544 = arith.mulf %543, %264 : vector<8x8x32xf32>
    %cst_134 = arith.constant dense<0.000000e+00> : vector<8x32xf32>
    %545 = vector.multi_reduction <add>, %544, %cst_134 [0] : vector<8x8x32xf32> to vector<8x32xf32>
    %cst_135 = arith.constant dense<0.000000e+00> : vector<8x32xf32>
    %546 = tpu.matmul %525, %277, %cst_135 {dimension_numbers = #tpu.dot_dimension_numbers<[1], [0], [0], [1], [0, 0, 1, 1], [], []>} : vector<8x32xf32>, vector<32x32xf32>, vector<8x32xf32> -> vector<8x32xf32>
    %547 = arith.addf %546, %545 : vector<8x32xf32>
    %548 = math.tanh %547 : vector<8x32xf32>
    %549 = tpu.concatenate %323, %368, %413, %458, %503, %548 in 0 : vector<8x32xf32>, vector<8x32xf32>, vector<8x32xf32>, vector<8x32xf32>, vector<8x32xf32>, vector<8x32xf32> -> vector<48x32xf32>
    %c0_136 = arith.constant 0 : index
    %c0_137 = arith.constant 0 : index
    %550 = vector.load %arg15[%c0_136, %c0_137] : memref<32x128xf32, #tpu.memory_space<vmem>>, vector<32x128xf32>
    %cst_138 = arith.constant dense<0.000000e+00> : vector<48x128xf32>
    %551 = tpu.matmul %549, %550, %cst_138 {dimension_numbers = #tpu.dot_dimension_numbers<[1], [0], [0], [1], [0, 0, 1, 1], [], []>} : vector<48x32xf32>, vector<32x128xf32>, vector<48x128xf32> -> vector<48x128xf32>
    %552 = vector.shape_cast %551 : vector<48x128xf32> to vector<6x8x128xf32>
    %553 = tpu.iota {dimensions = array<i32: 2>} : vector<6x8x128xi32>
    %c64_i32 = arith.constant 64 : i32
    %554 = vector.broadcast %c64_i32 : i32 to vector<6x8x128xi32>
    %555 = arith.cmpi slt, %553, %554 : vector<6x8x128xi32>
    %cst_139 = arith.constant -1.000000e+30 : f32
    %556 = vector.broadcast %cst_139 : f32 to vector<6x8x128xf32>
    %557 = arith.select %555, %552, %556 : vector<6x8x128xi1>, vector<6x8x128xf32>
    %cst_140 = arith.constant dense<0xFF800000> : vector<6x8xf32>
    %558 = vector.multi_reduction <maximumf>, %557, %cst_140 [2] : vector<6x8x128xf32> to vector<6x8xf32>
    %559 = vector.shape_cast %558 : vector<6x8xf32> to vector<6x8x1xf32>
    %560 = vector.broadcast %559 : vector<6x8x1xf32> to vector<6x8x128xf32>
    %561 = arith.subf %557, %560 : vector<6x8x128xf32>
    %562 = math.exp %561 : vector<6x8x128xf32>
    %cst_141 = arith.constant dense<0.000000e+00> : vector<6x8xf32>
    %563 = vector.multi_reduction <add>, %562, %cst_141 [2] : vector<6x8x128xf32> to vector<6x8xf32>
    %564 = vector.shape_cast %563 : vector<6x8xf32> to vector<6x8x1xf32>
    %565 = math.log %564 : vector<6x8x1xf32>
    %566 = arith.addf %565, %559 : vector<6x8x1xf32>
    %567 = vector.broadcast %566 : vector<6x8x1xf32> to vector<6x8x128xf32>
    %568 = arith.subf %557, %567 : vector<6x8x128xf32>
    %c0_142 = arith.constant 0 : index
    %c0_143 = arith.constant 0 : index
    %569 = vector.load %arg4[%c0_142, %c0_143] : memref<6x8xi32, #tpu.memory_space<vmem>>, vector<6x8xi32>
    %570 = vector.shape_cast %569 : vector<6x8xi32> to vector<6x8x1xi32>
    %571 = vector.broadcast %570 : vector<6x8x1xi32> to vector<6x8x128xi32>
    %572 = arith.cmpi eq, %553, %571 : vector<6x8x128xi32>
    %cst_144 = arith.constant 0.000000e+00 : f32
    %573 = vector.broadcast %cst_144 : f32 to vector<6x8x128xf32>
    %574 = arith.select %572, %568, %573 : vector<6x8x128xi1>, vector<6x8x128xf32>
    %c0_145 = arith.constant 0 : index
    %c0_146 = arith.constant 0 : index
    %575 = vector.load %arg5[%c0_145, %c0_146] : memref<6x8xf32, #tpu.memory_space<vmem>>, vector<6x8xf32>
    %576 = vector.shape_cast %575 : vector<6x8xf32> to vector<6x8x1xf32>
    %577 = vector.broadcast %576 : vector<6x8x1xf32> to vector<6x8x128xf32>
    %578 = arith.mulf %574, %577 : vector<6x8x128xf32>
    %cst_147 = arith.constant dense<0.000000e+00> : vector<8x128xf32>
    %579 = vector.multi_reduction <add>, %578, %cst_147 [0] : vector<6x8x128xf32> to vector<8x128xf32>
    %cst_148 = arith.constant dense<0.000000e+00> : vector<8xf32>
    %580 = vector.multi_reduction <add>, %579, %cst_148 [1] : vector<8x128xf32> to vector<8xf32>
    %581 = vector.shape_cast %580 : vector<8xf32> to vector<8x1xf32>
    %582 = vector.shape_cast %581 : vector<8x1xf32> to vector<8x1xf32>
    %583 = vector.broadcast %582 : vector<8x1xf32> to vector<8x128xf32>
    %c0_149 = arith.constant 0 : index
    %c0_150 = arith.constant 0 : index
    %584 = vector.load %arg16[%c0_149, %c0_150] : memref<8x128xf32, #tpu.memory_space<vmem>>, vector<8x128xf32>
    tpu.vector_store %arg16[%c0_149, %c0_150], %583 {strides = array<i32>} : memref<8x128xf32, #tpu.memory_space<vmem>>, vector<8x128xf32>,
    return
  }
}

</mosaic_0001>

<bundles_post_ra>
// kernel: nmt_forward_pallas.1
= control target key start
LH: loop header
LB: loop body
LE: loop exit
PB: predicated region body
PF: predicated region fallthrough
CT: control target
= control target key end

     0   :  { %v4922_v3 = vmov 0.0   ;;  %vm89_vm0 = vcmask 523264   ;;  %v79_v57 = vlaneseq  ;;  %vm1215_vm6 = vcmask 261120   ;;  %s6289_s6 = inlined_call_operand.vmem [shape: f32[64,256], index: 6, kind: input, shape index: {}]   ;;  %s6290_s8 = inlined_call_operand.vmem [shape: f32[64,256], index: 8, kind: input, shape index: {}]   ;;  %s6291_s0 = inlined_call_operand.vmem [shape: f32[8,8,64], index: 0, kind: input, shape index: {}]   ;;  %s6292_s7 = inlined_call_operand.vmem [shape: f32[1,256], index: 7, kind: input, shape index: {}]   ;;  %s6293_s1 = inlined_call_operand.vmem [shape: f32[8,8,64], index: 1, kind: input, shape index: {}]   ;;  %s6294_s9 = inlined_call_operand.vmem [shape: f32[64,64], index: 9, kind: input, shape index: {}]   ;;  %s6295_s10 = inlined_call_operand.vmem [shape: f32[64,64], index: 10, kind: input, shape index: {}]   ;;  %s6296_s11 = inlined_call_operand.vmem [shape: f32[32,128], index: 11, kind: input, shape index: {}]   ;;  %s6297_s3 = inlined_call_operand.vmem [shape: f32[6,8,32], index: 3, kind: input, shape index: {}]   ;;  %s6298_s13 = inlined_call_operand.vmem [shape: f32[64,128], index: 13, kind: input, shape index: {}]   ;;  %s6299_s12 = inlined_call_operand.vmem [shape: f32[1,128], index: 12, kind: input, shape index: {}]   ;;  %s6300_s14 = inlined_call_operand.vmem [shape: f32[32,32], index: 14, kind: input, shape index: {}]   ;;  %s6301_s2 = inlined_call_operand.vmem [shape: f32[8,8], index: 2, kind: input, shape index: {}]   ;;  %s6302_s15 = inlined_call_operand.vmem [shape: f32[32,128], index: 15, kind: input, shape index: {}]   ;;  %s6303_s4 = inlined_call_operand.vmem [shape: s32[6,8], index: 4, kind: input, shape index: {}]   ;;  %s6304_s5 = inlined_call_operand.vmem [shape: f32[6,8], index: 5, kind: input, shape index: {}]   ;;  %s6305_s16 = inlined_call_operand.vmem [shape: f32[8,128], index: 16, kind: output, shape index: {}]  }
   0x1   :  { %6307 = sst [smem:[#allocation2_spill]] %s6289_s6  ;;  %178 = vmatprep.mubr.f32.mxu0 %v4922_v3  ;;  %v228_v24 = vld [vmem:[%s6290_s8 + $0x8] sm:$0xff]  ;;  %v230_v25 = vld [vmem:[%s6290_s8 + $0x18] sm:$0xff]  ;;  %v227_v28 = vld [vmem:[%s6290_s8] sm:$0xff]  ;;  %vm4925_vm10 = vmmov 0   ;;  %vm1684_vm11 = vcmask 1041409  }
   0x2   :  { %s6308_s23 = sld [smem:[#allocation2_spill]]  ;;  %v5068_v27 = vpack.c.bf16 %v230_v25, %v228_v24  ;;  %v229_v29 = vld [vmem:[%s6290_s8 + $0x10] sm:$0xff]  ;;  %v232_v30 = vld [vmem:[%s6290_s8 + $0x28] sm:$0xff]  ;;  %v234_v31 = vld [vmem:[%s6290_s8 + $0x38] sm:$0xff]  ;;  %v5186_v58 = vshrl.u32 %v79_v57, 7  ;;  %vm1686_vm12 = vcmask 1042434  }
   0x3   :  { %v53_v32 = vld [vmem:[%s6291_s0] sm:$0xff]  ;;  %v5085_v33 = vpack.c.bf16 %v229_v29, %v227_v28  ;;  %v5088_v34 = vpack.c.bf16 %v234_v31, %v232_v30  ;;  %v233_v36 = vld [vmem:[%s6290_s8 + $0x30] sm:$0xff]  ;;  %v236_v37 = vld [vmem:[%s6290_s8 + $0x48] sm:$0xff]  ;;  %vm1688_vm13 = vcmask 1043459   ;;  %vm1690_vm14 = vcmask 1044484  }
   0x4   :  { %v231_v35 = vld [vmem:[%s6290_s8 + $0x20] sm:$0xff]  ;;  %v238_v38 = vld [vmem:[%s6290_s8 + $0x58] sm:$0xff]  ;;  %v54_v39 = vld [vmem:[%s6291_s0 + $0x8] sm:$0xff]  ;;  %v5189_v59 = vsub.s32 0, %v5186_v58  ;;  %v5198_v62 = vsub.s32 1, %v5186_v58  ;;  %vm1692_vm15 = vcmask 1045509  }
   0x5   :  { %v5108_v40 = vpack.c.bf16 %v233_v36, %v231_v35  ;;  %v5111_v41 = vpack.c.bf16 %v238_v38, %v236_v37  ;;  %v235_v42 = vld [vmem:[%s6290_s8 + $0x40] sm:$0xff]  ;;  %v237_v43 = vld [vmem:[%s6290_s8 + $0x50] sm:$0xff]  ;;  %v240_v44 = vld [vmem:[%s6290_s8 + $0x68] sm:$0xff] }
   0x6   :  { %v242_v45 = vld [vmem:[%s6290_s8 + $0x78] sm:$0xff]  ;;  %v55_v46 = vld [vmem:[%s6291_s0 + $0x10] sm:$0xff]  ;;  %v5131_v47 = vpack.c.bf16 %v237_v43, %v235_v42  ;;  %v239_v49 = vld [vmem:[%s6290_s8 + $0x60] sm:$0xff] }
   0x7   :  { %v5134_v48 = vpack.c.bf16 %v242_v45, %v240_v44  ;;  %v241_v50 = vld [vmem:[%s6290_s8 + $0x70] sm:$0xff]  ;;  %v56_v51 = vld [vmem:[%s6291_s0 + $0x18] sm:$0xff]  ;;  %v57_v53 = vld [vmem:[%s6291_s0 + $0x20] sm:$0xff] }
   0x8   :  { %v62_v0 = vld [vmem:[%s6308_s23 + $0x8] sm:$0xff]  ;;  %v64_v1 = vld [vmem:[%s6308_s23 + $0x18] sm:$0xff]  ;;  %v61_v2 = vld [vmem:[%s6308_s23] sm:$0xff]  ;;  %v5148_v52 = vpack.c.bf16 %v241_v50, %v239_v49 }
   0x9   :  { %v4424_v4 = vpack.c.bf16 %v64_v1, %v62_v0  ;;  %v63_v5 = vld [vmem:[%s6308_s23 + $0x10] sm:$0xff]  ;;  %v66_v6 = vld [vmem:[%s6308_s23 + $0x28] sm:$0xff]  ;;  %v68_v7 = vld [vmem:[%s6308_s23 + $0x38] sm:$0xff] }
   0xa   :  { %v4426_v8 = vpack.c.bf16 %v63_v5, %v61_v2  ;;  %v4428_v9 = vpack.c.bf16 %v68_v7, %v66_v6  ;;  %v65_v10 = vld [vmem:[%s6308_s23 + $0x20] sm:$0xff]  ;;  %v67_v11 = vld [vmem:[%s6308_s23 + $0x30] sm:$0xff]  ;;  %v70_v12 = vld [vmem:[%s6308_s23 + $0x48] sm:$0xff] }
   0xb   :  { %4425 = vmatprep.subr.bf16.mxu0 %v4424_v4  ;;  %v72_v13 = vld [vmem:[%s6308_s23 + $0x58] sm:$0xff]  ;;  %v4430_v14 = vpack.c.bf16 %v67_v11, %v65_v10  ;;  %v69_v16 = vld [vmem:[%s6308_s23 + $0x40] sm:$0xff]  ;;  %v71_v17 = vld [vmem:[%s6308_s23 + $0x50] sm:$0xff] }
   0xc   :  { %4427 = vmatpush1.bf16.msra.mxu0 %v4426_v8  ;;  %v4432_v15 = vpack.c.bf16 %v72_v13, %v70_v12  ;;  %v74_v18 = vld [vmem:[%s6308_s23 + $0x68] sm:$0xff]  ;;  %v76_v19 = vld [vmem:[%s6308_s23 + $0x78] sm:$0xff]  ;;  %v4434_v20 = vpack.c.bf16 %v71_v17, %v69_v16  ;;  %v73_v22 = vld [vmem:[%s6308_s23 + $0x60] sm:$0xff] }
   0xd   :  { %4429 = vmatprep.subr.bf16.mxu0 %v4428_v9  ;;  %v4436_v21 = vpack.c.bf16 %v76_v19, %v74_v18  ;;  %v75_v23 = vld [vmem:[%s6308_s23 + $0x70] sm:$0xff]  ;;  %v58_v54 = vld [vmem:[%s6291_s0 + $0x28] sm:$0xff]  ;;  %v60_v56 = vld [vmem:[%s6291_s0 + $0x38] sm:$0xff] }
   0xe   :  { %v4438_v26 = vpack.c.bf16 %v75_v23, %v73_v22  ;;  %v59_v55 = vld [vmem:[%s6291_s0 + $0x30] sm:$0xff]  ;;  %v77_v60 = vld [vmem:[%s6292_s7] sm:$0x3]  ;;  %s4923_s7 = smov 64  }
   0xf   :  { %v5195_v61 = vrot.slane %v77_v60, %v5189_v59  ;;  %v5202_v1 = vrot.slane %v77_v60, %v5198_v62 }
  0x10   :  { %4431 = vmatpush1.bf16.msra.mxu0 %v4430_v14 }
  0x11   :  { %4433 = vmatprep.subr.bf16.mxu0 %v4432_v15 }
  0x14   :  { %4435 = vmatpush1.bf16.msra.mxu0 %v4434_v20  ;;  %v243_v20 = vld [vmem:[%s6293_s1] sm:$0xff] }
  0x15   :  { %4437 = vmatprep.subr.bf16.mxu0 %v4436_v21  ;;  %vm251_vm1 = vcmp.gt.f32.partialorder %v243_v20, 0.5 }
  0x18   :  { %4439 = vmatpush1.bf16.msra.mxu0 %v4438_v26 }
  0x19   :  { %4441 = vmatprep.subr.bf16.mxu0 %v5068_v27 }
  0x1b   :  { %3983 = vmatmul.mubr.msk.f32.vlgmr.msra.gmra.mrb[0].mxu0 %vm89_vm0, %v53_v32 }
  0x1c   :  { %4443 = vmatpush1.bf16.msra.mxu0 %v5085_v33  ;;  %184 = vmatprep.mubr.f32.mxu0 %v4922_v3 }
  0x1d   :  { %4445 = vmatprep.subr.bf16.mxu0 %v5088_v34 }
  0x1f   :  { %3984 = vmatmul.mubr.msk.f32.gmra.mrb[2].mxu0 %vm89_vm0, %v54_v39 }
  0x20   :  { %190 = vmatprep.mubr.f32.mxu0 %v4922_v3  ;;  %4447 = vmatpush1.bf16.msra.mxu0 %v5108_v40 }
  0x21   :  { %4449 = vmatprep.subr.bf16.mxu0 %v5111_v41 }
  0x23   :  { %3985 = vmatmul.mubr.msk.f32.gmra.mrb[4].mxu0 %vm89_vm0, %v55_v46 }
  0x24   :  { %196 = vmatprep.mubr.f32.mxu0 %v4922_v3  ;;  %4451 = vmatpush1.bf16.msra.mxu0 %v5131_v47 }
  0x25   :  { %4453 = vmatprep.subr.bf16.mxu0 %v5134_v48 }
  0x27   :  { %3986 = vmatmul.mubr.msk.f32.gmra.mrb[6].mxu0 %vm89_vm0, %v56_v51 }
  0x28   :  { %202 = vmatprep.mubr.f32.mxu0 %v4922_v3  ;;  %4455 = vmatpush1.bf16.msra.mxu0 %v5148_v52 }
  0x29   :  { %4457 = vmatprep.subr.bf16.mxu0 %v5068_v27 }
  0x2b   :  { %3987 = vmatmul.mubr.msk.f32.gmra.mrb[8].mxu0 %vm89_vm0, %v57_v53  ;;  %v5233_v53 = vld [vmem:[%s6293_s1 + $0x8] sm:$0xff] }
  0x2c   :  { %208 = vmatprep.mubr.f32.mxu0 %v4922_v3  ;;  %vm252_vm2 = vcmp.gt.f32.partialorder %v5233_v53, 0.5 }
  0x2f   :  { %3988 = vmatmul.mubr.msk.f32.gmra.mrb[10].mxu0 %vm89_vm0, %v58_v54 }
  0x30   :  { %214 = vmatprep.mubr.f32.mxu0 %v4922_v3 }
  0x33   :  { %3989 = vmatmul.mubr.msk.f32.gmra.mrb[12].mxu0 %vm89_vm0, %v59_v55 }
  0x34   :  { %220 = vmatprep.mubr.f32.mxu0 %v4922_v3 }
  0x37   :  { %3990 = vmatmul.mubr.msk.f32.gmra.mrb[14].mxu0 %vm89_vm0, %v60_v56 }
  0x38   :  { %326 = vmatprep.mubr.f32.mxu0 %v4922_v3 }
  0x3b   :  { %327 = vmatmul.mubr.f32.vlgmr.msra.gmra.mrb[0].mxu0 %v4922_v3 }
  0x3c   :  { %4459 = vmatpush1.bf16.msra.mxu0 %v5085_v33  ;;  %430 = vmatprep.mubr.f32.mxu0 %v4922_v3 }
  0x3d   :  { %4461 = vmatprep.subr.bf16.mxu0 %v5088_v34 }
  0x40   :  { %4463 = vmatpush1.bf16.msra.mxu0 %v5108_v40 }
  0x41   :  { %4465 = vmatprep.subr.bf16.mxu0 %v5111_v41 }
  0x44   :  { %4467 = vmatpush1.bf16.msra.mxu0 %v5131_v47 }
  0x45   :  { %4469 = vmatprep.subr.bf16.mxu0 %v5134_v48 }
  0x48   :  { %4471 = vmatpush1.bf16.msra.mxu0 %v5148_v52 }
  0x49   :  { %4473 = vmatprep.subr.bf16.mxu0 %v5068_v27 }
 0x10e   :  { %v328_v63 = vpop.f32.mrb[0].mxu0 }
 0x10f   :  { %v4724_v0 = vadd.f32 %v328_v63, %v5195_v61  ;;  %v330_v2 = vpop.f32.mrb[1].mxu0 }
 0x110   :  { %v4725_v5 = vadd.f32 %v330_v2, %v5202_v1 }
 0x111   :  { %v335_v4 = vmul.f32 0.5, %v4724_v0 }
 0x112   :  { %v336_v11 = vmul.f32 0.5, %v4725_v5 }
 0x113   :  { %4762 = vtanh.f32 %v335_v4 }
 0x114   :  { %4764 = vtanh.f32 %v4725_v5 }
 0x115   :  { %4766 = vtanh.f32 %v336_v11 }
 0x11d   :  { %v4763_v6 = vpop.eup %4762 }
 0x11e   :  { %v339_v7 = vadd.f32 1.0, %v4763_v6  ;;  %v4765_v9 = vpop.eup %4764 }
 0x11f   :  { %v4767_v15 = vpop.eup %4766 }
 0x120   :  { %v341_v8 = vmul.f32 0.5, %v339_v7  ;;  %v340_v16 = vadd.f32 1.0, %v4767_v15 }
 0x122   :  { %v345_v10 = vmul.f32 %v4765_v9, %v341_v8  ;;  %v344_v12 = vmul.f32 0.0, %v341_v8  ;;  %v342_v17 = vmul.f32 0.5, %v340_v16 }
 0x124   :  { %347 = vrot.lane.b32.xlu0 %v345_v10, %s4923_s7 }
 0x196   :  { %v348_v13 = vpop.permute.xlu0 %347 }
 0x197   :  { %v350_v14 = vadd.f32 %v348_v13, %v344_v12 }
 0x199   :  { %359 = vrot.lane.b32.xlu1 %v350_v14, %s4923_s7  ;;  %4768 = vtanh.f32 %v350_v14 }
 0x1a3   :  { %v4769_v18 = vpop.eup %4768 }
 0x1a4   :  { %v352_v19 = vmul.f32 %v4769_v18, %v342_v17 }
 0x1a6   :  { %354 = vrot.lane.b32.xlu0 %v352_v19, %s4923_s7 }
 0x20b   :  { %v360_v21 = vpop.permute.xlu1 %359 }
 0x20c   :  { %v362_v22 = vsel %vm251_vm1, %v360_v21, 0.0  ;;  %v5263_v21 = vld [vmem:[%s6293_s1 + $0x10] sm:$0xff] }
 0x20d   :  { %449 = vrot.lane.b32.xlu1 %v362_v22, %s4923_s7  ;;  %vm253_vm3 = vcmp.gt.f32.partialorder %v5263_v21, 0.5 }
 0x218   :  { %v355_v23 = vpop.permute.xlu0 %354 }
 0x219   :  { %v5212_v24 = vsel %vm251_vm1, %v355_v23, 0.0  ;;  %vm1694_vm1 = vcmask 1046534  }
 0x21a   :  { %3991 = vmatmul.mubr.msk.f32.vlgmr.msra.gmra.mrb[2].mxu0 %vm89_vm0, %v5212_v24 }
 0x21b   :  { %4475 = vmatpush1.bf16.msra.mxu0 %v5085_v33  ;;  %539 = vmatprep.mubr.f32.mxu0 %v4922_v3 }
 0x21c   :  { %4477 = vmatprep.subr.bf16.mxu0 %v5088_v34 }
 0x21f   :  { %4479 = vmatpush1.bf16.msra.mxu0 %v5108_v40 }
 0x220   :  { %4481 = vmatprep.subr.bf16.mxu0 %v5111_v41 }
 0x223   :  { %4483 = vmatpush1.bf16.msra.mxu0 %v5131_v47 }
 0x224   :  { %4485 = vmatprep.subr.bf16.mxu0 %v5134_v48 }
 0x227   :  { %4487 = vmatpush1.bf16.msra.mxu0 %v5148_v52 }
 0x228   :  { %4489 = vmatprep.subr.bf16.mxu0 %v5068_v27 }
 0x27f   :  { %v450_v39 = vpop.permute.xlu1 %449 }
 0x2ed   :  { %v432_v25 = vpop.f32.mrb[2].mxu0 }
 0x2ee   :  { %v4726_v26 = vadd.f32 %v432_v25, %v5195_v61  ;;  %v434_v28 = vpop.f32.mrb[3].mxu0 }
 0x2ef   :  { %v4727_v30 = vadd.f32 %v434_v28, %v5202_v1 }
 0x2f0   :  { %v439_v29 = vmul.f32 0.5, %v4726_v26 }
 0x2f1   :  { %v440_v38 = vmul.f32 0.5, %v4727_v30 }
 0x2f2   :  { %4770 = vtanh.f32 %v439_v29 }
 0x2f3   :  { %4772 = vtanh.f32 %v4727_v30 }
 0x2f4   :  { %4774 = vtanh.f32 %v440_v38 }
 0x2fc   :  { %v4771_v31 = vpop.eup %4770 }
 0x2fd   :  { %v443_v32 = vadd.f32 1.0, %v4771_v31  ;;  %v4773_v36 = vpop.eup %4772 }
 0x2fe   :  { %v4775_v45 = vpop.eup %4774 }
 0x2ff   :  { %v445_v35 = vmul.f32 0.5, %v443_v32  ;;  %v444_v46 = vadd.f32 1.0, %v4775_v45 }
 0x301   :  { %v453_v37 = vmul.f32 %v4773_v36, %v445_v35  ;;  %v452_v42 = vmul.f32 %v450_v39, %v445_v35  ;;  %v446_v49 = vmul.f32 0.5, %v444_v46 }
 0x303   :  { %455 = vrot.lane.b32.xlu0 %v453_v37, %s4923_s7 }
 0x375   :  { %v456_v43 = vpop.permute.xlu0 %455 }
 0x376   :  { %v458_v44 = vadd.f32 %v456_v43, %v452_v42 }
 0x378   :  { %4776 = vtanh.f32 %v458_v44  ;;  %468 = vrot.lane.b32.xlu0 %v458_v44, %s4923_s7 }
 0x382   :  { %v4777_v50 = vpop.eup %4776 }
 0x383   :  { %v460_v51 = vmul.f32 %v4777_v50, %v446_v49 }
 0x385   :  { %462 = vrot.lane.b32.xlu1 %v460_v51, %s4923_s7 }
 0x3ea   :  { %v469_v54 = vpop.permute.xlu0 %468 }
 0x3eb   :  { %v471_v55 = vsel %vm252_vm2, %v469_v54, %v362_v22 }
 0x3ec   :  { %558 = vrot.lane.b32.xlu1 %v471_v55, %s4923_s7 }
 0x3f7   :  { %v5239_v56 = vpop.permute.xlu1 %462 }
 0x3f8   :  { %v466_v60 = vsel %vm252_vm2, %v5239_v56, %v5212_v24 }
 0x3f9   :  { %3992 = vmatmul.mubr.msk.f32.vlgmr.msra.gmra.mrb[4].mxu0 %vm89_vm0, %v466_v60 }
 0x3fa   :  { %4491 = vmatpush1.bf16.msra.mxu0 %v5085_v33  ;;  %648 = vmatprep.mubr.f32.mxu0 %v4922_v3 }
 0x3fb   :  { %4493 = vmatprep.subr.bf16.mxu0 %v5088_v34 }
 0x3fe   :  { %4495 = vmatpush1.bf16.msra.mxu0 %v5108_v40 }
 0x3ff   :  { %4497 = vmatprep.subr.bf16.mxu0 %v5111_v41 }
 0x402   :  { %4499 = vmatpush1.bf16.msra.mxu0 %v5131_v47 }
 0x403   :  { %4501 = vmatprep.subr.bf16.mxu0 %v5134_v48 }
 0x406   :  { %4503 = vmatpush1.bf16.msra.mxu0 %v5148_v52 }
 0x407   :  { %4505 = vmatprep.subr.bf16.mxu0 %v5068_v27 }
 0x45e   :  { %v559_v12 = vpop.permute.xlu1 %558 }
 0x4cc   :  { %v541_v63 = vpop.f32.mrb[4].mxu0 }
 0x4cd   :  { %v4728_v0 = vadd.f32 %v541_v63, %v5195_v61  ;;  %v543_v2 = vpop.f32.mrb[5].mxu0 }
 0x4ce   :  { %v4729_v5 = vadd.f32 %v543_v2, %v5202_v1 }
 0x4cf   :  { %v548_v4 = vmul.f32 0.5, %v4728_v0 }
 0x4d0   :  { %v549_v11 = vmul.f32 0.5, %v4729_v5 }
 0x4d1   :  { %4778 = vtanh.f32 %v548_v4 }
 0x4d2   :  { %4780 = vtanh.f32 %v4729_v5 }
 0x4d3   :  { %4782 = vtanh.f32 %v549_v11 }
 0x4db   :  { %v4779_v6 = vpop.eup %4778 }
 0x4dc   :  { %v552_v7 = vadd.f32 1.0, %v4779_v6  ;;  %v4781_v9 = vpop.eup %4780 }
 0x4dd   :  { %v4783_v16 = vpop.eup %4782 }
 0x4de   :  { %v554_v8 = vmul.f32 0.5, %v552_v7  ;;  %v553_v17 = vadd.f32 1.0, %v4783_v16 }
 0x4e0   :  { %v562_v10 = vmul.f32 %v4781_v9, %v554_v8  ;;  %v561_v13 = vmul.f32 %v559_v12, %v554_v8  ;;  %v555_v18 = vmul.f32 0.5, %v553_v17 }
 0x4e2   :  { %564 = vrot.lane.b32.xlu0 %v562_v10, %s4923_s7 }
 0x554   :  { %v565_v14 = vpop.permute.xlu0 %564 }
 0x555   :  { %v567_v15 = vadd.f32 %v565_v14, %v561_v13 }
 0x557   :  { %4784 = vtanh.f32 %v567_v15  ;;  %577 = vrot.lane.b32.xlu0 %v567_v15, %s4923_s7 }
 0x561   :  { %v4785_v19 = vpop.eup %4784 }
 0x562   :  { %v569_v20 = vmul.f32 %v4785_v19, %v555_v18 }
 0x564   :  { %571 = vrot.lane.b32.xlu1 %v569_v20, %s4923_s7 }
 0x5c9   :  { %v578_v22 = vpop.permute.xlu0 %577 }
 0x5ca   :  { %v580_v23 = vsel %vm253_vm3, %v578_v22, %v471_v55 }
 0x5cb   :  { %667 = vrot.lane.b32.xlu1 %v580_v23, %s4923_s7 }
 0x5d6   :  { %v5269_v25 = vpop.permute.xlu1 %571 }
 0x5d7   :  { %v575_v26 = vsel %vm253_vm3, %v5269_v25, %v466_v60  ;;  %v246_v60 = vld [vmem:[%s6293_s1 + $0x18] sm:$0xff] }
 0x5d8   :  { %3993 = vmatmul.mubr.msk.f32.vlgmr.msra.gmra.mrb[6].mxu0 %vm89_vm0, %v575_v26  ;;  %vm254_vm4 = vcmp.gt.f32.partialorder %v246_v60, 0.5 }
 0x5d9   :  { %4507 = vmatpush1.bf16.msra.mxu0 %v5085_v33  ;;  %757 = vmatprep.mubr.f32.mxu0 %v4922_v3 }
 0x5da   :  { %4509 = vmatprep.subr.bf16.mxu0 %v5088_v34 }
 0x5dd   :  { %4511 = vmatpush1.bf16.msra.mxu0 %v5108_v40 }
 0x5de   :  { %4513 = vmatprep.subr.bf16.mxu0 %v5111_v41 }
 0x5e1   :  { %4515 = vmatpush1.bf16.msra.mxu0 %v5131_v47 }
 0x5e2   :  { %4517 = vmatprep.subr.bf16.mxu0 %v5134_v48 }
 0x5e5   :  { %4519 = vmatpush1.bf16.msra.mxu0 %v5148_v52 }
 0x5e6   :  { %4521 = vmatprep.subr.bf16.mxu0 %v5068_v27 }
 0x63d   :  { %v668_v43 = vpop.permute.xlu1 %667 }
 0x6ab   :  { %v650_v28 = vpop.f32.mrb[6].mxu0 }
 0x6ac   :  { %v4730_v29 = vadd.f32 %v650_v28, %v5195_v61  ;;  %v652_v30 = vpop.f32.mrb[7].mxu0 }
 0x6ad   :  { %v4731_v32 = vadd.f32 %v652_v30, %v5202_v1 }
 0x6ae   :  { %v657_v31 = vmul.f32 0.5, %v4730_v29  ;;  %v247_v29 = vld [vmem:[%s6293_s1 + $0x20] sm:$0xff] }
 0x6af   :  { %v658_v42 = vmul.f32 0.5, %v4731_v32  ;;  %vm255_vm5 = vcmp.gt.f32.partialorder %v247_v29, 0.5 }
 0x6b0   :  { %4786 = vtanh.f32 %v657_v31 }
 0x6b1   :  { %4788 = vtanh.f32 %v4731_v32 }
 0x6b2   :  { %4790 = vtanh.f32 %v658_v42 }
 0x6ba   :  { %v4787_v35 = vpop.eup %4786 }
 0x6bb   :  { %v661_v36 = vadd.f32 1.0, %v4787_v35  ;;  %v4789_v38 = vpop.eup %4788 }
 0x6bc   :  { %v4791_v49 = vpop.eup %4790 }
 0x6bd   :  { %v663_v37 = vmul.f32 0.5, %v661_v36  ;;  %v662_v50 = vadd.f32 1.0, %v4791_v49 }
 0x6bf   :  { %v671_v39 = vmul.f32 %v4789_v38, %v663_v37  ;;  %v670_v44 = vmul.f32 %v668_v43, %v663_v37  ;;  %v664_v51 = vmul.f32 0.5, %v662_v50 }
 0x6c1   :  { %673 = vrot.lane.b32.xlu0 %v671_v39, %s4923_s7 }
 0x733   :  { %v674_v45 = vpop.permute.xlu0 %673 }
 0x734   :  { %v676_v46 = vadd.f32 %v674_v45, %v670_v44 }
 0x736   :  { %4792 = vtanh.f32 %v676_v46  ;;  %686 = vrot.lane.b32.xlu0 %v676_v46, %s4923_s7 }
 0x740   :  { %v4793_v54 = vpop.eup %4792 }
 0x741   :  { %v678_v55 = vmul.f32 %v4793_v54, %v664_v51 }
 0x743   :  { %680 = vrot.lane.b32.xlu1 %v678_v55, %s4923_s7 }
 0x7a8   :  { %v687_v63 = vpop.permute.xlu0 %686 }
 0x7a9   :  { %v689_v0 = vsel %vm254_vm4, %v687_v63, %v580_v23 }
 0x7aa   :  { %776 = vrot.lane.b32.xlu1 %v689_v0, %s4923_s7 }
 0x7b5   :  { %v681_v2 = vpop.permute.xlu1 %680 }
 0x7b6   :  { %v684_v4 = vsel %vm254_vm4, %v681_v2, %v575_v26  ;;  %v683_v35 = vsel %vm254_vm4, %v681_v2, 0.0  ;;  %vm1700_vm4 = vcmask 64512  }
 0x7b7   :  { %3994 = vmatmul.mubr.msk.f32.vlgmr.msra.gmra.mrb[8].mxu0 %vm89_vm0, %v684_v4 }
 0x7b8   :  { %4523 = vmatpush1.bf16.msra.mxu0 %v5085_v33  ;;  %866 = vmatprep.mubr.f32.mxu0 %v4922_v3 }
 0x7b9   :  { %4525 = vmatprep.subr.bf16.mxu0 %v5088_v34 }
 0x7bc   :  { %4527 = vmatpush1.bf16.msra.mxu0 %v5108_v40 }
 0x7bd   :  { %4529 = vmatprep.subr.bf16.mxu0 %v5111_v41 }
 0x7c0   :  { %4531 = vmatpush1.bf16.msra.mxu0 %v5131_v47 }
 0x7c1   :  { %4533 = vmatprep.subr.bf16.mxu0 %v5134_v48 }
 0x7c4   :  { %4535 = vmatpush1.bf16.msra.mxu0 %v5148_v52 }
 0x7c5   :  { %4537 = vmatprep.subr.bf16.mxu0 %v5068_v27 }
 0x81c   :  { %v777_v16 = vpop.permute.xlu1 %776 }
 0x88a   :  { %v759_v5 = vpop.f32.mrb[8].mxu0 }
 0x88b   :  { %v4732_v6 = vadd.f32 %v759_v5, %v5195_v61  ;;  %v761_v7 = vpop.f32.mrb[9].mxu0 }
 0x88c   :  { %v4733_v9 = vadd.f32 %v761_v7, %v5202_v1 }
 0x88d   :  { %v766_v8 = vmul.f32 0.5, %v4732_v6 }
 0x88e   :  { %v767_v15 = vmul.f32 0.5, %v4733_v9 }
 0x88f   :  { %4794 = vtanh.f32 %v766_v8 }
 0x890   :  { %4796 = vtanh.f32 %v4733_v9  ;;  %v248_v9 = vld [vmem:[%s6293_s1 + $0x28] sm:$0xff] }
 0x891   :  { %4798 = vtanh.f32 %v767_v15  ;;  %vm256_vm7 = vcmp.gt.f32.partialorder %v248_v9, 0.5 }
 0x899   :  { %v4795_v10 = vpop.eup %4794 }
 0x89a   :  { %v770_v11 = vadd.f32 1.0, %v4795_v10  ;;  %v4797_v13 = vpop.eup %4796 }
 0x89b   :  { %v4799_v20 = vpop.eup %4798 }
 0x89c   :  { %v772_v12 = vmul.f32 0.5, %v770_v11  ;;  %v771_v22 = vadd.f32 1.0, %v4799_v20 }
 0x89e   :  { %v780_v14 = vmul.f32 %v4797_v13, %v772_v12  ;;  %v779_v17 = vmul.f32 %v777_v16, %v772_v12  ;;  %v773_v23 = vmul.f32 0.5, %v771_v22  ;;  %v574_v13 = vsel %vm253_vm3, %v5269_v25, 0.0 }
 0x8a0   :  { %782 = vrot.lane.b32.xlu0 %v780_v14, %s4923_s7 }
 0x912   :  { %v783_v18 = vpop.permute.xlu0 %782 }
 0x913   :  { %v785_v19 = vadd.f32 %v783_v18, %v779_v17 }
 0x915   :  { %4800 = vtanh.f32 %v785_v19  ;;  %795 = vrot.lane.b32.xlu0 %v785_v19, %s4923_s7 }
 0x91f   :  { %v4801_v26 = vpop.eup %4800 }
 0x920   :  { %v787_v28 = vmul.f32 %v4801_v26, %v773_v23 }
 0x922   :  { %789 = vrot.lane.b32.xlu1 %v787_v28, %s4923_s7 }
 0x987   :  { %v796_v30 = vpop.permute.xlu0 %795 }
 0x988   :  { %v798_v31 = vsel %vm255_vm5, %v796_v30, %v689_v0 }
 0x989   :  { %885 = vrot.lane.b32.xlu1 %v798_v31, %s4923_s7 }
 0x994   :  { %v790_v32 = vpop.permute.xlu1 %789 }
 0x995   :  { %v792_v36 = vsel %vm255_vm5, %v790_v32, 0.0  ;;  %v793_v37 = vsel %vm255_vm5, %v790_v32, %v684_v4  ;;  %vm1784_vm5 = vcmask 523520  }
 0x996   :  { %3995 = vmatmul.mubr.msk.f32.vlgmr.msra.gmra.mrb[10].mxu0 %vm89_vm0, %v793_v37  ;;  %v5317_v38 = vsel %vm1215_vm6, %v683_v35, %v792_v36  ;;  %v5320_v39 = vsel %vm1215_vm6, %v792_v36, %v683_v35  ;;  %v249_v35 = vld [vmem:[%s6293_s1 + $0x30] sm:$0xff] }
 0x997   :  { %4539 = vmatpush1.bf16.msra.mxu0 %v5085_v33  ;;  %975 = vmatprep.mubr.f32.mxu0 %v4922_v3  ;;  %vm257_vm8 = vcmp.gt.f32.partialorder %v249_v35, 0.5  ;;  %v1228_v35 = vld [vmem:[%s6295_s10 + $0x20] sm:$0xff] }
 0x998   :  { %4541 = vmatprep.subr.bf16.mxu0 %v5088_v34 }
 0x99b   :  { %4543 = vmatpush1.bf16.msra.mxu0 %v5108_v40 }
 0x99c   :  { %4545 = vmatprep.subr.bf16.mxu0 %v5111_v41 }
 0x99f   :  { %4547 = vmatpush1.bf16.msra.mxu0 %v5131_v47 }
 0x9a0   :  { %4549 = vmatprep.subr.bf16.mxu0 %v5134_v48 }
 0x9a3   :  { %4551 = vmatpush1.bf16.msra.mxu0 %v5148_v52 }
 0x9a4   :  { %4553 = vmatprep.subr.bf16.mxu0 %v5068_v27 }
 0x9fb   :  { %v886_v63 = vpop.permute.xlu1 %885 }
 0xa69   :  { %v868_v42 = vpop.f32.mrb[10].mxu0 }
 0xa6a   :  { %v4734_v43 = vadd.f32 %v868_v42, %v5195_v61  ;;  %v870_v44 = vpop.f32.mrb[11].mxu0 }
 0xa6b   :  { %v4735_v46 = vadd.f32 %v870_v44, %v5202_v1 }
 0xa6c   :  { %v875_v45 = vmul.f32 0.5, %v4734_v43  ;;  %v465_v43 = vsel %vm252_vm2, %v5239_v56, 0.0  ;;  %vm1696_vm2 = vcmask 1047559  }
 0xa6d   :  { %v876_v60 = vmul.f32 0.5, %v4735_v46 }
 0xa6e   :  { %4802 = vtanh.f32 %v875_v45 }
 0xa6f   :  { %4804 = vtanh.f32 %v4735_v46 }
 0xa70   :  { %4806 = vtanh.f32 %v876_v60 }
 0xa78   :  { %v4803_v49 = vpop.eup %4802 }
 0xa79   :  { %v879_v50 = vadd.f32 1.0, %v4803_v49  ;;  %v4805_v54 = vpop.eup %4804 }
 0xa7a   :  { %v4807_v4 = vpop.eup %4806 }
 0xa7b   :  { %v881_v51 = vmul.f32 0.5, %v879_v50  ;;  %v880_v5 = vadd.f32 1.0, %v4807_v4 }
 0xa7d   :  { %v889_v55 = vmul.f32 %v4805_v54, %v881_v51  ;;  %v888_v27 = vmul.f32 %v886_v63, %v881_v51  ;;  %v882_v6 = vmul.f32 0.5, %v880_v5  ;;  %v1129_v5 = vld [vmem:[%s6294_s9 + $0x18] sm:$0xff] }
 0xa7f   :  { %891 = vrot.lane.b32.xlu0 %v889_v55, %s4923_s7 }
 0xaf1   :  { %v892_v0 = vpop.permute.xlu0 %891 }
 0xaf2   :  { %v894_v2 = vadd.f32 %v892_v0, %v888_v27 }
 0xaf4   :  { %4808 = vtanh.f32 %v894_v2  ;;  %904 = vrot.lane.b32.xlu0 %v894_v2, %s4923_s7  ;;  %v1126_v2 = vld [vmem:[%s6294_s9] sm:$0xff] }
 0xafe   :  { %v4809_v7 = vpop.eup %4808 }
 0xaff   :  { %v896_v8 = vmul.f32 %v4809_v7, %v882_v6  ;;  %v1130_v7 = vld [vmem:[%s6294_s9 + $0x20] sm:$0xff] }
 0xb01   :  { %898 = vrot.lane.b32.xlu1 %v896_v8, %s4923_s7  ;;  %v1131_v8 = vld [vmem:[%s6294_s9 + $0x28] sm:$0xff] }
 0xb66   :  { %v905_v10 = vpop.permute.xlu0 %904 }
 0xb67   :  { %v907_v11 = vsel %vm256_vm7, %v905_v10, %v798_v31  ;;  %v4576_v10 = vpack.c.bf16 %v1131_v8, %v1130_v7  ;;  %v1500_v7 = vld [vmem:[%s6298_s13 + $0x38] sm:$0xff] }
 0xb68   :  { %994 = vrot.lane.b32.xlu1 %v907_v11, %s4923_s7 }
 0xb73   :  { %v899_v12 = vpop.permute.xlu1 %898 }
 0xb74   :  { %v901_v14 = vsel %vm256_vm7, %v899_v12, 0.0  ;;  %v902_v15 = vsel %vm256_vm7, %v899_v12, %v793_v37  ;;  %v1133_v12 = vld [vmem:[%s6294_s9 + $0x38] sm:$0xff] }
 0xb75   :  { %3996 = vmatmul.mubr.msk.f32.vlgmr.msra.gmra.mrb[12].mxu0 %vm89_vm0, %v902_v15  ;;  %v5345_v16 = vsel %vm1215_vm6, %v574_v13, %v901_v14  ;;  %v5348_v17 = vsel %vm1215_vm6, %v901_v14, %v574_v13 }
 0xb76   :  { %4555 = vmatpush1.bf16.msra.mxu0 %v5085_v33  ;;  %1084 = vmatprep.mubr.f32.mxu0 %v4922_v3 }
 0xb77   :  { %4557 = vmatprep.subr.bf16.mxu0 %v5088_v34 }
 0xb7a   :  { %4559 = vmatpush1.bf16.msra.mxu0 %v5108_v40 }
 0xb7b   :  { %4561 = vmatprep.subr.bf16.mxu0 %v5111_v41 }
 0xb7e   :  { %4563 = vmatpush1.bf16.msra.mxu0 %v5131_v47 }
 0xb7f   :  { %4565 = vmatprep.subr.bf16.mxu0 %v5134_v48 }
 0xb82   :  { %4567 = vmatpush1.bf16.msra.mxu0 %v5148_v52 }
 0xbda   :  { %v995_v48 = vpop.permute.xlu1 %994 }
 0xc48   :  { %v977_v21 = vpop.f32.mrb[12].mxu0 }
 0xc49   :  { %v4736_v25 = vadd.f32 %v977_v21, %v5195_v61  ;;  %v979_v18 = vpop.f32.mrb[13].mxu0 }
 0xc4a   :  { %v4737_v33 = vadd.f32 %v979_v18, %v5202_v1  ;;  %v1224_v18 = vld [vmem:[%s6295_s10] sm:$0xff] }
 0xc4b   :  { %v984_v19 = vmul.f32 0.5, %v4736_v25 }
 0xc4c   :  { %v985_v47 = vmul.f32 0.5, %v4737_v33 }
 0xc4d   :  { %4810 = vtanh.f32 %v984_v19  ;;  %v1225_v19 = vld [vmem:[%s6295_s10 + $0x8] sm:$0xff] }
 0xc4e   :  { %4812 = vtanh.f32 %v4737_v33  ;;  %v4584_v33 = vpack.c.bf16 %v1225_v19, %v1224_v18 }
 0xc4f   :  { %4814 = vtanh.f32 %v985_v47  ;;  %v250_v47 = vld [vmem:[%s6293_s1 + $0x38] sm:$0xff] }
 0xc50   :  { %vm258_vm9 = vcmp.gt.f32.partialorder %v250_v47, 0.5 }
 0xc57   :  { %v4811_v34 = vpop.eup %4810 }
 0xc58   :  { %v988_v20 = vadd.f32 1.0, %v4811_v34  ;;  %v4813_v22 = vpop.eup %4812 }
 0xc59   :  { %v4815_v28 = vpop.eup %4814 }
 0xc5a   :  { %v990_v40 = vmul.f32 0.5, %v988_v20  ;;  %v989_v29 = vadd.f32 1.0, %v4815_v28 }
 0xc5c   :  { %v998_v41 = vmul.f32 %v4813_v22, %v990_v40  ;;  %v997_v52 = vmul.f32 %v995_v48, %v990_v40  ;;  %v991_v30 = vmul.f32 0.5, %v989_v29  ;;  %v1226_v48 = vld [vmem:[%s6295_s10 + $0x10] sm:$0xff] }
 0xc5e   :  { %1000 = vrot.lane.b32.xlu0 %v998_v41, %s4923_s7 }
 0xcd0   :  { %v1001_v23 = vpop.permute.xlu0 %1000 }
 0xcd1   :  { %v1003_v26 = vadd.f32 %v1001_v23, %v997_v52  ;;  %v1227_v52 = vld [vmem:[%s6295_s10 + $0x18] sm:$0xff] }
 0xcd3   :  { %4816 = vtanh.f32 %v1003_v26  ;;  %1013 = vrot.lane.b32.xlu0 %v1003_v26, %s4923_s7 }
 0xcdd   :  { %v4817_v31 = vpop.eup %4816 }
 0xcde   :  { %v1005_v32 = vmul.f32 %v4817_v31, %v991_v30  ;;  %v4588_v30 = vpack.c.bf16 %v1227_v52, %v1226_v48 }
 0xce0   :  { %1007 = vrot.lane.b32.xlu1 %v1005_v32, %s4923_s7 }
 0xd45   :  { %v1014_v36 = vpop.permute.xlu0 %1013 }
 0xd46   :  { %v5366_v37 = vsel %vm257_vm8, %v1014_v36, %v907_v11  ;;  %v1132_v11 = vld [vmem:[%s6294_s9 + $0x30] sm:$0xff]  ;;  %v1229_v36 = vld [vmem:[%s6295_s10 + $0x28] sm:$0xff] }
 0xd47   :  { %1103 = vrot.lane.b32.xlu1 %v5366_v37, %s4923_s7  ;;  %v4580_v13 = vpack.c.bf16 %v1133_v12, %v1132_v11 }
 0xd52   :  { %v1008_v42 = vpop.permute.xlu1 %1007 }
 0xd53   :  { %v1010_v44 = vsel %vm257_vm8, %v1008_v42, 0.0  ;;  %v5373_v45 = vsel %vm257_vm8, %v1008_v42, %v902_v15  ;;  %v1230_v42 = vld [vmem:[%s6295_s10 + $0x30] sm:$0xff] }
 0xd54   :  { %3997 = vmatmul.mubr.msk.f32.vlgmr.msra.gmra.mrb[14].mxu0 %vm89_vm0, %v5373_v45  ;;  %v5378_v46 = vsel %vm1215_vm6, %v465_v43, %v1010_v44  ;;  %v5381_v49 = vsel %vm1215_vm6, %v1010_v44, %v465_v43  ;;  %v1231_v43 = vld [vmem:[%s6295_s10 + $0x38] sm:$0xff] }
 0xd55   :  { %v4596_v44 = vpack.c.bf16 %v1231_v43, %v1230_v42  ;;  %4404 = vmatprep.mubr.msk.f32.mxu0 %vm4925_vm10, %v4922_v3 }
 0xdb9   :  { %v1104_v14 = vpop.permute.xlu1 %1103 }
 0xe27   :  { %v1086_v50 = vpop.f32.mrb[14].mxu0 }
 0xe28   :  { %v4738_v51 = vadd.f32 %v1086_v50, %v5195_v61  ;;  %v1088_v54 = vpop.f32.mrb[15].mxu0  ;;  %v1127_v61 = vld [vmem:[%s6294_s9 + $0x8] sm:$0xff] }
 0xe29   :  { %v4739_v53 = vadd.f32 %v1088_v54, %v5202_v1  ;;  %v4568_v4 = vpack.c.bf16 %v1127_v61, %v1126_v2  ;;  %v1128_v1 = vld [vmem:[%s6294_s9 + $0x10] sm:$0xff]  ;;  %v1494_v54 = vld [vmem:[%s6298_s13 + $0x8] sm:$0xff]  ;;  %v1497_v2 = vld [vmem:[%s6298_s13 + $0x20] sm:$0xff] }
 0xe2a   :  { %v1093_v55 = vmul.f32 0.5, %v4738_v51  ;;  %v4572_v6 = vpack.c.bf16 %v1129_v5, %v1128_v1  ;;  %v1493_v51 = vld [vmem:[%s6298_s13] sm:$0xff]  ;;  %v1498_v61 = vld [vmem:[%s6298_s13 + $0x28] sm:$0xff] }
 0xe2b   :  { %4569 = vmatprep.subr.bf16.mxu1 %v4568_v4  ;;  %v1094_v9 = vmul.f32 0.5, %v4739_v53  ;;  %v5519_v1 = vpack.c.bf16 %v1498_v61, %v1497_v2  ;;  %v1368_v5 = vld [vmem:[%s6297_s3 + $0x28] sm:$0xff] }
 0xe2c   :  { %4818 = vtanh.f32 %v1093_v55  ;;  %4571 = vmatpush3.bf16.msra.mxu1 %v4568_v4  ;;  %v1364_v55 = vld [vmem:[%s6297_s3 + $0x8] sm:$0xff]  ;;  %v1367_v4 = vld [vmem:[%s6297_s3 + $0x20] sm:$0xff] }
 0xe2d   :  { %4820 = vtanh.f32 %v4739_v53  ;;  %4573 = vmatprep.subr.bf16.mxu1 %v4572_v6  ;;  %v5487_v53 = vpack.c.bf16 %v1494_v54, %v1493_v51  ;;  %v1504_v54 = vld [vmem:[%s6300_s14 + $0x18] sm:$0xff] }
 0xe2e   :  { %4822 = vtanh.f32 %v1094_v9 }
 0xe30   :  { %4575 = vmatpush3.bf16.msra.mxu1 %v4572_v6  ;;  %v1499_v6 = vld [vmem:[%s6298_s13 + $0x30] sm:$0xff] }
 0xe31   :  { %4577 = vmatprep.subr.bf16.mxu1 %v4576_v10  ;;  %v5534_v8 = vpack.c.bf16 %v1500_v7, %v1499_v6 }
 0xe34   :  { %4579 = vmatpush3.bf16.msra.mxu1 %v4576_v10 }
 0xe35   :  { %4581 = vmatprep.subr.bf16.mxu1 %v4580_v13 }
 0xe36   :  { %v4819_v56 = vpop.eup %4818 }
 0xe37   :  { %v1097_v60 = vadd.f32 1.0, %v4819_v56  ;;  %v4821_v27 = vpop.eup %4820  ;;  %v1495_v56 = vld [vmem:[%s6298_s13 + $0x10] sm:$0xff] }
 0xe38   :  { %4583 = vmatpush3.bf16.msra.mxu1 %v4580_v13  ;;  %v4823_v34 = vpop.eup %4822 }
 0xe39   :  { %v1099_v63 = vmul.f32 0.5, %v1097_v60  ;;  %4585 = vmatprep.subr.bf16.mxu1 %v4584_v33  ;;  %v1098_v20 = vadd.f32 1.0, %v4823_v34  ;;  %v1496_v60 = vld [vmem:[%s6298_s13 + $0x18] sm:$0xff]  ;;  %v4008_v34 = vld [vmem:[%s6299_s12] ss:$0 sm:$0xff] }
 0xe3b   :  { %v1107_v0 = vmul.f32 %v4821_v27, %v1099_v63  ;;  %v1106_v15 = vmul.f32 %v1104_v14, %v1099_v63  ;;  %v1100_v40 = vmul.f32 0.5, %v1098_v20  ;;  %v1365_v63 = vld [vmem:[%s6297_s3 + $0x10] sm:$0xff]  ;;  %v5501_v27 = vpack.c.bf16 %v1496_v60, %v1495_v56 }
 0xe3d   :  { %1109 = vrot.lane.b32.xlu0 %v1107_v0, %s4923_s7  ;;  %v1366_v0 = vld [vmem:[%s6297_s3 + $0x18] sm:$0xff] }
 0xeaf   :  { %v1110_v21 = vpop.permute.xlu0 %1109 }
 0xeb0   :  { %v1112_v25 = vadd.f32 %v1110_v21, %v1106_v15 }
 0xeb2   :  { %4824 = vtanh.f32 %v1112_v25  ;;  %1122 = vrot.lane.b32.xlu0 %v1112_v25, %s4923_s7 }
 0xebc   :  { %v4825_v22 = vpop.eup %4824 }
 0xebd   :  { %v1114_v41 = vmul.f32 %v4825_v22, %v1100_v40 }
 0xebf   :  { %1116 = vrot.lane.b32.xlu1 %v1114_v41, %s4923_s7 }
 0xf24   :  { %v1123_v23 = vpop.permute.xlu0 %1122 }
 0xf25   :  { %v1125_v31 = vsel %vm258_vm9, %v1123_v23, %v5366_v37  ;;  %v4592_v37 = vpack.c.bf16 %v1229_v36, %v1228_v35 }
 0xf31   :  { %v1117_v26 = vpop.permute.xlu1 %1116 }
 0xf32   :  { %v1119_v28 = vsel %vm258_vm9, %v1117_v26, 0.0  ;;  %v1120_v29 = vsel %vm258_vm9, %v1117_v26, %v5373_v45 }
 0xf33   :  { %4179 = vmatprep.mubr.msk.f32.mxu1 %vm89_vm0, %v1120_v29  ;;  %v1216_v32 = vsel %vm1215_vm6, %v5212_v24, %v1119_v28  ;;  %v1223_v45 = vsel %vm1215_vm6, %v1119_v28, %v5212_v24  ;;  %v1372_v24 = vld [vmem:[%s6296_s11 + $0x18] sm:$0xff] }
 0xf34   :  { %4180 = vmatmul.mubr.msk.f32.vlgmr.msra.gmra.mrb[0].mxu1 %vm89_vm0, %v1125_v31 }
 0xf35   :  { %4587 = vmatpush3.bf16.msra.mxu1 %v4584_v33  ;;  %4198 = vmatprep.mubr.msk.f32.mxu1 %vm89_vm0, %v1216_v32 }
 0xf36   :  { %4589 = vmatprep.subr.bf16.mxu1 %v4588_v30 }
 0xf39   :  { %4591 = vmatpush3.bf16.msra.mxu1 %v4588_v30 }
 0xf3a   :  { %4593 = vmatprep.subr.bf16.mxu1 %v4592_v37 }
 0xf3d   :  { %4595 = vmatpush3.bf16.msra.mxu1 %v4592_v37 }
 0xf3e   :  { %4597 = vmatprep.subr.bf16.mxu1 %v4596_v44 }
 0xf41   :  { %4599 = vmatpush3.bf16.msra.mxu1 %v4596_v44 }
 0xf44   :  { %4199 = vmatmul.mubr.msk.f32.vlgmr.msra.gmra.mrb[2].mxu1 %vm89_vm0, %v5378_v46 }
 0xf45   :  { %4201 = vmatprep.mubr.msk.f32.mxu1 %vm89_vm0, %v5345_v16  ;;  %v1369_v16 = vld [vmem:[%s6296_s11] sm:$0xff] }
 0xf48   :  { %4202 = vmatmul.mubr.msk.f32.gmra.mrb[4].mxu1 %vm89_vm0, %v5317_v38  ;;  %v1370_v38 = vld [vmem:[%s6296_s11 + $0x8] sm:$0xff] }
 0xf49   :  { %4204 = vmatprep.mubr.msk.f32.mxu1 %vm89_vm0, %v5320_v39  ;;  %v1371_v39 = vld [vmem:[%s6296_s11 + $0x10] sm:$0xff]  ;;  %v4600_v46 = vpack.c.bf16 %v1370_v38, %v1369_v16 }
 0xf4a   :  { %v4604_v50 = vpack.c.bf16 %v1372_v24, %v1371_v39  ;;  %v1501_v24 = vld [vmem:[%s6300_s14] sm:$0xff] }
 0xf4b   :  { %4601 = vmatprep.subr.bf16.mxu1 %v4600_v46 }
 0xf4c   :  { %4205 = vmatmul.mubr.msk.f32.gmra.mrb[6].mxu1 %vm89_vm0, %v5348_v17  ;;  %v4924_v17 = vmov 0.0|0.0  }
 0xf4d   :  { %4207 = vmatprep.mubr.msk.f32.mxu1 %vm89_vm0, %v5381_v49  ;;  %4710 = vmatprep.subr.bf16.mxu0 %v4924_v17  ;;  %v1363_v49 = vld [vmem:[%s6297_s3] sm:$0xff]  ;;  %s4926_s3 = smov 32  }
 0xf4e   :  { %4603 = vmatpush3.bf16.msra.mxu1 %v4600_v46 }
 0xf4f   :  { %4605 = vmatprep.subr.bf16.mxu1 %v4604_v50 }
 0xf50   :  { %4208 = vmatmul.mubr.msk.f32.gmra.mrb[8].mxu1 %vm89_vm0, %v1223_v45 }
 0xf51   :  { %4218 = vmatprep.mubr.msk.f32.mxu1 %vm1215_vm6, %v1363_v49  ;;  %v1502_v49 = vld [vmem:[%s6300_s14 + $0x8] sm:$0xff] }
 0xf52   :  { %4607 = vmatpush3.bf16.msra.mxu1 %v4604_v50  ;;  %v1503_v50 = vld [vmem:[%s6300_s14 + $0x10] sm:$0xff]  ;;  %v5591_v51 = vpack.c.bf16 %v1502_v49, %v1501_v24 }
 0xf53   :  { %4608 = vmatprep.subr.bf16.mxu1 %v4924_v17 }
 0xf54   :  { %4712 = vmatpush3.bf16.msra.mxu0 %v5591_v51 }
 0xf55   :  { %4219 = vmatmul.mubr.msk.f32.vlgmr.msra.gmra.mrb[10].mxu1 %vm1215_vm6, %v1364_v55  ;;  %v5597_v55 = vpack.c.bf16 %v1504_v54, %v1503_v50  ;;  %4713 = vmatprep.subr.bf16.mxu0 %v4924_v17 }
 0xf56   :  { %4610 = vmatpush3.bf16.msra.mxu1 %v5487_v53  ;;  %4221 = vmatprep.mubr.msk.f32.mxu1 %vm1215_vm6, %v1365_v63 }
 0xf57   :  { %4611 = vmatprep.subr.bf16.mxu1 %v4924_v17 }
 0xf58   :  { %4715 = vmatpush3.bf16.msra.mxu0 %v5597_v55 }
 0xf59   :  { %4222 = vmatmul.mubr.msk.f32.gmra.mrb[12].mxu1 %vm1215_vm6, %v1366_v0 }
 0xf5a   :  { %4613 = vmatpush3.bf16.msra.mxu1 %v5501_v27  ;;  %4224 = vmatprep.mubr.msk.f32.mxu1 %vm1215_vm6, %v1367_v4 }
 0xf5b   :  { %4614 = vmatprep.subr.bf16.mxu1 %v4924_v17 }
 0xf5d   :  { %4225 = vmatmul.mubr.msk.f32.gmra.mrb[14].mxu1 %vm1215_vm6, %v1368_v5 }
 0xf5e   :  { %4616 = vmatpush3.bf16.msra.mxu1 %v5519_v1  ;;  %4243 = vmatprep.mubr.msk.f32.mxu1 %vm4925_vm10, %v4922_v3 }
 0xf5f   :  { %4617 = vmatprep.subr.bf16.mxu1 %v4924_v17 }
 0xf62   :  { %4619 = vmatpush3.bf16.msra.mxu1 %v5534_v8 }
 0xf63   :  { %4620 = vmatprep.subr.bf16.mxu1 %v4924_v17 }
0x1007   :  { %v4181_v9 = vpop.f32.mrb[0].mxu1 }
0x1008   :  { %v1206_v10 = vpop.f32.mrb[1].mxu1 }
0x1009   :  { %1506 = vrot.lane.b32.xlu1 %v1206_v10, %s4926_s3 }
0x1017   :  { %v5544_v11 = vpop.f32.mrb[2].mxu1 }
0x1018   :  { %v5546_v12 = vpop.f32.mrb[3].mxu1 }
0x101b   :  { %v5548_v13 = vpop.f32.mrb[4].mxu1 }
0x101c   :  { %v5550_v14 = vpop.f32.mrb[5].mxu1 }
0x101f   :  { %v5552_v15 = vpop.f32.mrb[6].mxu1 }
0x1020   :  { %v5554_v21 = vpop.f32.mrb[7].mxu1 }
0x1023   :  { %v5556_v25 = vpop.f32.mrb[8].mxu1 }
0x1024   :  { %v5558_v18 = vpop.f32.mrb[9].mxu1 }
0x1028   :  { %v4220_v20 = vpop.f32.mrb[10].mxu1 }
0x1029   :  { %v5567_v40 = vadd.f32 %v4220_v20, %v4008_v34  ;;  %v1464_v22 = vpop.f32.mrb[11].mxu1 }
0x102a   :  { %v1465_v30 = vadd.f32 %v4008_v34, %v1464_v22 }
0x102c   :  { %v4223_v41 = vpop.f32.mrb[12].mxu1 }
0x102d   :  { %v5569_v47 = vadd.f32 %v4223_v41, %v4008_v34  ;;  %v1474_v48 = vpop.f32.mrb[13].mxu1 }
0x102e   :  { %v5571_v52 = vadd.f32 %v4008_v34, %v1474_v48 }
0x1030   :  { %v4226_v23 = vpop.f32.mrb[14].mxu1 }
0x1031   :  { %v5573_v26 = vadd.f32 %v4226_v23, %v4008_v34  ;;  %v1484_v28 = vpop.f32.mrb[15].mxu1 }
0x1032   :  { %v5575_v29 = vadd.f32 %v4008_v34, %v1484_v28  ;;  %v5638_v28 = vand.u32 127, %v79_v57 }
0x107b   :  { %v1507_v19 = vpop.permute.xlu1 %1506 }
0x107c   :  { %v1509_v33 = vsel %vm1215_vm6, 0.0, %v1507_v19 }
0x107d   :  { %4244 = vmatmul.mubr.msk.f32.vlgmr.msra.gmra.mrb[16].mxu1 %vm89_vm0, %v1509_v33 }
0x107e   :  { %4254 = vmatprep.mubr.msk.f32.mxu1 %vm4925_vm10, %v4922_v3  ;;  %4622 = vmatpush3.bf16.msra.mxu1 %v5591_v51 }
0x107f   :  { %4623 = vmatprep.subr.bf16.mxu1 %v4924_v17 }
0x1082   :  { %4625 = vmatpush3.bf16.msra.mxu1 %v5597_v55 }
0x1083   :  { %4626 = vmatprep.subr.bf16.mxu1 %v4924_v17 }
0x1150   :  { %v1579_v31 = vpop.f32.mrb[16].mxu1 }
0x1151   :  { %v1583_v32 = vadd.f32 %v1579_v31, %v1465_v30  ;;  %v4245_v35 = vpop.f32.mrb[17].mxu1  ;;  %v5642_v31 = vsub.s32 %v5638_v28, %v5186_v58 }
0x1153   :  { %4826 = vtanh.f32 %v1583_v32  ;;  %v1584_v37 = vmul.f32 0.5, %v1583_v32 }
0x1155   :  { %4828 = vtanh.f32 %v1584_v37 }
0x115d   :  { %v4827_v36 = vpop.eup %4826 }
0x115e   :  { %1591 = vrot.lane.b32.xlu0 %v4827_v36, %s4923_s7 }
0x115f   :  { %v4829_v42 = vpop.eup %4828 }
0x1160   :  { %v1586_v43 = vadd.f32 1.0, %v4829_v42 }
0x1162   :  { %v1587_v44 = vmul.f32 0.5, %v1586_v43 }
0x1164   :  { %v1589_v38 = vmul.f32 %v4181_v9, %v1587_v44 }
0x11d0   :  { %v1592_v45 = vpop.permute.xlu0 %1591 }
0x11d1   :  { %v1594_v16 = vmul.f32 %v1592_v45, %v1587_v44 }
0x11d3   :  { %1596 = vrot.lane.b32.xlu1 %v1594_v16, %s4926_s3 }
0x1245   :  { %v1597_v39 = vpop.permute.xlu1 %1596 }
0x1246   :  { %v5579_v46 = vadd.f32 %v1597_v39, %v1589_v38 }
0x1248   :  { %4830 = vtanh.f32 %v5579_v46 }
0x1252   :  { %v4831_v56 = vpop.eup %4830 }
0x1253   :  { %1602 = vrot.lane.b32.xlu0 %v4831_v56, %s4923_s7  ;;  %v5657_v56 = vld [vmem:[%s6301_s2] sm:$0xff]  ;;  %s4927_s2 = smov 96  }
0x1254   :  { %vm1362_vm3 = vcmp.gt.f32.partialorder %v5657_v56, 0.5 }
0x12c5   :  { %v1603_v60 = vpop.permute.xlu0 %1602 }
0x12c6   :  { %v5606_v63 = vmul.f32 %v1603_v60, %v1587_v44 }
0x12c8   :  { %1607 = vrot.lane.b32.xlu1 %v5606_v63, %s4926_s3 }
0x133a   :  { %v1608_v0 = vpop.permute.xlu1 %1607 }
0x133b   :  { %4255 = vmatmul.mubr.msk.f32.vlgmr.msra.gmra.mrb[18].mxu1 %vm1215_vm6, %v1608_v0  ;;  %v1611_v2 = vmul.f32 %v5544_v11, %v1608_v0  ;;  %v1610_v61 = vmul.f32 %v1608_v0, %v5546_v12  ;;  %v1614_v6 = vmul.f32 %v1608_v0, %v5554_v21  ;;  %v1612_v7 = vmul.f32 %v1608_v0, %v5550_v14 }
0x133c   :  { %4628 = vmatpush3.bf16.msra.mxu1 %v5487_v53  ;;  %4273 = vmatprep.mubr.msk.f32.mxu1 %vm4925_vm10, %v4922_v3  ;;  %v1616_v19 = vmul.f32 %v1608_v0, %v5558_v18  ;;  %v1613_v33 = vmul.f32 %v5548_v13, %v1608_v0  ;;  %v1615_v22 = vmul.f32 %v5552_v15, %v1608_v0 }
0x133d   :  { %v1621_v4 = vsel %vm1215_vm6, %v1611_v2, 0.0  ;;  %v1618_v5 = vsel %vm1215_vm6, %v1610_v61, 0.0  ;;  %4629 = vmatprep.subr.bf16.mxu1 %v4924_v17  ;;  %v1630_v9 = vsel %vm1215_vm6, %v1614_v6, 0.0  ;;  %v1624_v10 = vsel %vm1215_vm6, %v1612_v7, 0.0 }
0x133e   :  { %1622 = vadd.xlane.f32.xlu1 %v1621_v4  ;;  %1619 = vadd.xlane.f32.xlu0 %v1618_v5  ;;  %v1636_v34 = vsel %vm1215_vm6, %v1616_v19, 0.0  ;;  %v1627_v20 = vsel %vm1215_vm6, %v1613_v33, 0.0  ;;  %v1633_v41 = vsel %vm1215_vm6, %v1615_v22, 0.0  ;;  %v1617_v48 = vmul.f32 %v5556_v25, %v1608_v0 }
0x1340   :  { %4631 = vmatpush3.bf16.msra.mxu1 %v5501_v27  ;;  %v1639_v23 = vsel %vm1215_vm6, %v1617_v48, 0.0 }
0x1341   :  { %4632 = vmatprep.subr.bf16.mxu1 %v4924_v17 }
0x1342   :  { %1631 = vadd.xlane.f32.xlu1 %v1630_v9  ;;  %1625 = vadd.xlane.f32.xlu0 %v1624_v10 }
0x1344   :  { %4634 = vmatpush3.bf16.msra.mxu1 %v5519_v1 }
0x1345   :  { %4635 = vmatprep.subr.bf16.mxu1 %v4924_v17 }
0x1346   :  { %1637 = vadd.xlane.f32.xlu1 %v1636_v34  ;;  %1628 = vadd.xlane.f32.xlu0 %v1627_v20 }
0x1348   :  { %4637 = vmatpush3.bf16.msra.mxu1 %v5534_v8 }
0x1349   :  { %4638 = vmatprep.subr.bf16.mxu1 %v4924_v17 }
0x134a   :  { %1634 = vadd.xlane.f32.xlu0 %v1633_v41 }
0x134e   :  { %1640 = vadd.xlane.f32.xlu0 %v1639_v23 }
0x13cb   :  { %v1620_v30 = vpop.xlane.xlu0 %1619  ;;  %v1623_v32 = vpop.xlane.xlu1 %1622 }
0x13cc   :  { %v1659_v36 = vrot.slane %v1623_v32, %v5642_v31  ;;  %v1655_v37 = vrot.slane %v1620_v30, %v5642_v31 }
0x13ce   :  { %v1685_v57 = vsel %vm1684_vm11, %v1659_v36, %v1655_v37 }
0x13cf   :  { %v1626_v35 = vpop.xlane.xlu0 %1625  ;;  %v1632_v43 = vpop.xlane.xlu1 %1631 }
0x13d0   :  { %v1663_v42 = vrot.slane %v1626_v35, %v5642_v31  ;;  %v1671_v39 = vrot.slane %v1632_v43, %v5642_v31 }
0x13d2   :  { %v1687_v16 = vsel %vm1686_vm12, %v1663_v42, %v1685_v57 }
0x13d3   :  { %v1629_v44 = vpop.xlane.xlu0 %1628  ;;  %v1638_v49 = vpop.xlane.xlu1 %1637 }
0x13d4   :  { %v1667_v45 = vrot.slane %v1629_v44, %v5642_v31  ;;  %v1679_v0 = vrot.slane %v1638_v49, %v5642_v31 }
0x13d6   :  { %v1689_v38 = vsel %vm1688_vm13, %v1667_v45, %v1687_v16 }
0x13d7   :  { %v1635_v24 = vpop.xlane.xlu0 %1634  ;;  %v1691_v54 = vsel %vm1690_vm14, %v1671_v39, %v1689_v38  ;;  %v5672_v39 = vsub.s32 4, %v5186_v58 }
0x13d8   :  { %v1675_v50 = vrot.slane %v1635_v24, %v5642_v31  ;;  %v5675_v24 = vsub.s32 2, %v5186_v58 }
0x13da   :  { %v1693_v60 = vsel %vm1692_vm15, %v1675_v50, %v1691_v54  ;;  %v5680_v54 = vsub.s32 6, %v5186_v58 }
0x13db   :  { %v1641_v2 = vpop.xlane.xlu0 %1640  ;;  %v1695_v4 = vsel %vm1694_vm1, %v1679_v0, %v1693_v60  ;;  %v5683_v60 = vsub.s32 3, %v5186_v58 }
0x13dc   :  { %v1683_v61 = vrot.slane %v1641_v2, %v5642_v31 }
0x13de   :  { %v1697_v5 = vsel %vm1696_vm2, %v1683_v61, %v1695_v4  ;;  %v5688_v61 = vsub.s32 5, %v5186_v58 }
0x13df   :  { %v1699_v6 = vsel %vm1362_vm3, -1e+30, %v1697_v5  ;;  %v5692_v5 = vsub.s32 7, %v5186_v58 }
0x13e0   :  { %v1701_v7 = vsel %vm1700_vm4, %v1699_v6, -inf }
0x13e1   :  { %v1702_v9 = vrot.slane %v1701_v7, 4 }
0x13e3   :  { %v1703_v10 = vmax.f32 %v1701_v7, %v1702_v9 }
0x13e5   :  { %v1704_v19 = vrot.slane %v1703_v10, 2 }
0x13e7   :  { %v1705_v33 = vmax.f32 %v1703_v10, %v1704_v19 }
0x13e9   :  { %v1706_v34 = vrot.slane %v1705_v33, 1 }
0x13eb   :  { %v1707_v20 = vmax.f32 %v1705_v33, %v1706_v34 }
0x13ed   :  { %v1708_v22 = vsub.f32 %v1699_v6, %v1707_v20 }
0x13ef   :  { %v1709_v41 = vmul.f32 1.442695, %v1708_v22 }
0x13f1   :  { %4832 = vpow2.f32 %v1709_v41 }
0x13fb   :  { %v4833_v48 = vpop.eup %4832 }
0x13fc   :  { %v1711_v23 = vsel %vm1700_vm4, %v4833_v48, 0.0 }
0x13fd   :  { %v1712_v30 = vrot.slane %v1711_v23, 4 }
0x13ff   :  { %v1713_v32 = vadd.f32 %v1712_v30, %v1711_v23 }
0x1401   :  { %v1714_v35 = vrot.slane %v1713_v32, 2 }
0x1403   :  { %v1715_v36 = vadd.f32 %v1714_v35, %v1713_v32 }
0x1405   :  { %v1716_v37 = vrot.slane %v1715_v36, 1 }
0x1407   :  { %v1717_v42 = vadd.f32 %v1716_v37, %v1715_v36 }
0x1409   :  { %4834 = vrcp.f32 %v1717_v42 }
0x140e   :  { %v1872_v43 = vpop.f32.mrb[18].mxu1 }
0x140f   :  { %v4256_v44 = vpop.f32.mrb[19].mxu1 }
0x1413   :  { %v4835_v57 = vpop.eup %4834 }
0x1414   :  { %v1719_v45 = vmul.f32 %v4835_v57, %v4833_v48 }
0x1416   :  { %v1730_v16 = vrot.slane %v1719_v45, %v5198_v62  ;;  %v1723_v38 = vrot.slane %v1719_v45, %v5189_v59  ;;  %v1751_v49 = vrot.slane %v1719_v45, %v5672_v39  ;;  %v1737_v50 = vrot.slane %v1719_v45, %v5675_v24 }
0x1417   :  { %v1765_v0 = vrot.slane %v1719_v45, %v5680_v54  ;;  %v1744_v2 = vrot.slane %v1719_v45, %v5683_v60  ;;  %v1758_v4 = vrot.slane %v1719_v45, %v5688_v61  ;;  %v1772_v6 = vrot.slane %v1719_v45, %v5692_v5 }
0x1418   :  { %1732 = vbcast.lane.b32.xlu0 %v1730_v16, 256  ;;  %1725 = vbcast.lane.b32.xlu1 %v1723_v38, 256 }
0x141c   :  { %1753 = vbcast.lane.b32.xlu0 %v1751_v49, 256  ;;  %1739 = vbcast.lane.b32.xlu1 %v1737_v50, 256 }
0x1420   :  { %1767 = vbcast.lane.b32.xlu0 %v1765_v0, 256  ;;  %1746 = vbcast.lane.b32.xlu1 %v1744_v2, 256 }
0x1424   :  { %1760 = vbcast.lane.b32.xlu1 %v1758_v4, 256 }
0x1428   :  { %1774 = vbcast.lane.b32.xlu1 %v1772_v6, 256 }
0x142c   :  { %1877 = vrot.lane.b32.xlu1 %v5606_v63, %s4923_s7 }
0x148a   :  { %v1733_v7 = vpop.permute.xlu0 %1732  ;;  %v1726_v9 = vpop.permute.xlu1 %1725 }
0x148b   :  { %v1777_v10 = vmul.f32 %v5544_v11, %v1733_v7  ;;  %v1776_v19 = vmul.f32 %v1726_v9, %v5546_v12 }
0x148d   :  { %v1786_v33 = vsel %vm1784_vm5, %v1777_v10, 0.0  ;;  %v1785_v34 = vsel %vm1784_vm5, %v1776_v19, 0.0 }
0x148e   :  { %v1787_v58 = vadd.f32 %v1786_v33, %v1785_v34  ;;  %v1754_v20 = vpop.permute.xlu0 %1753  ;;  %v1740_v22 = vpop.permute.xlu1 %1739 }
0x148f   :  { %v1778_v41 = vmul.f32 %v1740_v22, %v5550_v14  ;;  %v1780_v30 = vmul.f32 %v1754_v20, %v5554_v21 }
0x1491   :  { %v1788_v48 = vsel %vm1784_vm5, %v1778_v41, 0.0  ;;  %v1792_v44 = vsel %vm1784_vm5, %v1780_v30, 0.0 }
0x1492   :  { %v1789_v23 = vadd.f32 %v1788_v48, %v1787_v58  ;;  %v1747_v63 = vpop.permute.xlu1 %1746  ;;  %v1768_v35 = vpop.permute.xlu0 %1767 }
0x1493   :  { %v1779_v32 = vmul.f32 %v5548_v13, %v1747_v63  ;;  %v1782_v57 = vmul.f32 %v1768_v35, %v5558_v18 }
0x1495   :  { %v1790_v36 = vsel %vm1784_vm5, %v1779_v32, 0.0  ;;  %v1796_v0 = vsel %vm1784_vm5, %v1782_v57, 0.0 }
0x1496   :  { %v1791_v37 = vadd.f32 %v1790_v36, %v1789_v23  ;;  %v1761_v42 = vpop.permute.xlu1 %1760 }
0x1497   :  { %v1781_v45 = vmul.f32 %v5552_v15, %v1761_v42 }
0x1498   :  { %v1793_v16 = vadd.f32 %v1792_v44, %v1791_v37 }
0x1499   :  { %v1794_v38 = vsel %vm1784_vm5, %v1781_v45, 0.0 }
0x149a   :  { %v1795_v49 = vadd.f32 %v1794_v38, %v1793_v16  ;;  %v1775_v50 = vpop.permute.xlu1 %1774 }
0x149b   :  { %v1783_v2 = vmul.f32 %v5556_v25, %v1775_v50 }
0x149c   :  { %v1797_v4 = vadd.f32 %v1796_v0, %v1795_v49 }
0x149d   :  { %v1798_v6 = vsel %vm1784_vm5, %v1783_v2, 0.0 }
0x149e   :  { %v1799_v7 = vadd.f32 %v1798_v6, %v1797_v4  ;;  %v1878_v33 = vpop.permute.xlu1 %1877 }
0x14a0   :  { %1801 = vrot.lane.b32.xlu0 %v1799_v7, %s4927_s2 }
0x1512   :  { %v1802_v9 = vpop.permute.xlu0 %1801 }
0x1513   :  { %v1873_v10 = vadd.f32 %v1872_v43, %v1802_v9 }
0x1515   :  { %4836 = vtanh.f32 %v1873_v10 }
0x151f   :  { %v5714_v19 = vpop.eup %4836 }
0x1520   :  { %v1880_v34 = vsel %vm1215_vm6, %v5714_v19, %v1878_v33 }
0x1521   :  { %4274 = vmatmul.mubr.msk.f32.vlgmr.msra.gmra.mrb[20].mxu1 %vm89_vm0, %v1880_v34 }
0x1522   :  { %4640 = vmatpush3.bf16.msra.mxu1 %v5591_v51  ;;  %4284 = vmatprep.mubr.msk.f32.mxu1 %vm4925_vm10, %v4922_v3 }
0x1523   :  { %4641 = vmatprep.subr.bf16.mxu1 %v4924_v17 }
0x1526   :  { %4643 = vmatpush3.bf16.msra.mxu1 %v5597_v55 }
0x1527   :  { %4644 = vmatprep.subr.bf16.mxu1 %v4924_v17 }
0x15f4   :  { %v1950_v43 = vpop.f32.mrb[20].mxu1 }
0x15f5   :  { %v1954_v58 = vadd.f32 %v1950_v43, %v5567_v40  ;;  %v4275_v20 = vpop.f32.mrb[21].mxu1 }
0x15f7   :  { %4838 = vtanh.f32 %v1954_v58  ;;  %v1955_v41 = vmul.f32 0.5, %v1954_v58 }
0x15f9   :  { %4840 = vtanh.f32 %v1955_v41 }
0x1601   :  { %v4839_v22 = vpop.eup %4838 }
0x1602   :  { %1962 = vrot.lane.b32.xlu0 %v4839_v22, %s4923_s7 }
0x1603   :  { %v4841_v48 = vpop.eup %4840 }
0x1604   :  { %v1957_v23 = vadd.f32 1.0, %v4841_v48 }
0x1606   :  { %v1958_v63 = vmul.f32 0.5, %v1957_v23 }
0x1608   :  { %v1960_v35 = vmul.f32 %v1958_v63, %v5579_v46 }
0x1674   :  { %v1963_v30 = vpop.permute.xlu0 %1962 }
0x1675   :  { %v1965_v32 = vmul.f32 %v1963_v30, %v1958_v63 }
0x1677   :  { %1967 = vrot.lane.b32.xlu1 %v1965_v32, %s4926_s3 }
0x16e9   :  { %v1968_v36 = vpop.permute.xlu1 %1967 }
0x16ea   :  { %v5729_v37 = vadd.f32 %v1968_v36, %v1960_v35 }
0x16ec   :  { %4842 = vtanh.f32 %v5729_v37 }
0x16f6   :  { %v4843_v40 = vpop.eup %4842 }
0x16f7   :  { %1973 = vrot.lane.b32.xlu0 %v4843_v40, %s4923_s7 }
0x1769   :  { %v1974_v42 = vpop.permute.xlu0 %1973 }
0x176a   :  { %v5733_v44 = vmul.f32 %v1974_v42, %v1958_v63 }
0x176c   :  { %1978 = vrot.lane.b32.xlu1 %v5733_v44, %s4926_s3 }
0x17de   :  { %v1979_v57 = vpop.permute.xlu1 %1978 }
0x17df   :  { %4285 = vmatmul.mubr.msk.f32.vlgmr.msra.gmra.mrb[22].mxu1 %vm1215_vm6, %v1979_v57  ;;  %v1982_v45 = vmul.f32 %v5544_v11, %v1979_v57  ;;  %v1981_v46 = vmul.f32 %v1979_v57, %v5546_v12  ;;  %v1985_v49 = vmul.f32 %v1979_v57, %v5554_v21  ;;  %v1983_v50 = vmul.f32 %v1979_v57, %v5550_v14 }
0x17e0   :  { %4646 = vmatpush3.bf16.msra.mxu1 %v5487_v53  ;;  %4303 = vmatprep.mubr.msk.f32.mxu1 %vm4925_vm10, %v4922_v3  ;;  %v1987_v4 = vmul.f32 %v1979_v57, %v5558_v18  ;;  %v1984_v6 = vmul.f32 %v5548_v13, %v1979_v57  ;;  %v1986_v10 = vmul.f32 %v5552_v15, %v1979_v57 }
0x17e1   :  { %v1992_v16 = vsel %vm1215_vm6, %v1982_v45, 0.0  ;;  %v1989_v38 = vsel %vm1215_vm6, %v1981_v46, 0.0  ;;  %4647 = vmatprep.subr.bf16.mxu1 %v4924_v17  ;;  %v2001_v0 = vsel %vm1215_vm6, %v1985_v49, 0.0  ;;  %v1995_v2 = vsel %vm1215_vm6, %v1983_v50, 0.0 }
0x17e2   :  { %1993 = vadd.xlane.f32.xlu1 %v1992_v16  ;;  %1990 = vadd.xlane.f32.xlu0 %v1989_v38  ;;  %v2007_v7 = vsel %vm1215_vm6, %v1987_v4, 0.0  ;;  %v1998_v9 = vsel %vm1215_vm6, %v1984_v6, 0.0  ;;  %v2004_v33 = vsel %vm1215_vm6, %v1986_v10, 0.0  ;;  %v1988_v34 = vmul.f32 %v5556_v25, %v1979_v57 }
0x17e4   :  { %4649 = vmatpush3.bf16.msra.mxu1 %v5501_v27  ;;  %v2010_v43 = vsel %vm1215_vm6, %v1988_v34, 0.0 }
0x17e5   :  { %4650 = vmatprep.subr.bf16.mxu1 %v4924_v17 }
0x17e6   :  { %2002 = vadd.xlane.f32.xlu1 %v2001_v0  ;;  %1996 = vadd.xlane.f32.xlu0 %v1995_v2 }
0x17e8   :  { %4652 = vmatpush3.bf16.msra.mxu1 %v5519_v1 }
0x17e9   :  { %4653 = vmatprep.subr.bf16.mxu1 %v4924_v17 }
0x17ea   :  { %2008 = vadd.xlane.f32.xlu1 %v2007_v7  ;;  %1999 = vadd.xlane.f32.xlu0 %v1998_v9 }
0x17ec   :  { %4655 = vmatpush3.bf16.msra.mxu1 %v5534_v8 }
0x17ed   :  { %4656 = vmatprep.subr.bf16.mxu1 %v4924_v17 }
0x17ee   :  { %2005 = vadd.xlane.f32.xlu0 %v2004_v33 }
0x17f2   :  { %2011 = vadd.xlane.f32.xlu0 %v2010_v43 }
0x186f   :  { %v1991_v58 = vpop.xlane.xlu0 %1990  ;;  %v1994_v20 = vpop.xlane.xlu1 %1993 }
0x1870   :  { %v2028_v41 = vrot.slane %v1994_v20, %v5642_v31  ;;  %v2024_v48 = vrot.slane %v1991_v58, %v5642_v31 }
0x1872   :  { %v2053_v32 = vsel %vm1684_vm11, %v2028_v41, %v2024_v48 }
0x1873   :  { %v1997_v22 = vpop.xlane.xlu0 %1996  ;;  %v2003_v63 = vpop.xlane.xlu1 %2002 }
0x1874   :  { %v2032_v23 = vrot.slane %v1997_v22, %v5642_v31  ;;  %v2040_v42 = vrot.slane %v2003_v63, %v5642_v31 }
0x1876   :  { %v2054_v36 = vsel %vm1686_vm12, %v2032_v23, %v2053_v32 }
0x1877   :  { %v2000_v30 = vpop.xlane.xlu0 %1999  ;;  %v2009_v45 = vpop.xlane.xlu1 %2008 }
0x1878   :  { %v2036_v35 = vrot.slane %v2000_v30, %v5642_v31  ;;  %v2048_v49 = vrot.slane %v2009_v45, %v5642_v31 }
0x187a   :  { %v2055_v40 = vsel %vm1688_vm13, %v2036_v35, %v2054_v36 }
0x187b   :  { %v2006_v57 = vpop.xlane.xlu0 %2005  ;;  %v2056_v16 = vsel %vm1690_vm14, %v2040_v42, %v2055_v40 }
0x187c   :  { %v2044_v46 = vrot.slane %v2006_v57, %v5642_v31 }
0x187e   :  { %v2057_v38 = vsel %vm1692_vm15, %v2044_v46, %v2056_v16 }
0x187f   :  { %v2012_v50 = vpop.xlane.xlu0 %2011  ;;  %v2058_v2 = vsel %vm1694_vm1, %v2048_v49, %v2057_v38 }
0x1880   :  { %v2052_v0 = vrot.slane %v2012_v50, %v5642_v31 }
0x1882   :  { %v2059_v4 = vsel %vm1696_vm2, %v2052_v0, %v2058_v2 }
0x1883   :  { %v2061_v6 = vsel %vm1362_vm3, -1e+30, %v2059_v4 }
0x1884   :  { %v2062_v7 = vsel %vm1700_vm4, %v2061_v6, -inf }
0x1885   :  { %v2063_v9 = vrot.slane %v2062_v7, 4 }
0x1887   :  { %v2064_v10 = vmax.f32 %v2062_v7, %v2063_v9 }
0x1889   :  { %v2065_v33 = vrot.slane %v2064_v10, 2 }
0x188b   :  { %v2066_v34 = vmax.f32 %v2064_v10, %v2065_v33 }
0x188d   :  { %v2067_v43 = vrot.slane %v2066_v34, 1 }
0x188f   :  { %v2068_v58 = vmax.f32 %v2066_v34, %v2067_v43 }
0x1891   :  { %v2069_v20 = vsub.f32 %v2061_v6, %v2068_v58 }
0x1893   :  { %v2070_v22 = vmul.f32 1.442695, %v2069_v20 }
0x1895   :  { %4844 = vpow2.f32 %v2070_v22 }
0x189f   :  { %v4845_v41 = vpop.eup %4844 }
0x18a0   :  { %v2072_v48 = vsel %vm1700_vm4, %v4845_v41, 0.0 }
0x18a1   :  { %v2073_v23 = vrot.slane %v2072_v48, 4 }
0x18a3   :  { %v2074_v63 = vadd.f32 %v2073_v23, %v2072_v48 }
0x18a5   :  { %v2075_v30 = vrot.slane %v2074_v63, 2 }
0x18a7   :  { %v2076_v32 = vadd.f32 %v2075_v30, %v2074_v63 }
0x18a9   :  { %v2077_v35 = vrot.slane %v2076_v32, 1 }
0x18ab   :  { %v2078_v36 = vadd.f32 %v2077_v35, %v2076_v32 }
0x18ad   :  { %4846 = vrcp.f32 %v2078_v36 }
0x18b2   :  { %v2232_v40 = vpop.f32.mrb[22].mxu1 }
0x18b3   :  { %v4286_v42 = vpop.f32.mrb[23].mxu1 }
0x18b7   :  { %v4847_v57 = vpop.eup %4846 }
0x18b8   :  { %v2080_v45 = vmul.f32 %v4847_v57, %v4845_v41 }
0x18ba   :  { %v2091_v46 = vrot.slane %v2080_v45, %v5198_v62  ;;  %v2084_v16 = vrot.slane %v2080_v45, %v5189_v59  ;;  %v2112_v38 = vrot.slane %v2080_v45, %v5672_v39  ;;  %v2098_v49 = vrot.slane %v2080_v45, %v5675_v24 }
0x18bb   :  { %v2126_v50 = vrot.slane %v2080_v45, %v5680_v54  ;;  %v2105_v0 = vrot.slane %v2080_v45, %v5683_v60  ;;  %v2119_v2 = vrot.slane %v2080_v45, %v5688_v61  ;;  %v2133_v4 = vrot.slane %v2080_v45, %v5692_v5 }
0x18bc   :  { %2093 = vbcast.lane.b32.xlu0 %v2091_v46, 256  ;;  %2086 = vbcast.lane.b32.xlu1 %v2084_v16, 256 }
0x18c0   :  { %2114 = vbcast.lane.b32.xlu0 %v2112_v38, 256  ;;  %2100 = vbcast.lane.b32.xlu1 %v2098_v49, 256 }
0x18c4   :  { %2128 = vbcast.lane.b32.xlu0 %v2126_v50, 256  ;;  %2107 = vbcast.lane.b32.xlu1 %v2105_v0, 256 }
0x18c8   :  { %2121 = vbcast.lane.b32.xlu1 %v2119_v2, 256 }
0x18cc   :  { %2135 = vbcast.lane.b32.xlu1 %v2133_v4, 256 }
0x18d0   :  { %2237 = vrot.lane.b32.xlu1 %v5733_v44, %s4923_s7 }
0x192e   :  { %v2094_v6 = vpop.permute.xlu0 %2093  ;;  %v2087_v7 = vpop.permute.xlu1 %2086 }
0x192f   :  { %v2138_v9 = vmul.f32 %v5544_v11, %v2094_v6  ;;  %v2137_v10 = vmul.f32 %v2087_v7, %v5546_v12 }
0x1931   :  { %v2146_v33 = vsel %vm1784_vm5, %v2138_v9, 0.0  ;;  %v2145_v34 = vsel %vm1784_vm5, %v2137_v10, 0.0 }
0x1932   :  { %v2147_v43 = vadd.f32 %v2146_v33, %v2145_v34  ;;  %v2115_v58 = vpop.permute.xlu0 %2114  ;;  %v2101_v20 = vpop.permute.xlu1 %2100 }
0x1933   :  { %v2139_v22 = vmul.f32 %v2101_v20, %v5550_v14  ;;  %v2141_v44 = vmul.f32 %v2115_v58, %v5554_v21 }
0x1935   :  { %v2148_v41 = vsel %vm1784_vm5, %v2139_v22, 0.0  ;;  %v2152_v42 = vsel %vm1784_vm5, %v2141_v44, 0.0 }
0x1936   :  { %v2149_v48 = vadd.f32 %v2148_v41, %v2147_v43  ;;  %v2108_v23 = vpop.permute.xlu1 %2107  ;;  %v2129_v30 = vpop.permute.xlu0 %2128 }
0x1937   :  { %v2140_v63 = vmul.f32 %v5548_v13, %v2108_v23  ;;  %v2143_v57 = vmul.f32 %v2129_v30, %v5558_v18 }
0x1939   :  { %v2150_v32 = vsel %vm1784_vm5, %v2140_v63, 0.0  ;;  %v2156_v50 = vsel %vm1784_vm5, %v2143_v57, 0.0 }
0x193a   :  { %v2151_v35 = vadd.f32 %v2150_v32, %v2149_v48  ;;  %v2122_v36 = vpop.permute.xlu1 %2121 }
0x193b   :  { %v2142_v45 = vmul.f32 %v5552_v15, %v2122_v36 }
0x193c   :  { %v2153_v46 = vadd.f32 %v2152_v42, %v2151_v35 }
0x193d   :  { %v2154_v16 = vsel %vm1784_vm5, %v2142_v45, 0.0 }
0x193e   :  { %v2155_v38 = vadd.f32 %v2154_v16, %v2153_v46  ;;  %v2136_v49 = vpop.permute.xlu1 %2135 }
0x193f   :  { %v2144_v0 = vmul.f32 %v5556_v25, %v2136_v49 }
0x1940   :  { %v2157_v2 = vadd.f32 %v2156_v50, %v2155_v38 }
0x1941   :  { %v2158_v4 = vsel %vm1784_vm5, %v2144_v0, 0.0 }
0x1942   :  { %v2159_v6 = vadd.f32 %v2158_v4, %v2157_v2  ;;  %v2238_v33 = vpop.permute.xlu1 %2237 }
0x1944   :  { %2161 = vrot.lane.b32.xlu0 %v2159_v6, %s4927_s2 }
0x19b6   :  { %v2162_v7 = vpop.permute.xlu0 %2161 }
0x19b7   :  { %v2233_v9 = vadd.f32 %v2232_v40, %v2162_v7 }
0x19b9   :  { %4848 = vtanh.f32 %v2233_v9 }
0x19c3   :  { %v5810_v10 = vpop.eup %4848 }
0x19c4   :  { %v2240_v34 = vsel %vm1215_vm6, %v5810_v10, %v2238_v33 }
0x19c5   :  { %4304 = vmatmul.mubr.msk.f32.vlgmr.msra.gmra.mrb[24].mxu1 %vm89_vm0, %v2240_v34 }
0x19c6   :  { %4658 = vmatpush3.bf16.msra.mxu1 %v5591_v51  ;;  %4314 = vmatprep.mubr.msk.f32.mxu1 %vm4925_vm10, %v4922_v3 }
0x19c7   :  { %4659 = vmatprep.subr.bf16.mxu1 %v4924_v17 }
0x19ca   :  { %4661 = vmatpush3.bf16.msra.mxu1 %v5597_v55 }
0x19cb   :  { %4662 = vmatprep.subr.bf16.mxu1 %v4924_v17 }
0x1a98   :  { %v2310_v40 = vpop.f32.mrb[24].mxu1 }
0x1a99   :  { %v2314_v43 = vadd.f32 %v2310_v40, %v5571_v52  ;;  %v4305_v58 = vpop.f32.mrb[25].mxu1 }
0x1a9b   :  { %4850 = vtanh.f32 %v2314_v43  ;;  %v2315_v22 = vmul.f32 0.5, %v2314_v43 }
0x1a9d   :  { %4852 = vtanh.f32 %v2315_v22 }
0x1aa5   :  { %v4851_v20 = vpop.eup %4850 }
0x1aa6   :  { %2322 = vrot.lane.b32.xlu0 %v4851_v20, %s4923_s7 }
0x1aa7   :  { %v4853_v41 = vpop.eup %4852 }
0x1aa8   :  { %v2317_v48 = vadd.f32 1.0, %v4853_v41 }
0x1aaa   :  { %v2318_v23 = vmul.f32 0.5, %v2317_v48 }
0x1aac   :  { %v2320_v30 = vmul.f32 %v2318_v23, %v5729_v37 }
0x1b18   :  { %v2323_v44 = vpop.permute.xlu0 %2322 }
0x1b19   :  { %v2325_v63 = vmul.f32 %v2323_v44, %v2318_v23 }
0x1b1b   :  { %2327 = vrot.lane.b32.xlu1 %v2325_v63, %s4926_s3 }
0x1b8d   :  { %v2328_v32 = vpop.permute.xlu1 %2327 }
0x1b8e   :  { %v5825_v35 = vadd.f32 %v2328_v32, %v2320_v30 }
0x1b90   :  { %4854 = vtanh.f32 %v5825_v35 }
0x1b9a   :  { %v4855_v52 = vpop.eup %4854 }
0x1b9b   :  { %2333 = vrot.lane.b32.xlu0 %v4855_v52, %s4923_s7 }
0x1c0d   :  { %v2334_v36 = vpop.permute.xlu0 %2333 }
0x1c0e   :  { %v5829_v42 = vmul.f32 %v2334_v36, %v2318_v23 }
0x1c10   :  { %2338 = vrot.lane.b32.xlu1 %v5829_v42, %s4926_s3 }
0x1c82   :  { %v2339_v57 = vpop.permute.xlu1 %2338 }
0x1c83   :  { %4315 = vmatmul.mubr.msk.f32.vlgmr.msra.gmra.mrb[26].mxu1 %vm1215_vm6, %v2339_v57  ;;  %v2342_v45 = vmul.f32 %v5544_v11, %v2339_v57  ;;  %v2341_v37 = vmul.f32 %v2339_v57, %v5546_v12  ;;  %v2345_v38 = vmul.f32 %v2339_v57, %v5554_v21  ;;  %v2343_v49 = vmul.f32 %v2339_v57, %v5550_v14 }
0x1c84   :  { %4664 = vmatpush3.bf16.msra.mxu1 %v5487_v53  ;;  %4333 = vmatprep.mubr.msk.f32.mxu1 %vm4925_vm10, %v4922_v3  ;;  %v2347_v2 = vmul.f32 %v2339_v57, %v5558_v18  ;;  %v2344_v4 = vmul.f32 %v5548_v13, %v2339_v57  ;;  %v2346_v9 = vmul.f32 %v5552_v15, %v2339_v57 }
0x1c85   :  { %v2352_v46 = vsel %vm1215_vm6, %v2342_v45, 0.0  ;;  %v2349_v16 = vsel %vm1215_vm6, %v2341_v37, 0.0  ;;  %4665 = vmatprep.subr.bf16.mxu1 %v4924_v17  ;;  %v2361_v50 = vsel %vm1215_vm6, %v2345_v38, 0.0  ;;  %v2355_v0 = vsel %vm1215_vm6, %v2343_v49, 0.0 }
0x1c86   :  { %2353 = vadd.xlane.f32.xlu1 %v2352_v46  ;;  %2350 = vadd.xlane.f32.xlu0 %v2349_v16  ;;  %v2367_v6 = vsel %vm1215_vm6, %v2347_v2, 0.0  ;;  %v2358_v7 = vsel %vm1215_vm6, %v2344_v4, 0.0  ;;  %v2364_v33 = vsel %vm1215_vm6, %v2346_v9, 0.0  ;;  %v2348_v34 = vmul.f32 %v5556_v25, %v2339_v57 }
0x1c88   :  { %4667 = vmatpush3.bf16.msra.mxu1 %v5501_v27  ;;  %v2370_v40 = vsel %vm1215_vm6, %v2348_v34, 0.0 }
0x1c89   :  { %4668 = vmatprep.subr.bf16.mxu1 %v4924_v17 }
0x1c8a   :  { %2362 = vadd.xlane.f32.xlu1 %v2361_v50  ;;  %2356 = vadd.xlane.f32.xlu0 %v2355_v0 }
0x1c8c   :  { %4670 = vmatpush3.bf16.msra.mxu1 %v5519_v1 }
0x1c8d   :  { %4671 = vmatprep.subr.bf16.mxu1 %v4924_v17 }
0x1c8e   :  { %2368 = vadd.xlane.f32.xlu1 %v2367_v6  ;;  %2359 = vadd.xlane.f32.xlu0 %v2358_v7 }
0x1c90   :  { %4673 = vmatpush3.bf16.msra.mxu1 %v5534_v8 }
0x1c91   :  { %4674 = vmatprep.subr.bf16.mxu1 %v4924_v17 }
0x1c92   :  { %2365 = vadd.xlane.f32.xlu0 %v2364_v33 }
0x1c96   :  { %2371 = vadd.xlane.f32.xlu0 %v2370_v40 }
0x1d13   :  { %v2351_v43 = vpop.xlane.xlu0 %2350  ;;  %v2354_v58 = vpop.xlane.xlu1 %2353 }
0x1d14   :  { %v2388_v22 = vrot.slane %v2354_v58, %v5642_v31  ;;  %v2384_v41 = vrot.slane %v2351_v43, %v5642_v31 }
0x1d16   :  { %v2413_v63 = vsel %vm1684_vm11, %v2388_v22, %v2384_v41 }
0x1d17   :  { %v2357_v20 = vpop.xlane.xlu0 %2356  ;;  %v2363_v23 = vpop.xlane.xlu1 %2362 }
0x1d18   :  { %v2392_v48 = vrot.slane %v2357_v20, %v5642_v31  ;;  %v2400_v36 = vrot.slane %v2363_v23, %v5642_v31 }
0x1d1a   :  { %v2414_v32 = vsel %vm1686_vm12, %v2392_v48, %v2413_v63 }
0x1d1b   :  { %v2360_v44 = vpop.xlane.xlu0 %2359  ;;  %v2369_v45 = vpop.xlane.xlu1 %2368 }
0x1d1c   :  { %v2396_v30 = vrot.slane %v2360_v44, %v5642_v31  ;;  %v2408_v38 = vrot.slane %v2369_v45, %v5642_v31 }
0x1d1e   :  { %v2415_v52 = vsel %vm1688_vm13, %v2396_v30, %v2414_v32 }
0x1d1f   :  { %v2366_v57 = vpop.xlane.xlu0 %2365  ;;  %v2416_v46 = vsel %vm1690_vm14, %v2400_v36, %v2415_v52 }
0x1d20   :  { %v2404_v37 = vrot.slane %v2366_v57, %v5642_v31 }
0x1d22   :  { %v2417_v16 = vsel %vm1692_vm15, %v2404_v37, %v2416_v46 }
0x1d23   :  { %v2372_v49 = vpop.xlane.xlu0 %2371  ;;  %v2418_v0 = vsel %vm1694_vm1, %v2408_v38, %v2417_v16 }
0x1d24   :  { %v2412_v50 = vrot.slane %v2372_v49, %v5642_v31 }
0x1d26   :  { %v2419_v2 = vsel %vm1696_vm2, %v2412_v50, %v2418_v0 }
0x1d27   :  { %v2421_v4 = vsel %vm1362_vm3, -1e+30, %v2419_v2 }
0x1d28   :  { %v2422_v6 = vsel %vm1700_vm4, %v2421_v4, -inf }
0x1d29   :  { %v2423_v7 = vrot.slane %v2422_v6, 4 }
0x1d2b   :  { %v2424_v9 = vmax.f32 %v2422_v6, %v2423_v7 }
0x1d2d   :  { %v2425_v33 = vrot.slane %v2424_v9, 2 }
0x1d2f   :  { %v2426_v34 = vmax.f32 %v2424_v9, %v2425_v33 }
0x1d31   :  { %v2427_v40 = vrot.slane %v2426_v34, 1 }
0x1d33   :  { %v2428_v43 = vmax.f32 %v2426_v34, %v2427_v40 }
0x1d35   :  { %v2429_v58 = vsub.f32 %v2421_v4, %v2428_v43 }
0x1d37   :  { %v2430_v20 = vmul.f32 1.442695, %v2429_v58 }
0x1d39   :  { %4856 = vpow2.f32 %v2430_v20 }
0x1d43   :  { %v4857_v22 = vpop.eup %4856 }
0x1d44   :  { %v2432_v41 = vsel %vm1700_vm4, %v4857_v22, 0.0 }
0x1d45   :  { %v2433_v48 = vrot.slane %v2432_v41, 4 }
0x1d47   :  { %v2434_v23 = vadd.f32 %v2433_v48, %v2432_v41 }
0x1d49   :  { %v2435_v44 = vrot.slane %v2434_v23, 2 }
0x1d4b   :  { %v2436_v63 = vadd.f32 %v2435_v44, %v2434_v23 }
0x1d4d   :  { %v2437_v30 = vrot.slane %v2436_v63, 1 }
0x1d4f   :  { %v2438_v32 = vadd.f32 %v2437_v30, %v2436_v63 }
0x1d51   :  { %4858 = vrcp.f32 %v2438_v32 }
0x1d56   :  { %v2592_v52 = vpop.f32.mrb[26].mxu1 }
0x1d57   :  { %v4316_v36 = vpop.f32.mrb[27].mxu1 }
0x1d5b   :  { %v4859_v57 = vpop.eup %4858 }
0x1d5c   :  { %v2440_v45 = vmul.f32 %v4859_v57, %v4857_v22 }
0x1d5e   :  { %v2451_v37 = vrot.slane %v2440_v45, %v5198_v62  ;;  %v2444_v46 = vrot.slane %v2440_v45, %v5189_v59  ;;  %v2472_v16 = vrot.slane %v2440_v45, %v5672_v39  ;;  %v2458_v38 = vrot.slane %v2440_v45, %v5675_v24 }
0x1d5f   :  { %v2486_v49 = vrot.slane %v2440_v45, %v5680_v54  ;;  %v2465_v50 = vrot.slane %v2440_v45, %v5683_v60  ;;  %v2479_v0 = vrot.slane %v2440_v45, %v5688_v61  ;;  %v2493_v2 = vrot.slane %v2440_v45, %v5692_v5 }
0x1d60   :  { %2453 = vbcast.lane.b32.xlu0 %v2451_v37, 256  ;;  %2446 = vbcast.lane.b32.xlu1 %v2444_v46, 256 }
0x1d64   :  { %2474 = vbcast.lane.b32.xlu0 %v2472_v16, 256  ;;  %2460 = vbcast.lane.b32.xlu1 %v2458_v38, 256 }
0x1d68   :  { %2488 = vbcast.lane.b32.xlu0 %v2486_v49, 256  ;;  %2467 = vbcast.lane.b32.xlu1 %v2465_v50, 256 }
0x1d6c   :  { %2481 = vbcast.lane.b32.xlu1 %v2479_v0, 256 }
0x1d70   :  { %2495 = vbcast.lane.b32.xlu1 %v2493_v2, 256 }
0x1d74   :  { %2597 = vrot.lane.b32.xlu1 %v5829_v42, %s4923_s7 }
0x1dd2   :  { %v2454_v4 = vpop.permute.xlu0 %2453  ;;  %v2447_v6 = vpop.permute.xlu1 %2446 }
0x1dd3   :  { %v2498_v7 = vmul.f32 %v5544_v11, %v2454_v4  ;;  %v2497_v9 = vmul.f32 %v2447_v6, %v5546_v12 }
0x1dd5   :  { %v2506_v33 = vsel %vm1784_vm5, %v2498_v7, 0.0  ;;  %v2505_v34 = vsel %vm1784_vm5, %v2497_v9, 0.0 }
0x1dd6   :  { %v2507_v40 = vadd.f32 %v2506_v33, %v2505_v34  ;;  %v2475_v43 = vpop.permute.xlu0 %2474  ;;  %v2461_v58 = vpop.permute.xlu1 %2460 }
0x1dd7   :  { %v2499_v20 = vmul.f32 %v2461_v58, %v5550_v14  ;;  %v2501_v42 = vmul.f32 %v2475_v43, %v5554_v21 }
0x1dd9   :  { %v2508_v22 = vsel %vm1784_vm5, %v2499_v20, 0.0  ;;  %v2512_v36 = vsel %vm1784_vm5, %v2501_v42, 0.0 }
0x1dda   :  { %v2509_v41 = vadd.f32 %v2508_v22, %v2507_v40  ;;  %v2468_v48 = vpop.permute.xlu1 %2467  ;;  %v2489_v44 = vpop.permute.xlu0 %2488 }
0x1ddb   :  { %v2500_v23 = vmul.f32 %v5548_v13, %v2468_v48  ;;  %v2503_v57 = vmul.f32 %v2489_v44, %v5558_v18 }
0x1ddd   :  { %v2510_v63 = vsel %vm1784_vm5, %v2500_v23, 0.0  ;;  %v2516_v49 = vsel %vm1784_vm5, %v2503_v57, 0.0 }
0x1dde   :  { %v2511_v30 = vadd.f32 %v2510_v63, %v2509_v41  ;;  %v2482_v32 = vpop.permute.xlu1 %2481 }
0x1ddf   :  { %v2502_v45 = vmul.f32 %v5552_v15, %v2482_v32 }
0x1de0   :  { %v2513_v37 = vadd.f32 %v2512_v36, %v2511_v30 }
0x1de1   :  { %v2514_v46 = vsel %vm1784_vm5, %v2502_v45, 0.0 }
0x1de2   :  { %v2515_v16 = vadd.f32 %v2514_v46, %v2513_v37  ;;  %v2496_v38 = vpop.permute.xlu1 %2495 }
0x1de3   :  { %v2504_v50 = vmul.f32 %v5556_v25, %v2496_v38 }
0x1de4   :  { %v2517_v0 = vadd.f32 %v2516_v49, %v2515_v16 }
0x1de5   :  { %v2518_v2 = vsel %vm1784_vm5, %v2504_v50, 0.0 }
0x1de6   :  { %v2519_v4 = vadd.f32 %v2518_v2, %v2517_v0  ;;  %v2598_v33 = vpop.permute.xlu1 %2597 }
0x1de8   :  { %2521 = vrot.lane.b32.xlu0 %v2519_v4, %s4927_s2 }
0x1e5a   :  { %v2522_v6 = vpop.permute.xlu0 %2521 }
0x1e5b   :  { %v2593_v7 = vadd.f32 %v2592_v52, %v2522_v6 }
0x1e5d   :  { %4860 = vtanh.f32 %v2593_v7 }
0x1e67   :  { %v5906_v9 = vpop.eup %4860 }
0x1e68   :  { %v2600_v34 = vsel %vm1215_vm6, %v5906_v9, %v2598_v33 }
0x1e69   :  { %4334 = vmatmul.mubr.msk.f32.vlgmr.msra.gmra.mrb[28].mxu1 %vm89_vm0, %v2600_v34 }
0x1e6a   :  { %4676 = vmatpush3.bf16.msra.mxu1 %v5591_v51  ;;  %4344 = vmatprep.mubr.msk.f32.mxu1 %vm4925_vm10, %v4922_v3 }
0x1e6b   :  { %4677 = vmatprep.subr.bf16.mxu1 %v4924_v17 }
0x1e6e   :  { %4679 = vmatpush3.bf16.msra.mxu1 %v5597_v55 }
0x1e6f   :  { %4680 = vmatprep.subr.bf16.mxu1 %v4924_v17 }
0x1f3c   :  { %v2670_v52 = vpop.f32.mrb[28].mxu1 }
0x1f3d   :  { %v2674_v40 = vadd.f32 %v2670_v52, %v5569_v47  ;;  %v4335_v43 = vpop.f32.mrb[29].mxu1 }
0x1f3f   :  { %4862 = vtanh.f32 %v2674_v40  ;;  %v2675_v20 = vmul.f32 0.5, %v2674_v40 }
0x1f41   :  { %4864 = vtanh.f32 %v2675_v20 }
0x1f49   :  { %v4863_v58 = vpop.eup %4862 }
0x1f4a   :  { %2682 = vrot.lane.b32.xlu0 %v4863_v58, %s4923_s7 }
0x1f4b   :  { %v4865_v22 = vpop.eup %4864 }
0x1f4c   :  { %v2677_v41 = vadd.f32 1.0, %v4865_v22 }
0x1f4e   :  { %v2678_v48 = vmul.f32 0.5, %v2677_v41 }
0x1f50   :  { %v2680_v44 = vmul.f32 %v2678_v48, %v5825_v35 }
0x1fbc   :  { %v2683_v42 = vpop.permute.xlu0 %2682 }
0x1fbd   :  { %v2685_v23 = vmul.f32 %v2683_v42, %v2678_v48 }
0x1fbf   :  { %2687 = vrot.lane.b32.xlu1 %v2685_v23, %s4926_s3 }
0x2031   :  { %v2688_v63 = vpop.permute.xlu1 %2687 }
0x2032   :  { %v5921_v30 = vadd.f32 %v2688_v63, %v2680_v44 }
0x2034   :  { %4866 = vtanh.f32 %v5921_v30 }
0x203e   :  { %v4867_v47 = vpop.eup %4866 }
0x203f   :  { %2693 = vrot.lane.b32.xlu0 %v4867_v47, %s4923_s7 }
0x20b1   :  { %v2694_v32 = vpop.permute.xlu0 %2693 }
0x20b2   :  { %v5925_v36 = vmul.f32 %v2694_v32, %v2678_v48 }
0x20b4   :  { %2698 = vrot.lane.b32.xlu1 %v5925_v36, %s4926_s3 }
0x2126   :  { %v2699_v57 = vpop.permute.xlu1 %2698 }
0x2127   :  { %4345 = vmatmul.mubr.msk.f32.vlgmr.msra.gmra.mrb[30].mxu1 %vm1215_vm6, %v2699_v57  ;;  %v2702_v45 = vmul.f32 %v5544_v11, %v2699_v57  ;;  %v2701_v35 = vmul.f32 %v2699_v57, %v5546_v12  ;;  %v2705_v16 = vmul.f32 %v2699_v57, %v5554_v21  ;;  %v2703_v38 = vmul.f32 %v2699_v57, %v5550_v14 }
0x2128   :  { %4682 = vmatpush3.bf16.msra.mxu1 %v5487_v53  ;;  %4363 = vmatprep.mubr.msk.f32.mxu1 %vm4925_vm10, %v4922_v3  ;;  %v2707_v0 = vmul.f32 %v2699_v57, %v5558_v18  ;;  %v2704_v2 = vmul.f32 %v5548_v13, %v2699_v57  ;;  %v2706_v7 = vmul.f32 %v5552_v15, %v2699_v57 }
0x2129   :  { %v2712_v37 = vsel %vm1215_vm6, %v2702_v45, 0.0  ;;  %v2709_v46 = vsel %vm1215_vm6, %v2701_v35, 0.0  ;;  %4683 = vmatprep.subr.bf16.mxu1 %v4924_v17  ;;  %v2721_v49 = vsel %vm1215_vm6, %v2705_v16, 0.0  ;;  %v2715_v50 = vsel %vm1215_vm6, %v2703_v38, 0.0 }
0x212a   :  { %2713 = vadd.xlane.f32.xlu1 %v2712_v37  ;;  %2710 = vadd.xlane.f32.xlu0 %v2709_v46  ;;  %v2727_v4 = vsel %vm1215_vm6, %v2707_v0, 0.0  ;;  %v2718_v6 = vsel %vm1215_vm6, %v2704_v2, 0.0  ;;  %v2724_v33 = vsel %vm1215_vm6, %v2706_v7, 0.0  ;;  %v2708_v34 = vmul.f32 %v5556_v25, %v2699_v57 }
0x212c   :  { %4685 = vmatpush3.bf16.msra.mxu1 %v5501_v27  ;;  %v2730_v52 = vsel %vm1215_vm6, %v2708_v34, 0.0 }
0x212d   :  { %4686 = vmatprep.subr.bf16.mxu1 %v4924_v17 }
0x212e   :  { %2722 = vadd.xlane.f32.xlu1 %v2721_v49  ;;  %2716 = vadd.xlane.f32.xlu0 %v2715_v50 }
0x2130   :  { %4688 = vmatpush3.bf16.msra.mxu1 %v5519_v1 }
0x2131   :  { %4689 = vmatprep.subr.bf16.mxu1 %v4924_v17 }
0x2132   :  { %2728 = vadd.xlane.f32.xlu1 %v2727_v4  ;;  %2719 = vadd.xlane.f32.xlu0 %v2718_v6 }
0x2134   :  { %4691 = vmatpush3.bf16.msra.mxu1 %v5534_v8 }
0x2135   :  { %4692 = vmatprep.subr.bf16.mxu1 %v4924_v17 }
0x2136   :  { %2725 = vadd.xlane.f32.xlu0 %v2724_v33 }
0x213a   :  { %2731 = vadd.xlane.f32.xlu0 %v2730_v52 }
0x21b7   :  { %v2711_v40 = vpop.xlane.xlu0 %2710  ;;  %v2714_v43 = vpop.xlane.xlu1 %2713 }
0x21b8   :  { %v2748_v20 = vrot.slane %v2714_v43, %v5642_v31  ;;  %v2744_v22 = vrot.slane %v2711_v40, %v5642_v31 }
0x21ba   :  { %v2773_v23 = vsel %vm1684_vm11, %v2748_v20, %v2744_v22 }
0x21bb   :  { %v2717_v58 = vpop.xlane.xlu0 %2716  ;;  %v2723_v48 = vpop.xlane.xlu1 %2722 }
0x21bc   :  { %v2752_v41 = vrot.slane %v2717_v58, %v5642_v31  ;;  %v2760_v32 = vrot.slane %v2723_v48, %v5642_v31 }
0x21be   :  { %v2774_v63 = vsel %vm1686_vm12, %v2752_v41, %v2773_v23 }
0x21bf   :  { %v2720_v42 = vpop.xlane.xlu0 %2719  ;;  %v2729_v45 = vpop.xlane.xlu1 %2728 }
0x21c0   :  { %v2756_v44 = vrot.slane %v2720_v42, %v5642_v31  ;;  %v2768_v16 = vrot.slane %v2729_v45, %v5642_v31 }
0x21c2   :  { %v2775_v47 = vsel %vm1688_vm13, %v2756_v44, %v2774_v63 }
0x21c3   :  { %v2726_v57 = vpop.xlane.xlu0 %2725  ;;  %v2776_v37 = vsel %vm1690_vm14, %v2760_v32, %v2775_v47 }
0x21c4   :  { %v2764_v35 = vrot.slane %v2726_v57, %v5642_v31 }
0x21c6   :  { %v2777_v46 = vsel %vm1692_vm15, %v2764_v35, %v2776_v37 }
0x21c7   :  { %v2732_v38 = vpop.xlane.xlu0 %2731  ;;  %v2778_v50 = vsel %vm1694_vm1, %v2768_v16, %v2777_v46 }
0x21c8   :  { %v2772_v49 = vrot.slane %v2732_v38, %v5642_v31 }
0x21ca   :  { %v2779_v0 = vsel %vm1696_vm2, %v2772_v49, %v2778_v50 }
0x21cb   :  { %v2781_v2 = vsel %vm1362_vm3, -1e+30, %v2779_v0 }
0x21cc   :  { %v2782_v4 = vsel %vm1700_vm4, %v2781_v2, -inf }
0x21cd   :  { %v2783_v6 = vrot.slane %v2782_v4, 4 }
0x21cf   :  { %v2784_v7 = vmax.f32 %v2782_v4, %v2783_v6 }
0x21d1   :  { %v2785_v33 = vrot.slane %v2784_v7, 2 }
0x21d3   :  { %v2786_v34 = vmax.f32 %v2784_v7, %v2785_v33 }
0x21d5   :  { %v2787_v52 = vrot.slane %v2786_v34, 1 }
0x21d7   :  { %v2788_v40 = vmax.f32 %v2786_v34, %v2787_v52 }
0x21d9   :  { %v2789_v43 = vsub.f32 %v2781_v2, %v2788_v40 }
0x21db   :  { %v2790_v58 = vmul.f32 1.442695, %v2789_v43 }
0x21dd   :  { %4868 = vpow2.f32 %v2790_v58 }
0x21e7   :  { %v4869_v20 = vpop.eup %4868 }
0x21e8   :  { %v2792_v22 = vsel %vm1700_vm4, %v4869_v20, 0.0 }
0x21e9   :  { %v2793_v41 = vrot.slane %v2792_v22, 4 }
0x21eb   :  { %v2794_v48 = vadd.f32 %v2793_v41, %v2792_v22 }
0x21ed   :  { %v2795_v42 = vrot.slane %v2794_v48, 2 }
0x21ef   :  { %v2796_v23 = vadd.f32 %v2795_v42, %v2794_v48 }
0x21f1   :  { %v2797_v44 = vrot.slane %v2796_v23, 1 }
0x21f3   :  { %v2798_v63 = vadd.f32 %v2797_v44, %v2796_v23 }
0x21f5   :  { %4870 = vrcp.f32 %v2798_v63 }
0x21fa   :  { %v2952_v47 = vpop.f32.mrb[30].mxu1 }
0x21fb   :  { %v4346_v32 = vpop.f32.mrb[31].mxu1 }
0x21ff   :  { %v4871_v57 = vpop.eup %4870 }
0x2200   :  { %v2800_v45 = vmul.f32 %v4871_v57, %v4869_v20 }
0x2202   :  { %v2811_v35 = vrot.slane %v2800_v45, %v5198_v62  ;;  %v2804_v37 = vrot.slane %v2800_v45, %v5189_v59  ;;  %v2832_v46 = vrot.slane %v2800_v45, %v5672_v39  ;;  %v2818_v16 = vrot.slane %v2800_v45, %v5675_v24 }
0x2203   :  { %v2846_v38 = vrot.slane %v2800_v45, %v5680_v54  ;;  %v2825_v49 = vrot.slane %v2800_v45, %v5683_v60  ;;  %v2839_v50 = vrot.slane %v2800_v45, %v5688_v61  ;;  %v2853_v0 = vrot.slane %v2800_v45, %v5692_v5 }
0x2204   :  { %2813 = vbcast.lane.b32.xlu0 %v2811_v35, 256  ;;  %2806 = vbcast.lane.b32.xlu1 %v2804_v37, 256 }
0x2208   :  { %2834 = vbcast.lane.b32.xlu0 %v2832_v46, 256  ;;  %2820 = vbcast.lane.b32.xlu1 %v2818_v16, 256 }
0x220c   :  { %2848 = vbcast.lane.b32.xlu0 %v2846_v38, 256  ;;  %2827 = vbcast.lane.b32.xlu1 %v2825_v49, 256 }
0x2210   :  { %2841 = vbcast.lane.b32.xlu1 %v2839_v50, 256 }
0x2214   :  { %2855 = vbcast.lane.b32.xlu1 %v2853_v0, 256 }
0x2218   :  { %2957 = vrot.lane.b32.xlu1 %v5925_v36, %s4923_s7 }
0x2276   :  { %v2814_v2 = vpop.permute.xlu0 %2813  ;;  %v2807_v4 = vpop.permute.xlu1 %2806 }
0x2277   :  { %v2858_v6 = vmul.f32 %v5544_v11, %v2814_v2  ;;  %v2857_v7 = vmul.f32 %v2807_v4, %v5546_v12 }
0x2279   :  { %v2866_v33 = vsel %vm1784_vm5, %v2858_v6, 0.0  ;;  %v2865_v34 = vsel %vm1784_vm5, %v2857_v7, 0.0 }
0x227a   :  { %v2867_v52 = vadd.f32 %v2866_v33, %v2865_v34  ;;  %v2835_v40 = vpop.permute.xlu0 %2834  ;;  %v2821_v43 = vpop.permute.xlu1 %2820 }
0x227b   :  { %v2859_v58 = vmul.f32 %v2821_v43, %v5550_v14  ;;  %v2861_v36 = vmul.f32 %v2835_v40, %v5554_v21 }
0x227d   :  { %v2868_v20 = vsel %vm1784_vm5, %v2859_v58, 0.0  ;;  %v2872_v32 = vsel %vm1784_vm5, %v2861_v36, 0.0 }
0x227e   :  { %v2869_v22 = vadd.f32 %v2868_v20, %v2867_v52  ;;  %v2828_v41 = vpop.permute.xlu1 %2827  ;;  %v2849_v42 = vpop.permute.xlu0 %2848 }
0x227f   :  { %v2860_v48 = vmul.f32 %v5548_v13, %v2828_v41  ;;  %v2863_v57 = vmul.f32 %v2849_v42, %v5558_v18 }
0x2281   :  { %v2870_v23 = vsel %vm1784_vm5, %v2860_v48, 0.0  ;;  %v2876_v38 = vsel %vm1784_vm5, %v2863_v57, 0.0 }
0x2282   :  { %v2871_v44 = vadd.f32 %v2870_v23, %v2869_v22  ;;  %v2842_v63 = vpop.permute.xlu1 %2841 }
0x2283   :  { %v2862_v45 = vmul.f32 %v5552_v15, %v2842_v63 }
0x2284   :  { %v2873_v35 = vadd.f32 %v2872_v32, %v2871_v44 }
0x2285   :  { %v2874_v37 = vsel %vm1784_vm5, %v2862_v45, 0.0 }
0x2286   :  { %v2875_v46 = vadd.f32 %v2874_v37, %v2873_v35  ;;  %v2856_v16 = vpop.permute.xlu1 %2855 }
0x2287   :  { %v2864_v49 = vmul.f32 %v5556_v25, %v2856_v16 }
0x2288   :  { %v2877_v50 = vadd.f32 %v2876_v38, %v2875_v46 }
0x2289   :  { %v2878_v0 = vsel %vm1784_vm5, %v2864_v49, 0.0 }
0x228a   :  { %v2879_v2 = vadd.f32 %v2878_v0, %v2877_v50  ;;  %v2958_v33 = vpop.permute.xlu1 %2957 }
0x228c   :  { %2881 = vrot.lane.b32.xlu0 %v2879_v2, %s4927_s2 }
0x22fe   :  { %v2882_v4 = vpop.permute.xlu0 %2881 }
0x22ff   :  { %v2953_v6 = vadd.f32 %v2952_v47, %v2882_v4 }
0x2301   :  { %4872 = vtanh.f32 %v2953_v6 }
0x230b   :  { %v6002_v7 = vpop.eup %4872 }
0x230c   :  { %v2960_v34 = vsel %vm1215_vm6, %v6002_v7, %v2958_v33 }
0x230d   :  { %4364 = vmatmul.mubr.msk.f32.vlgmr.msra.gmra.mrb[32].mxu1 %vm89_vm0, %v2960_v34 }
0x230e   :  { %4694 = vmatpush3.bf16.msra.mxu1 %v5591_v51  ;;  %4374 = vmatprep.mubr.msk.f32.mxu1 %vm4925_vm10, %v4922_v3 }
0x230f   :  { %4695 = vmatprep.subr.bf16.mxu1 %v4924_v17 }
0x2312   :  { %4697 = vmatpush3.bf16.msra.mxu1 %v5597_v55 }
0x2313   :  { %4698 = vmatprep.subr.bf16.mxu1 %v4924_v17 }
0x23e0   :  { %v3030_v47 = vpop.f32.mrb[32].mxu1 }
0x23e1   :  { %v3034_v52 = vadd.f32 %v3030_v47, %v5575_v29  ;;  %v4365_v40 = vpop.f32.mrb[33].mxu1 }
0x23e3   :  { %4874 = vtanh.f32 %v3034_v52  ;;  %v3035_v58 = vmul.f32 0.5, %v3034_v52 }
0x23e5   :  { %4876 = vtanh.f32 %v3035_v58 }
0x23ed   :  { %v4875_v43 = vpop.eup %4874 }
0x23ee   :  { %3042 = vrot.lane.b32.xlu0 %v4875_v43, %s4923_s7 }
0x23ef   :  { %v4877_v51 = vpop.eup %4876 }
0x23f0   :  { %v3037_v20 = vadd.f32 1.0, %v4877_v51 }
0x23f2   :  { %v3038_v22 = vmul.f32 0.5, %v3037_v20 }
0x23f4   :  { %v3040_v55 = vmul.f32 %v3038_v22, %v5921_v30 }
0x2460   :  { %v3043_v41 = vpop.permute.xlu0 %3042 }
0x2461   :  { %v3045_v36 = vmul.f32 %v3043_v41, %v3038_v22 }
0x2463   :  { %3047 = vrot.lane.b32.xlu1 %v3045_v36, %s4926_s3 }
0x24d5   :  { %v3048_v48 = vpop.permute.xlu1 %3047 }
0x24d6   :  { %v6017_v42 = vadd.f32 %v3048_v48, %v3040_v55 }
0x24d8   :  { %4878 = vtanh.f32 %v6017_v42 }
0x24e2   :  { %v4879_v29 = vpop.eup %4878 }
0x24e3   :  { %3053 = vrot.lane.b32.xlu0 %v4879_v29, %s4923_s7 }
0x2555   :  { %v3054_v23 = vpop.permute.xlu0 %3053 }
0x2556   :  { %v6021_v44 = vmul.f32 %v3054_v23, %v3038_v22 }
0x2558   :  { %3058 = vrot.lane.b32.xlu1 %v6021_v44, %s4926_s3 }
0x25ca   :  { %v3059_v63 = vpop.permute.xlu1 %3058 }
0x25cb   :  { %4375 = vmatmul.mubr.msk.f32.vlgmr.msra.gmra.mrb[34].mxu1 %vm1215_vm6, %v3059_v63  ;;  %v3062_v32 = vmul.f32 %v5544_v11, %v3059_v63  ;;  %v3061_v30 = vmul.f32 %v3059_v63, %v5546_v12  ;;  %v3065_v35 = vmul.f32 %v3059_v63, %v5554_v21  ;;  %v3063_v37 = vmul.f32 %v3059_v63, %v5550_v14 }
0x25cc   :  { %4700 = vmatpush3.bf16.msra.mxu1 %v5487_v53  ;;  %4393 = vmatprep.mubr.msk.f32.mxu1 %vm4925_vm10, %v4922_v3  ;;  %v3067_v16 = vmul.f32 %v3059_v63, %v5558_v18  ;;  %v3064_v38 = vmul.f32 %v5548_v13, %v3059_v63  ;;  %v3068_v0 = vmul.f32 %v5556_v25, %v3059_v63 }
0x25cd   :  { %v3072_v57 = vsel %vm1215_vm6, %v3062_v32, 0.0  ;;  %v3069_v45 = vsel %vm1215_vm6, %v3061_v30, 0.0  ;;  %4701 = vmatprep.subr.bf16.mxu1 %v4924_v17  ;;  %v3081_v46 = vsel %vm1215_vm6, %v3065_v35, 0.0  ;;  %v3075_v53 = vsel %vm1215_vm6, %v3063_v37, 0.0 }
0x25ce   :  { %3073 = vadd.xlane.f32.xlu1 %v3072_v57  ;;  %3070 = vadd.xlane.f32.xlu0 %v3069_v45  ;;  %v3087_v3 = vsel %vm1215_vm6, %v3067_v16, 0.0  ;;  %v3078_v49 = vsel %vm1215_vm6, %v3064_v38, 0.0  ;;  %v3090_v2 = vsel %vm1215_vm6, %v3068_v0, 0.0 }
0x25d0   :  { %4703 = vmatpush3.bf16.msra.mxu1 %v5501_v27  ;;  %v3066_v27 = vmul.f32 %v5552_v15, %v3059_v63 }
0x25d1   :  { %4704 = vmatprep.subr.bf16.mxu1 %v4924_v17 }
0x25d2   :  { %3082 = vadd.xlane.f32.xlu1 %v3081_v46  ;;  %3076 = vadd.xlane.f32.xlu0 %v3075_v53  ;;  %v3084_v50 = vsel %vm1215_vm6, %v3066_v27, 0.0 }
0x25d4   :  { %4706 = vmatpush3.bf16.msra.mxu1 %v5519_v1 }
0x25d5   :  { %4707 = vmatprep.subr.bf16.mxu1 %v4924_v17 }
0x25d6   :  { %3088 = vadd.xlane.f32.xlu1 %v3087_v3  ;;  %3079 = vadd.xlane.f32.xlu0 %v3078_v49 }
0x25d8   :  { %4709 = vmatpush3.bf16.msra.mxu1 %v5534_v8 }
0x25da   :  { %3085 = vadd.xlane.f32.xlu0 %v3084_v50 }
0x25de   :  { %3091 = vadd.xlane.f32.xlu0 %v3090_v2 }
0x265b   :  { %v3071_v1 = vpop.xlane.xlu0 %3070  ;;  %v3074_v4 = vpop.xlane.xlu1 %3073 }
0x265c   :  { %v3108_v33 = vrot.slane %v3074_v4, %v5642_v31  ;;  %v3104_v34 = vrot.slane %v3071_v1, %v5642_v31 }
0x265e   :  { %v3133_v8 = vsel %vm1684_vm11, %v3108_v33, %v3104_v34 }
0x265f   :  { %v3077_v6 = vpop.xlane.xlu0 %3076  ;;  %v3083_v47 = vpop.xlane.xlu1 %3082 }
0x2660   :  { %v3112_v17 = vrot.slane %v3077_v6, %v5642_v31  ;;  %v3120_v51 = vrot.slane %v3083_v47, %v5642_v31 }
0x2662   :  { %v3134_v43 = vsel %vm1686_vm12, %v3112_v17, %v3133_v8 }
0x2663   :  { %v3080_v52 = vpop.xlane.xlu0 %3079  ;;  %v3089_v22 = vpop.xlane.xlu1 %3088 }
0x2664   :  { %v3116_v40 = vrot.slane %v3080_v52, %v5642_v31  ;;  %v3128_v48 = vrot.slane %v3089_v22, %v5642_v31 }
0x2666   :  { %v3135_v58 = vsel %vm1688_vm13, %v3116_v40, %v3134_v43 }
0x2667   :  { %v3086_v20 = vpop.xlane.xlu0 %3085  ;;  %v3136_v36 = vsel %vm1690_vm14, %v3120_v51, %v3135_v58 }
0x2668   :  { %v3124_v41 = vrot.slane %v3086_v20, %v5642_v31 }
0x266a   :  { %v3137_v55 = vsel %vm1692_vm15, %v3124_v41, %v3136_v36 }
0x266b   :  { %v3092_v29 = vpop.xlane.xlu0 %3091  ;;  %v3138_v63 = vsel %vm1694_vm1, %v3128_v48, %v3137_v55 }
0x266c   :  { %v3132_v23 = vrot.slane %v3092_v29, %v5642_v31 }
0x266e   :  { %v3139_v32 = vsel %vm1696_vm2, %v3132_v23, %v3138_v63 }
0x266f   :  { %v3141_v30 = vsel %vm1362_vm3, -1e+30, %v3139_v32 }
0x2670   :  { %v3142_v57 = vsel %vm1700_vm4, %v3141_v30, -inf }
0x2671   :  { %v3143_v45 = vrot.slane %v3142_v57, 4 }
0x2673   :  { %v3144_v35 = vmax.f32 %v3142_v57, %v3143_v45 }
0x2675   :  { %v3145_v37 = vrot.slane %v3144_v35, 2 }
0x2677   :  { %v3146_v46 = vmax.f32 %v3144_v35, %v3145_v37 }
0x2679   :  { %v3147_v53 = vrot.slane %v3146_v46, 1 }
0x267b   :  { %v3148_v16 = vmax.f32 %v3146_v46, %v3147_v53 }
0x267d   :  { %v3149_v38 = vsub.f32 %v3141_v30, %v3148_v16 }
0x267f   :  { %v3150_v3 = vmul.f32 1.442695, %v3149_v38 }
0x2681   :  { %4880 = vpow2.f32 %v3150_v3 }
0x268b   :  { %v4881_v49 = vpop.eup %4880 }
0x268c   :  { %v3152_v27 = vsel %vm1700_vm4, %v4881_v49, 0.0 }
0x268d   :  { %v3153_v50 = vrot.slane %v3152_v27, 4 }
0x268f   :  { %v3154_v0 = vadd.f32 %v3153_v50, %v3152_v27 }
0x2691   :  { %v3155_v2 = vrot.slane %v3154_v0, 2 }
0x2693   :  { %v3156_v1 = vadd.f32 %v3155_v2, %v3154_v0 }
0x2695   :  { %v3157_v4 = vrot.slane %v3156_v1, 1 }
0x2697   :  { %v3158_v6 = vadd.f32 %v3157_v4, %v3156_v1 }
0x2699   :  { %4882 = vrcp.f32 %v3158_v6 }
0x269e   :  { %v3312_v33 = vpop.f32.mrb[34].mxu1 }
0x269f   :  { %v4376_v34 = vpop.f32.mrb[35].mxu1 }
0x26a3   :  { %v4883_v17 = vpop.eup %4882 }
0x26a4   :  { %v3160_v47 = vmul.f32 %v4883_v17, %v4881_v49 }
0x26a6   :  { %v3171_v52 = vrot.slane %v3160_v47, %v5198_v62  ;;  %v3164_v8 = vrot.slane %v3160_v47, %v5189_v59  ;;  %v3192_v40 = vrot.slane %v3160_v47, %v5672_v39  ;;  %v3178_v43 = vrot.slane %v3160_v47, %v5675_v24 }
0x26a7   :  { %v3206_v58 = vrot.slane %v3160_v47, %v5680_v54  ;;  %v3185_v51 = vrot.slane %v3160_v47, %v5683_v60  ;;  %v3199_v20 = vrot.slane %v3160_v47, %v5688_v61  ;;  %v3213_v22 = vrot.slane %v3160_v47, %v5692_v5 }
0x26a8   :  { %3173 = vbcast.lane.b32.xlu0 %v3171_v52, 256  ;;  %3166 = vbcast.lane.b32.xlu1 %v3164_v8, 256 }
0x26ac   :  { %3194 = vbcast.lane.b32.xlu0 %v3192_v40, 256  ;;  %3180 = vbcast.lane.b32.xlu1 %v3178_v43, 256 }
0x26b0   :  { %3208 = vbcast.lane.b32.xlu0 %v3206_v58, 256  ;;  %3187 = vbcast.lane.b32.xlu1 %v3185_v51, 256 }
0x26b4   :  { %3201 = vbcast.lane.b32.xlu1 %v3199_v20, 256 }
0x26b8   :  { %3215 = vbcast.lane.b32.xlu1 %v3213_v22, 256 }
0x26bc   :  { %3317 = vrot.lane.b32.xlu1 %v6021_v44, %s4923_s7 }
0x271a   :  { %v3174_v41 = vpop.permute.xlu0 %3173  ;;  %v3167_v36 = vpop.permute.xlu1 %3166 }
0x271b   :  { %v3218_v55 = vmul.f32 %v5544_v11, %v3174_v41  ;;  %v3217_v48 = vmul.f32 %v3167_v36, %v5546_v12 }
0x271d   :  { %v3226_v29 = vsel %vm1784_vm5, %v3218_v55, 0.0  ;;  %v3225_v23 = vsel %vm1784_vm5, %v3217_v48, 0.0 }
0x271e   :  { %v3227_v63 = vadd.f32 %v3226_v29, %v3225_v23  ;;  %v3195_v32 = vpop.permute.xlu0 %3194  ;;  %v3181_v30 = vpop.permute.xlu1 %3180 }
0x271f   :  { %v3219_v57 = vmul.f32 %v3181_v30, %v5550_v14  ;;  %v3221_v44 = vmul.f32 %v3195_v32, %v5554_v21 }
0x2721   :  { %v3228_v45 = vsel %vm1784_vm5, %v3219_v57, 0.0  ;;  %v3232_v49 = vsel %vm1784_vm5, %v3221_v44, 0.0 }
0x2722   :  { %v3229_v35 = vadd.f32 %v3228_v45, %v3227_v63  ;;  %v3188_v37 = vpop.permute.xlu1 %3187  ;;  %v3209_v53 = vpop.permute.xlu0 %3208  ;;  %v3678_v45 = vld [vmem:[%s6302_s15 + $0x8] sm:$0xff] }
0x2723   :  { %v3220_v46 = vmul.f32 %v5548_v13, %v3188_v37  ;;  %v3223_v27 = vmul.f32 %v3209_v53, %v5558_v18  ;;  %v3680_v53 = vld [vmem:[%s6302_s15 + $0x18] sm:$0xff] }
0x2725   :  { %v3230_v16 = vsel %vm1784_vm5, %v3220_v46, 0.0  ;;  %v3236_v6 = vsel %vm1784_vm5, %v3223_v27, 0.0 }
0x2726   :  { %v3231_v38 = vadd.f32 %v3230_v16, %v3229_v35  ;;  %v3202_v3 = vpop.permute.xlu1 %3201 }
0x2727   :  { %v3222_v50 = vmul.f32 %v5552_v15, %v3202_v3 }
0x2728   :  { %v3233_v0 = vadd.f32 %v3232_v49, %v3231_v38 }
0x2729   :  { %v3234_v2 = vsel %vm1784_vm5, %v3222_v50, 0.0 }
0x272a   :  { %v3235_v1 = vadd.f32 %v3234_v2, %v3233_v0  ;;  %v3216_v4 = vpop.permute.xlu1 %3215 }
0x272b   :  { %v3224_v34 = vmul.f32 %v5556_v25, %v3216_v4 }
0x272c   :  { %v3237_v17 = vadd.f32 %v3236_v6, %v3235_v1 }
0x272d   :  { %v3238_v47 = vsel %vm1784_vm5, %v3224_v34, 0.0 }
0x272e   :  { %v3239_v52 = vadd.f32 %v3238_v47, %v3237_v17  ;;  %v3318_v58 = vpop.permute.xlu1 %3317 }
0x2730   :  { %3241 = vrot.lane.b32.xlu0 %v3239_v52, %s4927_s2 }
0x27a2   :  { %v3242_v8 = vpop.permute.xlu0 %3241 }
0x27a3   :  { %v3313_v40 = vadd.f32 %v3312_v33, %v3242_v8 }
0x27a5   :  { %4884 = vtanh.f32 %v3313_v40 }
0x27af   :  { %v6097_v43 = vpop.eup %4884 }
0x27b0   :  { %v3320_v51 = vsel %vm1215_vm6, %v6097_v43, %v3318_v58 }
0x27b1   :  { %4394 = vmatmul.mubr.msk.f32.vlgmr.msra.gmra.mrb[36].mxu1 %vm89_vm0, %v3320_v51  ;;  %vm3794_vm0 = vcmp.lt.s32.totalorder %v5638_v28, 64 }
0x2884   :  { %v3390_v20 = vpop.f32.mrb[36].mxu1 }
0x2885   :  { %v3394_v22 = vadd.f32 %v3390_v20, %v5573_v26  ;;  %v4395_v41 = vpop.f32.mrb[37].mxu1  ;;  %v3677_v26 = vld [vmem:[%s6302_s15] sm:$0xff] }
0x2886   :  { %v4716_v35 = vpack.c.bf16 %v3678_v45, %v3677_v26 }
0x2887   :  { %4886 = vtanh.f32 %v3394_v22  ;;  %v3395_v55 = vmul.f32 0.5, %v3394_v22 }
0x2888   :  { %4717 = vmatprep.subr.bf16.mxu0 %v4716_v35 }
0x2889   :  { %4888 = vtanh.f32 %v3395_v55 }
0x2891   :  { %v4887_v36 = vpop.eup %4886 }
0x2892   :  { %3402 = vrot.lane.b32.xlu0 %v4887_v36, %s4923_s7 }
0x2893   :  { %v4889_v33 = vpop.eup %4888 }
0x2894   :  { %v3397_v48 = vadd.f32 1.0, %v4889_v33 }
0x2896   :  { %v3398_v29 = vmul.f32 0.5, %v3397_v48 }
0x2898   :  { %v3400_v32 = vmul.f32 %v3398_v29, %v6017_v42  ;;  %v3679_v42 = vld [vmem:[%s6302_s15 + $0x10] sm:$0xff] }
0x2899   :  { %v4720_v16 = vpack.c.bf16 %v3680_v53, %v3679_v42 }
0x2904   :  { %v3403_v23 = vpop.permute.xlu0 %3402 }
0x2905   :  { %v3405_v63 = vmul.f32 %v3403_v23, %v3398_v29 }
0x2907   :  { %3407 = vrot.lane.b32.xlu1 %v3405_v63, %s4926_s3 }
0x2979   :  { %v3408_v30 = vpop.permute.xlu1 %3407 }
0x297a   :  { %v3410_v57 = vadd.f32 %v3408_v30, %v3400_v32 }
0x297c   :  { %4890 = vtanh.f32 %v3410_v57 }
0x2986   :  { %v4891_v37 = vpop.eup %4890 }
0x2987   :  { %3413 = vrot.lane.b32.xlu0 %v4891_v37, %s4923_s7 }
0x29f9   :  { %v3414_v44 = vpop.permute.xlu0 %3413 }
0x29fa   :  { %v3416_v46 = vmul.f32 %v3414_v44, %v3398_v29 }
0x29fc   :  { %3418 = vrot.lane.b32.xlu1 %v3416_v46, %s4926_s3 }
0x2a6e   :  { %v3419_v38 = vpop.permute.xlu1 %3418 }
0x2a6f   :  { %4405 = vmatmul.mubr.msk.f32.vlgmr.msra.gmra.mrb[16].mxu0 %vm1215_vm6, %v3419_v38  ;;  %v3422_v3 = vmul.f32 %v5544_v11, %v3419_v38  ;;  %v3421_v49 = vmul.f32 %v3419_v38, %v5546_v12  ;;  %v3425_v0 = vmul.f32 %v3419_v38, %v5554_v21  ;;  %v3423_v2 = vmul.f32 %v3419_v38, %v5550_v14 }
0x2a70   :  { %4719 = vmatpush3.bf16.msra.mxu0 %v4716_v35  ;;  %4415 = vmatprep.mubr.msk.f32.mxu0 %vm1215_vm6, %v5714_v19  ;;  %v3427_v6 = vmul.f32 %v3419_v38, %v5558_v18  ;;  %v3424_v19 = vmul.f32 %v5548_v13, %v3419_v38  ;;  %v3426_v47 = vmul.f32 %v5552_v15, %v3419_v38 }
0x2a71   :  { %v3432_v27 = vsel %vm1215_vm6, %v3422_v3, 0.0  ;;  %4721 = vmatprep.subr.bf16.mxu0 %v4720_v16  ;;  %v3429_v50 = vsel %vm1215_vm6, %v3421_v49, 0.0  ;;  %v3441_v1 = vsel %vm1215_vm6, %v3425_v0, 0.0  ;;  %v3435_v4 = vsel %vm1215_vm6, %v3423_v2, 0.0 }
0x2a72   :  { %3433 = vadd.xlane.f32.xlu1 %v3432_v27  ;;  %3430 = vadd.xlane.f32.xlu0 %v3429_v50  ;;  %v3447_v34 = vsel %vm1215_vm6, %v3427_v6, 0.0  ;;  %v3438_v17 = vsel %vm1215_vm6, %v3424_v19, 0.0  ;;  %v3444_v52 = vsel %vm1215_vm6, %v3426_v47, 0.0 }
0x2a74   :  { %4723 = vmatpush3.bf16.msra.mxu0 %v4720_v16 }
0x2a76   :  { %3442 = vadd.xlane.f32.xlu1 %v3441_v1  ;;  %3436 = vadd.xlane.f32.xlu0 %v3435_v4 }
0x2a77   :  { %4416 = vmatmul.mubr.msk.f32.vlgmr.msra.gmra.mrb[18].mxu0 %vm1215_vm6, %v5810_v10  ;;  %v3428_v10 = vmul.f32 %v5556_v25, %v3419_v38 }
0x2a78   :  { %4418 = vmatprep.mubr.msk.f32.mxu0 %vm1215_vm6, %v5906_v9 }
0x2a79   :  { %v3450_v9 = vsel %vm1215_vm6, %v3428_v10, 0.0 }
0x2a7a   :  { %3448 = vadd.xlane.f32.xlu1 %v3447_v34  ;;  %3439 = vadd.xlane.f32.xlu0 %v3438_v17 }
0x2a7b   :  { %4419 = vmatmul.mubr.msk.f32.gmra.mrb[20].mxu0 %vm1215_vm6, %v6002_v7 }
0x2a7c   :  { %4421 = vmatprep.mubr.msk.f32.mxu0 %vm1215_vm6, %v6097_v43 }
0x2a7e   :  { %3445 = vadd.xlane.f32.xlu0 %v3444_v52 }
0x2a82   :  { %3451 = vadd.xlane.f32.xlu0 %v3450_v9 }
0x2aff   :  { %v3431_v8 = vpop.xlane.xlu0 %3430  ;;  %v3434_v40 = vpop.xlane.xlu1 %3433 }
0x2b00   :  { %v3468_v51 = vrot.slane %v3434_v40, %v5642_v31  ;;  %v3464_v20 = vrot.slane %v3431_v8, %v5642_v31 }
0x2b02   :  { %v3493_v43 = vsel %vm1684_vm11, %v3468_v51, %v3464_v20 }
0x2b03   :  { %v3437_v58 = vpop.xlane.xlu0 %3436  ;;  %v3443_v22 = vpop.xlane.xlu1 %3442 }
0x2b04   :  { %v3472_v7 = vrot.slane %v3437_v58, %v5642_v31  ;;  %v3480_v48 = vrot.slane %v3443_v22, %v5642_v31 }
0x2b06   :  { %v3494_v55 = vsel %vm1686_vm12, %v3472_v7, %v3493_v43 }
0x2b07   :  { %v3440_v41 = vpop.xlane.xlu0 %3439  ;;  %v3449_v23 = vpop.xlane.xlu1 %3448 }
0x2b08   :  { %v3476_v36 = vrot.slane %v3440_v41, %v5642_v31  ;;  %v3488_v57 = vrot.slane %v3449_v23, %v5642_v31 }
0x2b0a   :  { %v3495_v33 = vsel %vm1688_vm13, %v3476_v36, %v3494_v55 }
0x2b0b   :  { %v3446_v29 = vpop.xlane.xlu0 %3445  ;;  %v3496_v32 = vsel %vm1690_vm14, %v3480_v48, %v3495_v33 }
0x2b0c   :  { %v3484_v63 = vrot.slane %v3446_v29, %v5642_v31 }
0x2b0e   :  { %v3497_v30 = vsel %vm1692_vm15, %v3484_v63, %v3496_v32 }
0x2b0f   :  { %v3452_v26 = vpop.xlane.xlu0 %3451  ;;  %v3498_v35 = vsel %vm1694_vm1, %v3488_v57, %v3497_v30 }
0x2b10   :  { %v3492_v45 = vrot.slane %v3452_v26, %v5642_v31 }
0x2b12   :  { %v3499_v37 = vsel %vm1696_vm2, %v3492_v45, %v3498_v35 }
0x2b13   :  { %v3501_v44 = vsel %vm1362_vm3, -1e+30, %v3499_v37 }
0x2b14   :  { %v3502_v46 = vsel %vm1700_vm4, %v3501_v44, -inf }
0x2b15   :  { %v3503_v42 = vrot.slane %v3502_v46, 4 }
0x2b17   :  { %v3504_v53 = vmax.f32 %v3502_v46, %v3503_v42 }
0x2b19   :  { %v3505_v16 = vrot.slane %v3504_v53, 2 }
0x2b1b   :  { %v3506_v38 = vmax.f32 %v3504_v53, %v3505_v16 }
0x2b1d   :  { %v3507_v3 = vrot.slane %v3506_v38, 1 }
0x2b1f   :  { %v3508_v49 = vmax.f32 %v3506_v38, %v3507_v3 }
0x2b21   :  { %v3509_v27 = vsub.f32 %v3501_v44, %v3508_v49 }
0x2b23   :  { %v3510_v50 = vmul.f32 1.442695, %v3509_v27 }
0x2b25   :  { %4892 = vpow2.f32 %v3510_v50 }
0x2b2f   :  { %v4893_v0 = vpop.eup %4892 }
0x2b30   :  { %v3512_v31 = vsel %vm1700_vm4, %v4893_v0, 0.0 }
0x2b31   :  { %v3513_v2 = vrot.slane %v3512_v31, 4 }
0x2b33   :  { %v3514_v1 = vadd.f32 %v3513_v2, %v3512_v31 }
0x2b35   :  { %v3515_v4 = vrot.slane %v3514_v1, 2 }
0x2b37   :  { %v3516_v6 = vadd.f32 %v3515_v4, %v3514_v1 }
0x2b39   :  { %v3517_v56 = vrot.slane %v3516_v6, 1 }
0x2b3b   :  { %v3518_v19 = vadd.f32 %v3517_v56, %v3516_v6 }
0x2b3d   :  { %4894 = vrcp.f32 %v3518_v19 }
0x2b42   :  { %v6166_v34 = vpop.f32.mrb[16].mxu0 }
0x2b43   :  { %v4406_v17 = vpop.f32.mrb[17].mxu0 }
0x2b47   :  { %v4895_v47 = vpop.eup %4894 }
0x2b48   :  { %v3520_v52 = vmul.f32 %v4895_v47, %v4893_v0 }
0x2b4a   :  { %v4417_v10 = vpop.f32.mrb[18].mxu0  ;;  %v3531_v9 = vrot.slane %v3520_v52, %v5198_v62  ;;  %v3524_v8 = vrot.slane %v3520_v52, %v5189_v59  ;;  %v3552_v51 = vrot.slane %v3520_v52, %v5672_v39  ;;  %v3538_v20 = vrot.slane %v3520_v52, %v5675_v24 }
0x2b4b   :  { %v3765_v40 = vpop.f32.mrb[19].mxu0  ;;  %v3566_v22 = vrot.slane %v3520_v52, %v5680_v54  ;;  %v3545_v41 = vrot.slane %v3520_v52, %v5683_v60  ;;  %v3559_v43 = vrot.slane %v3520_v52, %v5688_v61  ;;  %v3573_v36 = vrot.slane %v3520_v52, %v5692_v5 }
0x2b4c   :  { %3533 = vbcast.lane.b32.xlu0 %v3531_v9, 256  ;;  %3526 = vbcast.lane.b32.xlu1 %v3524_v8, 256  ;;  %v6179_v55 = vsel %vm3794_vm0, %v3765_v40, -1e+30 }
0x2b4e   :  { %v4420_v58 = vpop.f32.mrb[20].mxu0 }
0x2b4f   :  { %v3775_v7 = vpop.f32.mrb[21].mxu0  ;;  %v6184_v54 = vsel %vm3794_vm0, %v4420_v58, -1e+30 }
0x2b50   :  { %3554 = vbcast.lane.b32.xlu0 %v3552_v51, 256  ;;  %3540 = vbcast.lane.b32.xlu1 %v3538_v20, 256 }
0x2b54   :  { %3568 = vbcast.lane.b32.xlu0 %v3566_v22, 256  ;;  %3547 = vbcast.lane.b32.xlu1 %v3545_v41, 256 }
0x2b58   :  { %3561 = vbcast.lane.b32.xlu1 %v3559_v43, 256 }
0x2b5c   :  { %3575 = vbcast.lane.b32.xlu1 %v3573_v36, 256 }
0x2b80   :  { %3801 = vmax.xlane.f32.xlu1 %v6179_v55 }
0x2b84   :  { %3807 = vmax.xlane.f32.xlu1 %v6184_v54 }
0x2bbe   :  { %v3534_v33 = vpop.permute.xlu0 %3533  ;;  %v3527_v48 = vpop.permute.xlu1 %3526 }
0x2bbf   :  { %v3578_v29 = vmul.f32 %v5544_v11, %v3534_v33  ;;  %v3577_v5 = vmul.f32 %v3527_v48, %v5546_v12  ;;  %v3867_v48 = vld [vmem:[%s6303_s4] sm:$0x3f] }
0x2bc1   :  { %v3586_v23 = vsel %vm1784_vm5, %v3578_v29, 0.0  ;;  %v3585_v63 = vsel %vm1784_vm5, %v3577_v5, 0.0  ;;  %v3878_v29 = vrot.slane %v3867_v48, %v5198_v62  ;;  %v3885_v5 = vrot.slane %v3867_v48, %v5675_v24 }
0x2bc2   :  { %v3587_v32 = vadd.f32 %v3586_v23, %v3585_v63  ;;  %v3555_v30 = vpop.permute.xlu0 %3554  ;;  %v3541_v57 = vpop.permute.xlu1 %3540  ;;  %v3922_v23 = vld [vmem:[%s6304_s5] sm:$0x3f]  ;;  %v3871_v63 = vrot.slane %v3867_v48, %v5189_v59 }
0x2bc3   :  { %v3579_v26 = vmul.f32 %v3541_v57, %v5550_v14  ;;  %v3581_v44 = vmul.f32 %v3555_v30, %v5554_v21  ;;  %v3926_v30 = vrot.slane %v3922_v23, %v5189_v59  ;;  %v3940_v57 = vrot.slane %v3922_v23, %v5675_v24 }
0x2bc5   :  { %v3588_v45 = vsel %vm1784_vm5, %v3579_v26, 0.0  ;;  %v3592_v16 = vsel %vm1784_vm5, %v3581_v44, 0.0  ;;  %v3892_v26 = vrot.slane %v3867_v48, %v5683_v60 }
0x2bc6   :  { %v3589_v35 = vadd.f32 %v3588_v45, %v3587_v32  ;;  %v3548_v37 = vpop.permute.xlu1 %3547  ;;  %v3569_v11 = vpop.permute.xlu0 %3568  ;;  %v3933_v32 = vrot.slane %v3922_v23, %v5198_v62  ;;  %v3947_v45 = vrot.slane %v3922_v23, %v5683_v60 }
0x2bc7   :  { %v3580_v46 = vmul.f32 %v5548_v13, %v3548_v37  ;;  %v3583_v38 = vmul.f32 %v3569_v11, %v5558_v18  ;;  %v6206_v18 = vsel %vm3794_vm0, %v4417_v10, -1e+30 }
0x2bc9   :  { %v3590_v12 = vsel %vm1784_vm5, %v3580_v46, 0.0  ;;  %v3596_v21 = vsel %vm1784_vm5, %v3583_v38, 0.0 }
0x2bca   :  { %v3591_v42 = vadd.f32 %v3590_v12, %v3589_v35  ;;  %v3562_v53 = vpop.permute.xlu1 %3561  ;;  %v3899_v35 = vrot.slane %v3867_v48, %v5672_v39  ;;  %v3954_v12 = vrot.slane %v3922_v23, %v5672_v39 }
0x2bcb   :  { %v3582_v3 = vmul.f32 %v5552_v15, %v3562_v53  ;;  %v6211_v15 = vsel %vm3794_vm0, %v3775_v7, -1e+30  ;;  %v3961_v53 = vrot.slane %v3922_v23, %v5688_v61 }
0x2bcc   :  { %v3593_v14 = vadd.f32 %v3592_v16, %v3591_v42  ;;  %v3906_v42 = vrot.slane %v3867_v48, %v5688_v61 }
0x2bcd   :  { %v3594_v49 = vsel %vm1784_vm5, %v3582_v3, 0.0 }
0x2bce   :  { %v3595_v27 = vadd.f32 %v3594_v49, %v3593_v14  ;;  %v3576_v50 = vpop.permute.xlu1 %3575 }
0x2bcf   :  { %v3584_v13 = vmul.f32 %v5556_v25, %v3576_v50 }
0x2bd0   :  { %v3597_v0 = vadd.f32 %v3596_v21, %v3595_v27 }
0x2bd1   :  { %v3598_v31 = vsel %vm1784_vm5, %v3584_v13, 0.0 }
0x2bd2   :  { %v3599_v2 = vadd.f32 %v3598_v31, %v3597_v0 }
0x2bd4   :  { %3601 = vrot.lane.b32.xlu0 %v3599_v2, %s4927_s2 }
0x2bf3   :  { %3803 = vmax.xlane.f32.xlu0 %v6206_v18 }
0x2bf7   :  { %3805 = vmax.xlane.f32.xlu0 %v6211_v15 }
0x2c0d   :  { %v6216_v6 = vpop.xlane.xlu1 %3801 }
0x2c0e   :  { %v3813_v17 = vsub.f32 %v6179_v55, %v6216_v6 }
0x2c10   :  { %v3819_v9 = vmul.f32 1.442695, %v3813_v17 }
0x2c11   :  { %v6224_v47 = vpop.xlane.xlu1 %3807 }
0x2c46   :  { %v3602_v1 = vpop.permute.xlu0 %3601 }
0x2c47   :  { %v3673_v25 = vadd.f32 %v6166_v34, %v3602_v1  ;;  %v3816_v34 = vsub.f32 %v6184_v54, %v6224_v47 }
0x2c49   :  { %4896 = vtanh.f32 %v3673_v25  ;;  %v3825_v40 = vmul.f32 1.442695, %v3816_v34 }
0x2c53   :  { %v4897_v4 = vpop.eup %4896 }
0x2c54   :  { %4422 = vmatmul.mubr.msk.f32.gmra.mrb[22].mxu0 %vm1215_vm6, %v4897_v4 }
0x2c80   :  { %v6218_v56 = vpop.xlane.xlu0 %3803 }
0x2c81   :  { %v3814_v19 = vsub.f32 %v6206_v18, %v6218_v56 }
0x2c83   :  { %v3821_v10 = vmul.f32 1.442695, %v3814_v19 }
0x2c84   :  { %v6226_v52 = vpop.xlane.xlu0 %3805 }
0x2c85   :  { %v3815_v8 = vsub.f32 %v6211_v15, %v6226_v52  ;;  %4898 = vpow2.f32 %v3821_v10 }
0x2c86   :  { %4900 = vpow2.f32 %v3819_v9 }
0x2c87   :  { %v3823_v58 = vmul.f32 1.442695, %v3815_v8  ;;  %4902 = vpow2.f32 %v3825_v40 }
0x2c89   :  { %4904 = vpow2.f32 %v3823_v58 }
0x2c8f   :  { %v4899_v41 = vpop.eup %4898 }
0x2c90   :  { %v4901_v43 = vpop.eup %4900 }
0x2c91   :  { %v4903_v36 = vpop.eup %4902 }
0x2c93   :  { %v4905_v33 = vpop.eup %4904 }
0x2d27   :  { %v4423_v51 = vpop.f32.mrb[22].mxu0 }
0x2d28   :  { %v6234_v20 = vsel %vm3794_vm0, %v4423_v51, -1e+30  ;;  %v3785_v7 = vpop.f32.mrb[23].mxu0 }
0x2d29   :  { %v6238_v22 = vsel %vm3794_vm0, %v3785_v7, -1e+30  ;;  %3811 = vmax.xlane.f32.xlu1 %v6234_v20 }
0x2d2a   :  { %3809 = vmax.xlane.f32.xlu0 %v6238_v22 }
0x2d2d   :  { %3833 = vadd.xlane.f32.xlu1 %v4899_v41 }
0x2d2e   :  { %3831 = vadd.xlane.f32.xlu0 %v4901_v43 }
0x2d31   :  { %3837 = vadd.xlane.f32.xlu1 %v4903_v36 }
0x2d32   :  { %3835 = vadd.xlane.f32.xlu0 %v4905_v33 }
0x2d42   :  { %3880 = vbcast.lane.b32.xlu1 %v3878_v29, 256 }
0x2d46   :  { %3887 = vbcast.lane.b32.xlu1 %v3885_v5, 256 }
0x2d48   :  { %3873 = vbcast.lane.b32.xlu0 %v3871_v63, 256 }
0x2d4a   :  { %3935 = vbcast.lane.b32.xlu1 %v3933_v32, 256 }
0x2d4c   :  { %3928 = vbcast.lane.b32.xlu0 %v3926_v30, 256 }
0x2d4e   :  { %3942 = vbcast.lane.b32.xlu1 %v3940_v57, 256 }
0x2d50   :  { %3894 = vbcast.lane.b32.xlu0 %v3892_v26, 256 }
0x2d52   :  { %3949 = vbcast.lane.b32.xlu1 %v3947_v45, 256 }
0x2d54   :  { %3901 = vbcast.lane.b32.xlu0 %v3899_v35, 256 }
0x2db6   :  { %v6257_v37 = vpop.xlane.xlu1 %3811 }
0x2db7   :  { %v3818_v62 = vsub.f32 %v6234_v20, %v6257_v37  ;;  %v6261_v59 = vpop.xlane.xlu0 %3809 }
0x2db8   :  { %v3817_v24 = vsub.f32 %v6238_v22, %v6261_v59 }
0x2db9   :  { %v3829_v44 = vmul.f32 1.442695, %v3818_v62 }
0x2dba   :  { %v3827_v46 = vmul.f32 1.442695, %v3817_v24  ;;  %v3834_v16 = vpop.xlane.xlu1 %3833 }
0x2dbb   :  { %4906 = vpow2.f32 %v3829_v44  ;;  %v3832_v3 = vpop.xlane.xlu0 %3831 }
0x2dbc   :  { %4908 = vpow2.f32 %v3827_v46 }
0x2dbd   :  { %4910 = vlog2.f32 %v3834_v16 }
0x2dbe   :  { %v3838_v38 = vpop.xlane.xlu1 %3837  ;;  %4912 = vlog2.f32 %v3832_v3 }
0x2dbf   :  { %v3836_v49 = vpop.xlane.xlu0 %3835 }
0x2dc0   :  { %4914 = vlog2.f32 %v3836_v49 }
0x2dc1   :  { %4916 = vlog2.f32 %v3838_v38 }
0x2dc2   :  { %v3881_v14 = vpop.permute.xlu1 %3880 }
0x2dc3   :  { %v3874_v50 = vpop.permute.xlu0 %3873  ;;  %vm3911_vm6 = vcmp.eq.s32.totalorder %v5638_v28, %v3881_v14 }
0x2dc4   :  { %vm3910_vm7 = vcmp.eq.s32.totalorder %v5638_v28, %v3874_v50 }
0x2dc5   :  { %v4907_v60 = vpop.eup %4906 }
0x2dc6   :  { %v4909_v11 = vpop.eup %4908  ;;  %3841 = vadd.xlane.f32.xlu1 %v4907_v60  ;;  %v3888_v27 = vpop.permute.xlu1 %3887 }
0x2dc7   :  { %3839 = vadd.xlane.f32.xlu0 %v4909_v11  ;;  %v3929_v13 = vpop.permute.xlu0 %3928  ;;  %v4911_v0 = vpop.eup %4910  ;;  %vm3912_vm8 = vcmp.eq.s32.totalorder %v5638_v28, %v3888_v27 }
0x2dc8   :  { %v4913_v31 = vpop.eup %4912  ;;  %v3846_v61 = vmul.f32 0.6931472, %v4911_v0 }
0x2dc9   :  { %v3844_v25 = vmul.f32 0.6931472, %v4913_v31 }
0x2dca   :  { %v3936_v21 = vpop.permute.xlu1 %3935  ;;  %v4915_v1 = vpop.eup %4914  ;;  %v3856_v34 = vadd.f32 %v3846_v61, %v6218_v56 }
0x2dcb   :  { %v3895_v2 = vpop.permute.xlu0 %3894  ;;  %v3848_v19 = vmul.f32 0.6931472, %v4915_v1  ;;  %v3855_v10 = vadd.f32 %v3844_v25, %v6216_v6  ;;  %v4917_v9 = vpop.eup %4916 }
0x2dcc   :  { %v3850_v51 = vmul.f32 0.6931472, %v4917_v9  ;;  %v3862_v41 = vsub.f32 %v6206_v18, %v3856_v34  ;;  %vm3913_vm9 = vcmp.eq.s32.totalorder %v5638_v28, %v3895_v2 }
0x2dcd   :  { %v3857_v40 = vadd.f32 %v3848_v19, %v6226_v52  ;;  %v3861_v7 = vsub.f32 %v6179_v55, %v3855_v10 }
0x2dce   :  { %v3943_v39 = vpop.permute.xlu1 %3942  ;;  %v3858_v6 = vadd.f32 %v3850_v51, %v6224_v47  ;;  %v3917_v52 = vsel %vm3911_vm6, %v3862_v41, 0.0 }
0x2dcf   :  { %v3902_v17 = vpop.permute.xlu0 %3901  ;;  %v3863_v56 = vsub.f32 %v6211_v15, %v3857_v40  ;;  %v3916_v43 = vsel %vm3910_vm7, %v3861_v7, 0.0  ;;  %v3966_v48 = vmul.f32 %v3936_v21, %v3917_v52 }
0x2dd0   :  { %v3965_v33 = vmul.f32 %v3929_v13, %v3916_v43  ;;  %v3864_v55 = vsub.f32 %v6184_v54, %v3858_v6  ;;  %vm3914_vm11 = vcmp.eq.s32.totalorder %v5638_v28, %v3902_v17 }
0x2dd1   :  { %v3918_v36 = vsel %vm3912_vm8, %v3863_v56, 0.0 }
0x2dd2   :  { %v3950_v4 = vpop.permute.xlu1 %3949  ;;  %v3967_v18 = vmul.f32 %v3943_v39, %v3918_v36  ;;  %v3971_v15 = vadd.f32 %v3966_v48, %v3965_v33  ;;  %v3919_v57 = vsel %vm3913_vm9, %v3864_v55, 0.0 }
0x2dd3   :  { %v3968_v45 = vmul.f32 %v3950_v4, %v3919_v57 }
0x2dd4   :  { %v3972_v26 = vadd.f32 %v3971_v15, %v3967_v18 }
0x2dd6   :  { %v3973_v60 = vadd.f32 %v3972_v26, %v3968_v45 }
0x2dd7   :  { %3956 = vbcast.lane.b32.xlu1 %v3954_v12, 256 }
0x2ddd   :  { %3908 = vbcast.lane.b32.xlu0 %v3906_v42, 256 }
0x2de1   :  { %3963 = vbcast.lane.b32.xlu0 %v3961_v53, 256 }
0x2e53   :  { %v3842_v8 = vpop.xlane.xlu1 %3841 }
0x2e54   :  { %4918 = vlog2.f32 %v3842_v8  ;;  %v3840_v58 = vpop.xlane.xlu0 %3839 }
0x2e55   :  { %4920 = vlog2.f32 %v3840_v58 }
0x2e57   :  { %v3957_v62 = vpop.permute.xlu1 %3956 }
0x2e58   :  { %v3909_v32 = vpop.permute.xlu0 %3908 }
0x2e59   :  { %vm3915_vm10 = vcmp.eq.s32.totalorder %v5638_v28, %v3909_v32 }
0x2e5c   :  { %v3964_v24 = vpop.permute.xlu0 %3963 }
0x2e5e   :  { %v4919_v29 = vpop.eup %4918 }
0x2e5f   :  { %v4921_v5 = vpop.eup %4920  ;;  %v3854_v23 = vmul.f32 0.6931472, %v4919_v29 }
0x2e60   :  { %v3852_v63 = vmul.f32 0.6931472, %v4921_v5 }
0x2e61   :  { %v3860_v30 = vadd.f32 %v3854_v23, %v6257_v37 }
0x2e62   :  { %v3859_v47 = vadd.f32 %v3852_v63, %v6261_v59 }
0x2e63   :  { %v3866_v35 = vsub.f32 %v6234_v20, %v3860_v30 }
0x2e64   :  { %v3865_v54 = vsub.f32 %v6238_v22, %v3859_v47 }
0x2e65   :  { %v3921_v44 = vsel %vm3915_vm10, %v3866_v35, 0.0 }
0x2e66   :  { %v3920_v46 = vsel %vm3914_vm11, %v3865_v54, 0.0  ;;  %v3970_v37 = vmul.f32 %v3964_v24, %v3921_v44 }
0x2e67   :  { %v3969_v11 = vmul.f32 %v3957_v62, %v3920_v46 }
0x2e69   :  { %v3974_v12 = vadd.f32 %v3973_v60, %v3969_v11 }
0x2e6b   :  { %v3975_v42 = vadd.f32 %v3974_v12, %v3970_v37 }
0x2e6d   :  { %3976 = vadd.xlane.f32.xlu1 %v3975_v42 }
0x2efa   :  { %v3977_v59 = vpop.xlane.xlu1 %3976 }
0x2efb   :  { %3978 = vst [vmem:[%s6305_s16] sm:$0xff] %v3977_v59 }

</bundles_post_ra>
